<compile_context>
chip_gen: v7x
topology: tpu7x:2x2x1
jax: 0.10.0
libtpu: 0.0.40
codegen_flags: <defaults>
</compile_context>

<pallas_src>
import math

import numpy as np
import jax
import jax.numpy as jnp
from jax.experimental import pallas as pl
from jax.experimental.pallas import tpu as pltpu

PAD1_H, PAD1_W = 2, 8    # 5x5 depthwise halo: exact reach in H, 8-aligned in W (sublane)
PAD2_H, PAD2_W = 10, 16  # 21-tap strip halo: exact reach in H, 16-aligned in W
I32_MIN = -2147483648
I32_MAX = 2147483647


def _gelu_tanh(x):
    # tanh-form GELU: one EUP transcendental instead of a 10-op VPU polynomial.
    c = 0.7978845608028654  # sqrt(2/pi)
    return 0.5 * x * (1.0 + jnp.tanh(c * (x + 0.044715 * x * x * x)))


def mecs_kernel(x_ref, pw_w_ref, pw_b_ref, fc1_w_ref, fc1_b_ref,
                fc2_w_ref, fc2_b_ref, dw5_ref, dw5b_ref,
                wh_ref, wv_ref, stripb_ref,
                o_ref, buf1_ref, buf2_ref):
    _, H, W, C = x_ref.shape
    HW = H * W

    # 1x1 conv == per-pixel matmul over channels; bf16 operands (pre-cast
    # weight), f32 accumulation on the MXU.
    pw_w = pw_w_ref[...]                      # bf16 (C, C)
    pw_b = pw_b_ref[...]                      # f32  (1, C)

    def pointwise(t):
        t2 = t.reshape(HW, C).astype(jnp.bfloat16)
        y = jnp.dot(t2, pw_w, preferred_element_type=jnp.float32) + pw_b
        return y.reshape(1, H, W, C)

    # ---- pointwise conv + GELU ---------------------------------------------
    xg = _gelu_tanh(pointwise(x_ref[...]))

    # ---- channel attention: avg / max / median pooling + MLP on the MXU ----
    xg2 = xg.reshape(HW, C)
    ones_avg = jnp.full((1, HW), 1.0 / float(HW), jnp.float32)
    avg_p = jnp.dot(ones_avg, xg2, preferred_element_type=jnp.float32)   # (1, C)
    max_p = jnp.max(xg2, axis=0, keepdims=True)                          # (1, C)

    # Exact lower median (torch.median) via 32-step binary search on an
    # order-preserving int32 key; the per-pass count goes to the MXU.
    ib = pltpu.bitcast(xg2, jnp.int32)
    i32min = jnp.int32(I32_MIN)
    key = jnp.where(ib < 0, i32min - ib, ib)          # monotone f32 -> i32 map
    kk = jnp.float32((HW - 1) // 2 + 1)               # need count(key <= m) >= kk
    ones_cnt = jnp.ones((1, HW), jnp.bfloat16)

    def bs_body(_, carry):
        lo, hi = carry                                # invariant: answer in (lo, hi]
        mid = ((lo ^ hi) >> 1) + (lo & hi)            # floor((lo+hi)/2), no overflow
        mask = (key <= mid).astype(jnp.bfloat16)      # 0/1 values, exact
        cnt = jnp.dot(ones_cnt, mask, preferred_element_type=jnp.float32)  # (1, C)
        ge = cnt >= kk
        return jnp.where(ge, lo, mid), jnp.where(ge, mid, hi)

    lo0 = jnp.full((1, C), i32min, jnp.int32)
    hi0 = jnp.full((1, C), jnp.int32(I32_MAX), jnp.int32)
    _, key_med = jax.lax.fori_loop(0, 32, bs_body, (lo0, hi0))
    med_p = pltpu.bitcast(jnp.where(key_med < 0, i32min - key_med, key_med),
                          jnp.float32)                                # (1, C)

    # tiny MLP on the MXU: one (3,C)x(C,Ci) and one (3,Ci)x(Ci,C) matmul
    p3 = jnp.concatenate([avg_p, max_p, med_p], axis=0)               # (3, C)
    h = jnp.maximum(
        jnp.dot(p3, fc1_w_ref[...], preferred_element_type=jnp.float32)
        + fc1_b_ref[...], 0.0)
    o3 = jnp.dot(h, fc2_w_ref[...], preferred_element_type=jnp.float32) + fc2_b_ref[...]
    att = jax.nn.sigmoid(jnp.sum(o3, axis=0, keepdims=True))          # (1, C)

    x_att = xg * att.reshape(1, 1, 1, C)

    # ---- depthwise section: padded scratch buffers + shifted slices --------
    # Halos never change and interiors are fully rewritten every step, so
    # zero the halo margins only on the first grid step (batch axis is
    # "arbitrary" => one core owns the scratch).
    @pl.when(pl.program_id(0) == 0)
    def _():
        buf1_ref[:, :PAD1_H, :, :] = jnp.zeros((1, PAD1_H, W + 2 * PAD1_W, C), jnp.float32)
        buf1_ref[:, PAD1_H + H:, :, :] = jnp.zeros((1, PAD1_H, W + 2 * PAD1_W, C), jnp.float32)
        buf1_ref[:, PAD1_H:PAD1_H + H, :PAD1_W, :] = jnp.zeros((1, H, PAD1_W, C), jnp.float32)
        buf1_ref[:, PAD1_H:PAD1_H + H, PAD1_W + W:, :] = jnp.zeros((1, H, PAD1_W, C), jnp.float32)
        buf2_ref[:, :PAD2_H, :, :] = jnp.zeros((1, PAD2_H, W + 2 * PAD2_W, C), jnp.float32)
        buf2_ref[:, PAD2_H + H:, :, :] = jnp.zeros((1, PAD2_H, W + 2 * PAD2_W, C), jnp.float32)
        buf2_ref[:, PAD2_H:PAD2_H + H, :PAD2_W, :] = jnp.zeros((1, H, PAD2_W, C), jnp.float32)
        buf2_ref[:, PAD2_H:PAD2_H + H, PAD2_W + W:, :] = jnp.zeros((1, H, PAD2_W, C), jnp.float32)

    # x_att lives in buf1's interior (re-read later for the final gating mul)
    buf1_ref[:, PAD1_H:PAD1_H + H, PAD1_W:PAD1_W + W, :] = x_att

    # initial 5x5 depthwise conv (padding 2); accumulator in f32,
    # first tap + bias folded into the init (no zero slab).
    # TODO(synk): on v6e/v7x the scratch/taps could be bf16 with f32 acc.
    dw5 = dw5_ref[...]                                                # (5, 5, C)

    def tap5(dh, dw):
        return buf1_ref[:, PAD1_H - 2 + dh:PAD1_H - 2 + dh + H,
                        PAD1_W - 2 + dw:PAD1_W - 2 + dw + W, :]

    acc = dw5[0, 0, :] * tap5(0, 0) + dw5b_ref[...].reshape(1, 1, 1, C)
    for dh in range(5):
        for dw in range(5):
            if dh == 0 and dw == 0:
                continue
            acc = acc + dw5[dh, dw, :] * tap5(dh, dw)
    buf2_ref[:, PAD2_H:PAD2_H + H, PAD2_W:PAD2_W + W, :] = acc

    # folded strip convs: one 1x21 + one 21x1 (weights pre-summed in wrapper)
    # TODO(synk): the unaligned W-offset taps could use pltpu.roll (XLU)
    #             instead of 25 masked sublane slices to offload vld/VALU.
    wh = wh_ref[...]                                                  # (21, C)
    wv = wv_ref[...]                                                  # (21, C)

    def taph(d):
        return buf2_ref[:, PAD2_H:PAD2_H + H,
                        PAD2_W - 10 + d:PAD2_W - 10 + d + W, :]

    def tapv(d):
        return buf2_ref[:, PAD2_H - 10 + d:PAD2_H - 10 + d + H,
                        PAD2_W:PAD2_W + W, :]

    sp = wh[0, :] * taph(0) + stripb_ref[...].reshape(1, 1, 1, C)
    for d in range(1, 21):
        sp = sp + wh[d, :] * taph(d)
    for d in range(21):
        sp = sp + wv[d, :] * tapv(d)

    spatial_att = pointwise(sp)
    x_att_back = buf1_ref[:, PAD1_H:PAD1_H + H, PAD1_W:PAD1_W + W, :]
    o_ref[...] = pointwise(spatial_att * x_att_back)


def _combine_strips(w_a7, w_a11, w_a21):
    """Sum zero-padded 7/11/21-tap depthwise kernels into one 21-tap kernel."""
    wc = w_a21.astype(jnp.float32)            # (21, C)
    wc = wc.at[7:14].add(w_a7)                # center-aligned 7 taps
    wc = wc.at[5:16].add(w_a11)               # center-aligned 11 taps
    return wc


def mecs_forward(x_nchw, params):
    """x_nchw: (B, C, H, W) float32 (PyTorch layout)."""
    x = jnp.transpose(x_nchw, (0, 2, 3, 1)).astype(jnp.float32)       # -> NHWC
    B, H, W, C = x.shape
    Cp = ((C + 127) // 128) * 128                                     # lane-pad channels
    Ci = params['fc1_w'].shape[1]

    wh = _combine_strips(params['w1x7'], params['w1x11'], params['w1x21'])
    wv = _combine_strips(params['w7x1'], params['w11x1'], params['w21x1'])
    strip_b = jnp.sum(params['db'][1:7], axis=0, keepdims=True)       # (1, C)
    dw5_b = params['db'][0:1]                                         # (1, C)

    def padc(a, axes):
        widths = [(0, 0)] * a.ndim
        for ax in axes:
            widths[ax] = (0, Cp - a.shape[ax])
        return jnp.pad(a, widths)

    inputs = (
        padc(x, [3]),
        padc(params['pw_w'], [0, 1]).astype(jnp.bfloat16),            # pre-cast to bf16
        padc(params['pw_b'], [1]),
        padc(params['fc1_w'], [0]),
        params['fc1_b'],
        padc(params['fc2_w'], [1]),
        padc(params['fc2_b'], [1]),
        padc(params['dw5'], [2]),
        padc(dw5_b, [1]),
        padc(wh, [1]),
        padc(wv, [1]),
        padc(strip_b, [1]),
    )

    const2 = lambda b: (0, 0)
    in_specs = [
        pl.BlockSpec((1, H, W, Cp), lambda b: (b, 0, 0, 0)),          # x
        pl.BlockSpec((Cp, Cp), const2),                               # pw_w (bf16)
        pl.BlockSpec((1, Cp), const2),                                # pw_b
        pl.BlockSpec((Cp, Ci), const2),                               # fc1_w
        pl.BlockSpec((1, Ci), const2),                                # fc1_b
        pl.BlockSpec((Ci, Cp), const2),                               # fc2_w
        pl.BlockSpec((1, Cp), const2),                                # fc2_b
        pl.BlockSpec((5, 5, Cp), lambda b: (0, 0, 0)),                # dw5
        pl.BlockSpec((1, Cp), const2),                                # dw5 bias
        pl.BlockSpec((21, Cp), const2),                               # combined 1x21
        pl.BlockSpec((21, Cp), const2),                               # combined 21x1
        pl.BlockSpec((1, Cp), const2),                                # combined strip bias
    ]
    # TODO(synk): pipeline_mode=pl.Buffered(1) on the constant weight specs
    #             would halve their VMEM residency on v7x.

    out = pl.pallas_call(
        mecs_kernel,
        grid=(B,),
        in_specs=in_specs,
        out_specs=pl.BlockSpec((1, H, W, Cp), lambda b: (b, 0, 0, 0)),
        out_shape=jax.ShapeDtypeStruct((B, H, W, Cp), jnp.float32),
        scratch_shapes=[
            pltpu.VMEM((1, H + 2 * PAD1_H, W + 2 * PAD1_W, Cp), jnp.float32),
            pltpu.VMEM((1, H + 2 * PAD2_H, W + 2 * PAD2_W, Cp), jnp.float32),
        ],
        # "arbitrary" so the halo-zeroing hoist (program_id==0) is correct on
        # every generation; TODO(synk): add a row-strip "parallel" axis for v7x.
        compiler_params=pltpu.CompilerParams(
            dimension_semantics=("arbitrary",),
            vmem_limit_bytes=48 * 1024 * 1024),
    )(*inputs)

    out = out[:, :, :, :C]
    return jnp.transpose(out, (0, 3, 1, 2))                           # -> NCHW


def init_params(key, C, reduce=4):
    """Deterministic synthetic parameters (shapes follow MECS.__init__)."""
    Ci = C // reduce
    ks = jax.random.split(key, 14)

    def u(k, shape, fan_in):
        b = 1.0 / math.sqrt(fan_in)
        return jax.random.uniform(k, shape, jnp.float32, -b, b)

    return dict(
        pw_w=u(ks[0], (C, C), C),        # pointwise_conv: (C_in, C_out)
        pw_b=u(ks[1], (1, C), C),
        fc1_w=u(ks[2], (C, Ci), C),      # channel_attention.fc1
        fc1_b=u(ks[3], (1, Ci), C),
        fc2_w=u(ks[4], (Ci, C), Ci),     # channel_attention.fc2
        fc2_b=u(ks[5], (1, C), Ci),
        dw5=u(ks[6], (5, 5, C), 25),     # initial_depth_conv (depthwise 5x5)
        w1x7=u(ks[7], (7, C), 7),
        w7x1=u(ks[8], (7, C), 7),
        w1x11=u(ks[9], (11, C), 11),
        w11x1=u(ks[10], (11, C), 11),
        w1x21=u(ks[11], (21, C), 21),
        w21x1=u(ks[12], (21, C), 21),
        db=u(ks[13], (7, C), 25),        # depthwise biases [5x5,1x7,7x1,1x11,11x1,1x21,21x1]
    )


def mecs_reference(x_nchw, params):
    """Pure-JAX f32 reference (exact erf GELU, same parameter layout)."""
    x = jnp.transpose(x_nchw, (0, 2, 3, 1)).astype(jnp.float32)
    B, H, W, C = x.shape
    HI = jax.lax.Precision.HIGHEST

    def pointwise(t):
        return (jnp.einsum('bhwc,cd->bhwd', t, params['pw_w'], precision=HI)
                + params['pw_b'].reshape(1, 1, 1, C))

    def dwconv(t, w, ph, pw):
        rhs = w[:, :, None, :]            # (kh, kw, 1, C)
        return jax.lax.conv_general_dilated(
            t, rhs, (1, 1), ((ph, ph), (pw, pw)),
            dimension_numbers=('NHWC', 'HWIO', 'NHWC'),
            feature_group_count=C, precision=HI)

    xg = jax.nn.gelu(pointwise(x), approximate=False)
    avg_p = jnp.mean(xg, axis=(1, 2))
    max_p = jnp.max(xg, axis=(1, 2))
    med_p = jnp.sort(xg.reshape(B, H * W, C), axis=1)[:, (H * W - 1) // 2, :]

    def mlp(p):
        h = jnp.maximum(jnp.dot(p, params['fc1_w'], precision=HI) + params['fc1_b'], 0.0)
        return jnp.dot(h, params['fc2_w'], precision=HI) + params['fc2_b']

    att = jax.nn.sigmoid(mlp(avg_p) + mlp(max_p) + mlp(med_p))
    x_att = xg * att[:, None, None, :]

    init = dwconv(x_att, params['dw5'], 2, 2) + params['db'][0]
    sp = (dwconv(init, params['w1x7'][None, :, :], 0, 3) + params['db'][1]
          + dwconv(init, params['w7x1'][:, None, :], 3, 0) + params['db'][2]
          + dwconv(init, params['w1x11'][None, :, :], 0, 5) + params['db'][3]
          + dwconv(init, params['w11x1'][:, None, :], 5, 0) + params['db'][4]
          + dwconv(init, params['w1x21'][None, :, :], 0, 10) + params['db'][5]
          + dwconv(init, params['w21x1'][:, None, :], 10, 0) + params['db'][6])
    out = pointwise(pointwise(sp) * x_att)
    return jnp.transpose(out, (0, 3, 1, 2))


if __name__ == "__main__":
    B, C, H, W = 2, 8, 8, 8                      # in_channels == out_channels
    key = jax.random.PRNGKey(0)
    kx, kp = jax.random.split(key)
    x = jax.random.normal(kx, (B, C, H, W), jnp.float32)   # NCHW like PyTorch
    params = init_params(kp, C, reduce=4)

    out = mecs_forward(x, params)
    out = jax.block_until_ready(out)
    assert out.shape == (B, C, H, W)
    assert bool(jnp.all(jnp.isfinite(out)))

    ref = mecs_reference(x, params)
    np.testing.assert_allclose(np.asarray(out), np.asarray(ref), rtol=5e-2, atol=5e-2)

    print("KERNEL_OK")
</pallas_src>

<mosaic_0001>
module attributes {stable_mosaic.version = 11 : i64} {
  func.func @mecs_kernel(%arg0: i32, %arg1: memref<1x8x8x128xf32, #tpu.memory_space<vmem>>, %arg2: memref<128x128xbf16, #tpu.memory_space<vmem>>, %arg3: memref<1x128xf32, #tpu.memory_space<vmem>>, %arg4: memref<128x2xf32, #tpu.memory_space<vmem>>, %arg5: memref<1x2xf32, #tpu.memory_space<vmem>>, %arg6: memref<2x128xf32, #tpu.memory_space<vmem>>, %arg7: memref<1x128xf32, #tpu.memory_space<vmem>>, %arg8: memref<5x5x128xf32, #tpu.memory_space<vmem>>, %arg9: memref<1x128xf32, #tpu.memory_space<vmem>>, %arg10: memref<21x128xf32, #tpu.memory_space<vmem>>, %arg11: memref<21x128xf32, #tpu.memory_space<vmem>>, %arg12: memref<1x128xf32, #tpu.memory_space<vmem>>, %arg13: memref<1x8x8x128xf32, #tpu.memory_space<vmem>>, %arg14: memref<1x12x24x128xf32, #tpu.memory_space<vmem>>, %arg15: memref<1x28x40x128xf32, #tpu.memory_space<vmem>>) attributes {dimension_semantics = [#tpu.dimension_semantics<arbitrary>], iteration_bounds = array<i64: 2>, scalar_prefetch = 0 : i64, scratch_operands = 2 : i64, tpu.core_type = #tpu.core_type<tc>, window_params = [{transform_indices = @transform_0, window_bounds = array<i64: 1, 8, 8, 128>}, {pipeline_mode = #tpu.pipeline_mode<synchronous>, transform_indices = @transform_1, window_bounds = array<i64: 128, 128>}, {pipeline_mode = #tpu.pipeline_mode<synchronous>, transform_indices = @transform_2, window_bounds = array<i64: 1, 128>}, {pipeline_mode = #tpu.pipeline_mode<synchronous>, transform_indices = @transform_3, window_bounds = array<i64: 128, 2>}, {pipeline_mode = #tpu.pipeline_mode<synchronous>, transform_indices = @transform_4, window_bounds = array<i64: 1, 2>}, {pipeline_mode = #tpu.pipeline_mode<synchronous>, transform_indices = @transform_5, window_bounds = array<i64: 2, 128>}, {pipeline_mode = #tpu.pipeline_mode<synchronous>, transform_indices = @transform_6, window_bounds = array<i64: 1, 128>}, {pipeline_mode = #tpu.pipeline_mode<synchronous>, transform_indices = @transform_7, window_bounds = array<i64: 5, 5, 128>}, {pipeline_mode = #tpu.pipeline_mode<synchronous>, transform_indices = @transform_8, window_bounds = array<i64: 1, 128>}, {pipeline_mode = #tpu.pipeline_mode<synchronous>, transform_indices = @transform_9, window_bounds = array<i64: 21, 128>}, {pipeline_mode = #tpu.pipeline_mode<synchronous>, transform_indices = @transform_10, window_bounds = array<i64: 21, 128>}, {pipeline_mode = #tpu.pipeline_mode<synchronous>, transform_indices = @transform_11, window_bounds = array<i64: 1, 128>}, {transform_indices = @transform_12, window_bounds = array<i64: 1, 8, 8, 128>}]} {
    %c0 = arith.constant 0 : index
    %c0_0 = arith.constant 0 : index
    %0 = vector.load %arg2[%c0, %c0_0] : memref<128x128xbf16, #tpu.memory_space<vmem>>, vector<128x128xbf16>
    %c0_1 = arith.constant 0 : index
    %c0_2 = arith.constant 0 : index
    %1 = vector.load %arg3[%c0_1, %c0_2] : memref<1x128xf32, #tpu.memory_space<vmem>>, vector<1x128xf32>
    %c0_3 = arith.constant 0 : index
    %c0_4 = arith.constant 0 : index
    %c0_5 = arith.constant 0 : index
    %c0_6 = arith.constant 0 : index
    %2 = vector.load %arg1[%c0_3, %c0_4, %c0_5, %c0_6] : memref<1x8x8x128xf32, #tpu.memory_space<vmem>>, vector<1x8x8x128xf32>
    %3 = vector.shape_cast %2 : vector<1x8x8x128xf32> to vector<64x128xf32>
    %4 = arith.truncf %3 : vector<64x128xf32> to vector<64x128xbf16>
    %cst = arith.constant dense<0.000000e+00> : vector<64x128xf32>
    %5 = tpu.matmul %4, %0, %cst {dimension_numbers = #tpu.dot_dimension_numbers<[1], [0], [0], [1], [0, 0, 1, 1], [], []>} : vector<64x128xbf16>, vector<128x128xbf16>, vector<64x128xf32> -> vector<64x128xf32>
    %6 = vector.broadcast %1 : vector<1x128xf32> to vector<64x128xf32>
    %7 = arith.addf %5, %6 : vector<64x128xf32>
    %8 = vector.shape_cast %7 : vector<64x128xf32> to vector<1x8x8x128xf32>
    %cst_7 = arith.constant 5.000000e-01 : f32
    %9 = vector.broadcast %cst_7 : f32 to vector<1x8x8x128xf32>
    %10 = arith.mulf %9, %8 : vector<1x8x8x128xf32>
    %cst_8 = arith.constant 4.471500e-02 : f32
    %11 = vector.broadcast %cst_8 : f32 to vector<1x8x8x128xf32>
    %12 = arith.mulf %11, %8 : vector<1x8x8x128xf32>
    %13 = arith.mulf %12, %8 : vector<1x8x8x128xf32>
    %14 = arith.mulf %13, %8 : vector<1x8x8x128xf32>
    %15 = arith.addf %8, %14 : vector<1x8x8x128xf32>
    %cst_9 = arith.constant 0.797884583 : f32
    %16 = vector.broadcast %cst_9 : f32 to vector<1x8x8x128xf32>
    %17 = arith.mulf %16, %15 : vector<1x8x8x128xf32>
    %18 = math.tanh %17 : vector<1x8x8x128xf32>
    %cst_10 = arith.constant 1.000000e+00 : f32
    %19 = vector.broadcast %cst_10 : f32 to vector<1x8x8x128xf32>
    %20 = arith.addf %19, %18 : vector<1x8x8x128xf32>
    %21 = arith.mulf %10, %20 : vector<1x8x8x128xf32>
    %22 = vector.shape_cast %21 : vector<1x8x8x128xf32> to vector<64x128xf32>
    %cst_11 = arith.constant 1.562500e-02 : f32
    %23 = vector.broadcast %cst_11 : f32 to vector<1x64xf32>
    %cst_12 = arith.constant dense<0.000000e+00> : vector<1x128xf32>
    %24 = tpu.matmul %23, %22, %cst_12 {dimension_numbers = #tpu.dot_dimension_numbers<[1], [0], [0], [1], [0, 0, 1, 1], [], []>} : vector<1x64xf32>, vector<64x128xf32>, vector<1x128xf32> -> vector<1x128xf32>
    %cst_13 = arith.constant dense<0xFF800000> : vector<128xf32>
    %25 = vector.multi_reduction <maximumf>, %22, %cst_13 [0] : vector<64x128xf32> to vector<128xf32>
    %26 = vector.shape_cast %25 : vector<128xf32> to vector<1x128xf32>
    %27 = tpu.bitcast %22 : vector<64x128xf32> -> vector<64x128xi32>
    %c0_i32 = arith.constant 0 : i32
    %28 = vector.broadcast %c0_i32 : i32 to vector<64x128xi32>
    %29 = arith.cmpi slt, %27, %28 : vector<64x128xi32>
    %c-2147483648_i32 = arith.constant -2147483648 : i32
    %30 = vector.broadcast %c-2147483648_i32 : i32 to vector<64x128xi32>
    %31 = arith.subi %30, %27 : vector<64x128xi32>
    %32 = arith.select %29, %31, %27 : vector<64x128xi1>, vector<64x128xi32>
    %cst_14 = arith.constant 1.000000e+00 : bf16
    %33 = vector.broadcast %cst_14 : bf16 to vector<1x64xbf16>
    %c-2147483648_i32_15 = arith.constant -2147483648 : i32
    %34 = vector.broadcast %c-2147483648_i32_15 : i32 to vector<1x128xi32>
    %c2147483647_i32 = arith.constant 2147483647 : i32
    %35 = vector.broadcast %c2147483647_i32 : i32 to vector<1x128xi32>
    %cst_16 = arith.constant 3.200000e+01 : f32
    %c0_i32_17 = arith.constant 0 : i32
    %c32_i32 = arith.constant 32 : i32
    %36 = arith.addi %c0_i32_17, %c32_i32 : i32
    %c1_i32 = arith.constant 1 : i32
    %37:2 = scf.for %arg16 = %c0_i32_17 to %36 step %c1_i32 iter_args(%arg17 = %34, %arg18 = %35) -> (vector<1x128xi32>, vector<1x128xi32>)  : i32 {
      %565 = arith.xori %arg17, %arg18 : vector<1x128xi32>
      %c1_i32_306 = arith.constant 1 : i32
      %566 = vector.broadcast %c1_i32_306 : i32 to vector<1x128xi32>
      %567 = arith.shrsi %565, %566 : vector<1x128xi32>
      %568 = arith.andi %arg17, %arg18 : vector<1x128xi32>
      %569 = arith.addi %567, %568 : vector<1x128xi32>
      %570 = vector.broadcast %569 : vector<1x128xi32> to vector<64x128xi32>
      %571 = arith.cmpi sle, %32, %570 : vector<64x128xi32>
      %572 = arith.extui %571 : vector<64x128xi1> to vector<64x128xi32>
      %573 = arith.sitofp %572 : vector<64x128xi32> to vector<64x128xf32>
      %574 = arith.truncf %573 : vector<64x128xf32> to vector<64x128xbf16>
      %cst_307 = arith.constant dense<0.000000e+00> : vector<1x128xf32>
      %575 = tpu.matmul %33, %574, %cst_307 {dimension_numbers = #tpu.dot_dimension_numbers<[1], [0], [0], [1], [0, 0, 1, 1], [], []>} : vector<1x64xbf16>, vector<64x128xbf16>, vector<1x128xf32> -> vector<1x128xf32>
      %576 = vector.broadcast %cst_16 : f32 to vector<1x128xf32>
      %577 = arith.cmpf oge, %575, %576 : vector<1x128xf32>
      %578 = arith.select %577, %arg17, %569 : vector<1x128xi1>, vector<1x128xi32>
      %579 = arith.select %577, %569, %arg18 : vector<1x128xi1>, vector<1x128xi32>
      scf.yield %578, %579 : vector<1x128xi32>, vector<1x128xi32>
    }
    %c0_i32_18 = arith.constant 0 : i32
    %38 = vector.broadcast %c0_i32_18 : i32 to vector<1x128xi32>
    %39 = arith.cmpi slt, %37#1, %38 : vector<1x128xi32>
    %c-2147483648_i32_19 = arith.constant -2147483648 : i32
    %40 = vector.broadcast %c-2147483648_i32_19 : i32 to vector<1x128xi32>
    %41 = arith.subi %40, %37#1 : vector<1x128xi32>
    %42 = arith.select %39, %41, %37#1 : vector<1x128xi1>, vector<1x128xi32>
    %43 = tpu.bitcast %42 : vector<1x128xi32> -> vector<1x128xf32>
    %44 = tpu.concatenate %24, %26, %43 in 0 : vector<1x128xf32>, vector<1x128xf32>, vector<1x128xf32> -> vector<3x128xf32>
    %c0_20 = arith.constant 0 : index
    %c0_21 = arith.constant 0 : index
    %45 = vector.load %arg4[%c0_20, %c0_21] : memref<128x2xf32, #tpu.memory_space<vmem>>, vector<128x2xf32>
    %cst_22 = arith.constant dense<0.000000e+00> : vector<3x2xf32>
    %46 = tpu.matmul %44, %45, %cst_22 {dimension_numbers = #tpu.dot_dimension_numbers<[1], [0], [0], [1], [0, 0, 1, 1], [], []>} : vector<3x128xf32>, vector<128x2xf32>, vector<3x2xf32> -> vector<3x2xf32>
    %c0_23 = arith.constant 0 : index
    %c0_24 = arith.constant 0 : index
    %47 = vector.load %arg5[%c0_23, %c0_24] : memref<1x2xf32, #tpu.memory_space<vmem>>, vector<1x2xf32>
    %48 = vector.broadcast %47 : vector<1x2xf32> to vector<3x2xf32>
    %49 = arith.addf %46, %48 : vector<3x2xf32>
    %cst_25 = arith.constant 0.000000e+00 : f32
    %50 = vector.broadcast %cst_25 : f32 to vector<3x2xf32>
    %51 = arith.maximumf %49, %50 : vector<3x2xf32>
    %c0_26 = arith.constant 0 : index
    %c0_27 = arith.constant 0 : index
    %52 = vector.load %arg6[%c0_26, %c0_27] : memref<2x128xf32, #tpu.memory_space<vmem>>, vector<2x128xf32>
    %cst_28 = arith.constant dense<0.000000e+00> : vector<3x128xf32>
    %53 = tpu.matmul %51, %52, %cst_28 {dimension_numbers = #tpu.dot_dimension_numbers<[1], [0], [0], [1], [0, 0, 1, 1], [], []>} : vector<3x2xf32>, vector<2x128xf32>, vector<3x128xf32> -> vector<3x128xf32>
    %c0_29 = arith.constant 0 : index
    %c0_30 = arith.constant 0 : index
    %54 = vector.load %arg7[%c0_29, %c0_30] : memref<1x128xf32, #tpu.memory_space<vmem>>, vector<1x128xf32>
    %55 = vector.broadcast %54 : vector<1x128xf32> to vector<3x128xf32>
    %56 = arith.addf %53, %55 : vector<3x128xf32>
    %cst_31 = arith.constant dense<0.000000e+00> : vector<128xf32>
    %57 = vector.multi_reduction <add>, %56, %cst_31 [0] : vector<3x128xf32> to vector<128xf32>
    %58 = vector.shape_cast %57 : vector<128xf32> to vector<1x128xf32>
    %59 = arith.negf %58 : vector<1x128xf32>
    %60 = math.exp %59 : vector<1x128xf32>
    %cst_32 = arith.constant 1.000000e+00 : f32
    %61 = vector.broadcast %cst_32 : f32 to vector<1x128xf32>
    %62 = arith.addf %61, %60 : vector<1x128xf32>
    %63 = arith.divf %61, %62 : vector<1x128xf32>
    %64 = vector.shape_cast %63 : vector<1x128xf32> to vector<1x1x1x128xf32>
    %65 = vector.broadcast %64 : vector<1x1x1x128xf32> to vector<1x8x8x128xf32>
    %66 = arith.mulf %21, %65 : vector<1x8x8x128xf32>
    %c0_i32_33 = arith.constant 0 : i32
    %67 = arith.cmpi eq, %arg0, %c0_i32_33 : i32
    %68 = arith.extui %67 : i1 to i32
    %c0_i32_34 = arith.constant 0 : i32
    %69 = arith.cmpi ne, %68, %c0_i32_34 : i32
    scf.if %69 {
      %cst_306 = arith.constant 0.000000e+00 : f32
      %565 = vector.broadcast %cst_306 : f32 to vector<1x2x24x128xf32>
      %c0_307 = arith.constant 0 : index
      %c0_308 = arith.constant 0 : index
      %c0_309 = arith.constant 0 : index
      %c0_310 = arith.constant 0 : index
      %566 = vector.load %arg14[%c0_307, %c0_308, %c0_309, %c0_310] : memref<1x12x24x128xf32, #tpu.memory_space<vmem>>, vector<1x2x24x128xf32>
      tpu.vector_store %arg14[%c0_307, %c0_308, %c0_309, %c0_310], %565 {strides = array<i32>} : memref<1x12x24x128xf32, #tpu.memory_space<vmem>>, vector<1x2x24x128xf32>,
      %cst_311 = arith.constant 0.000000e+00 : f32
      %567 = vector.broadcast %cst_311 : f32 to vector<1x2x24x128xf32>
      %c0_312 = arith.constant 0 : index
      %c10_313 = arith.constant 10 : index
      %c0_314 = arith.constant 0 : index
      %c0_315 = arith.constant 0 : index
      %568 = vector.load %arg14[%c0_312, %c10_313, %c0_314, %c0_315] : memref<1x12x24x128xf32, #tpu.memory_space<vmem>>, vector<1x2x24x128xf32>
      tpu.vector_store %arg14[%c0_312, %c10_313, %c0_314, %c0_315], %567 {strides = array<i32>} : memref<1x12x24x128xf32, #tpu.memory_space<vmem>>, vector<1x2x24x128xf32>,
      %cst_316 = arith.constant 0.000000e+00 : f32
      %569 = vector.broadcast %cst_316 : f32 to vector<1x8x8x128xf32>
      %c0_317 = arith.constant 0 : index
      %c2_318 = arith.constant 2 : index
      %c0_319 = arith.constant 0 : index
      %c0_320 = arith.constant 0 : index
      %570 = vector.load %arg14[%c0_317, %c2_318, %c0_319, %c0_320] : memref<1x12x24x128xf32, #tpu.memory_space<vmem>>, vector<1x8x8x128xf32>
      tpu.vector_store %arg14[%c0_317, %c2_318, %c0_319, %c0_320], %569 {strides = array<i32>} : memref<1x12x24x128xf32, #tpu.memory_space<vmem>>, vector<1x8x8x128xf32>,
      %cst_321 = arith.constant 0.000000e+00 : f32
      %571 = vector.broadcast %cst_321 : f32 to vector<1x8x8x128xf32>
      %c0_322 = arith.constant 0 : index
      %c2_323 = arith.constant 2 : index
      %c16_324 = arith.constant 16 : index
      %c0_325 = arith.constant 0 : index
      %572 = vector.load %arg14[%c0_322, %c2_323, %c16_324, %c0_325] : memref<1x12x24x128xf32, #tpu.memory_space<vmem>>, vector<1x8x8x128xf32>
      tpu.vector_store %arg14[%c0_322, %c2_323, %c16_324, %c0_325], %571 {strides = array<i32>} : memref<1x12x24x128xf32, #tpu.memory_space<vmem>>, vector<1x8x8x128xf32>,
      %cst_326 = arith.constant 0.000000e+00 : f32
      %573 = vector.broadcast %cst_326 : f32 to vector<1x10x40x128xf32>
      %c0_327 = arith.constant 0 : index
      %c0_328 = arith.constant 0 : index
      %c0_329 = arith.constant 0 : index
      %c0_330 = arith.constant 0 : index
      %574 = vector.load %arg15[%c0_327, %c0_328, %c0_329, %c0_330] : memref<1x28x40x128xf32, #tpu.memory_space<vmem>>, vector<1x10x40x128xf32>
      tpu.vector_store %arg15[%c0_327, %c0_328, %c0_329, %c0_330], %573 {strides = array<i32>} : memref<1x28x40x128xf32, #tpu.memory_space<vmem>>, vector<1x10x40x128xf32>,
      %cst_331 = arith.constant 0.000000e+00 : f32
      %575 = vector.broadcast %cst_331 : f32 to vector<1x10x40x128xf32>
      %c0_332 = arith.constant 0 : index
      %c18_333 = arith.constant 18 : index
      %c0_334 = arith.constant 0 : index
      %c0_335 = arith.constant 0 : index
      %576 = vector.load %arg15[%c0_332, %c18_333, %c0_334, %c0_335] : memref<1x28x40x128xf32, #tpu.memory_space<vmem>>, vector<1x10x40x128xf32>
      tpu.vector_store %arg15[%c0_332, %c18_333, %c0_334, %c0_335], %575 {strides = array<i32>} : memref<1x28x40x128xf32, #tpu.memory_space<vmem>>, vector<1x10x40x128xf32>,
      %cst_336 = arith.constant 0.000000e+00 : f32
      %577 = vector.broadcast %cst_336 : f32 to vector<1x8x16x128xf32>
      %c0_337 = arith.constant 0 : index
      %c10_338 = arith.constant 10 : index
      %c0_339 = arith.constant 0 : index
      %c0_340 = arith.constant 0 : index
      %578 = vector.load %arg15[%c0_337, %c10_338, %c0_339, %c0_340] : memref<1x28x40x128xf32, #tpu.memory_space<vmem>>, vector<1x8x16x128xf32>
      tpu.vector_store %arg15[%c0_337, %c10_338, %c0_339, %c0_340], %577 {strides = array<i32>} : memref<1x28x40x128xf32, #tpu.memory_space<vmem>>, vector<1x8x16x128xf32>,
      %cst_341 = arith.constant 0.000000e+00 : f32
      %579 = vector.broadcast %cst_341 : f32 to vector<1x8x16x128xf32>
      %c0_342 = arith.constant 0 : index
      %c10_343 = arith.constant 10 : index
      %c24_344 = arith.constant 24 : index
      %c0_345 = arith.constant 0 : index
      %580 = vector.load %arg15[%c0_342, %c10_343, %c24_344, %c0_345] : memref<1x28x40x128xf32, #tpu.memory_space<vmem>>, vector<1x8x16x128xf32>
      tpu.vector_store %arg15[%c0_342, %c10_343, %c24_344, %c0_345], %579 {strides = array<i32>} : memref<1x28x40x128xf32, #tpu.memory_space<vmem>>, vector<1x8x16x128xf32>,
    } else {
    }
    %c0_35 = arith.constant 0 : index
    %c2 = arith.constant 2 : index
    %c8 = arith.constant 8 : index
    %c0_36 = arith.constant 0 : index
    %70 = vector.load %arg14[%c0_35, %c2, %c8, %c0_36] : memref<1x12x24x128xf32, #tpu.memory_space<vmem>>, vector<1x8x8x128xf32>
    tpu.vector_store %arg14[%c0_35, %c2, %c8, %c0_36], %66 {strides = array<i32>} : memref<1x12x24x128xf32, #tpu.memory_space<vmem>>, vector<1x8x8x128xf32>,
    %c0_37 = arith.constant 0 : index
    %c0_38 = arith.constant 0 : index
    %c0_39 = arith.constant 0 : index
    %71 = vector.load %arg8[%c0_37, %c0_38, %c0_39] : memref<5x5x128xf32, #tpu.memory_space<vmem>>, vector<5x5x128xf32>
    %72 = vector.extract_strided_slice %71 {offsets = [0, 0, 0], sizes = [1, 1, 128], strides = [1, 1, 1]} : vector<5x5x128xf32> to vector<1x1x128xf32>
    %73 = vector.shape_cast %72 : vector<1x1x128xf32> to vector<128xf32>
    %c0_40 = arith.constant 0 : index
    %c0_41 = arith.constant 0 : index
    %c6 = arith.constant 6 : index
    %c0_42 = arith.constant 0 : index
    %74 = vector.load %arg14[%c0_40, %c0_41, %c6, %c0_42] : memref<1x12x24x128xf32, #tpu.memory_space<vmem>>, vector<1x8x8x128xf32>
    %75 = vector.shape_cast %73 : vector<128xf32> to vector<1x1x1x128xf32>
    %76 = vector.broadcast %75 : vector<1x1x1x128xf32> to vector<1x8x8x128xf32>
    %77 = arith.mulf %76, %74 : vector<1x8x8x128xf32>
    %c0_43 = arith.constant 0 : index
    %c0_44 = arith.constant 0 : index
    %78 = vector.load %arg9[%c0_43, %c0_44] : memref<1x128xf32, #tpu.memory_space<vmem>>, vector<1x128xf32>
    %79 = vector.shape_cast %78 : vector<1x128xf32> to vector<1x1x1x128xf32>
    %80 = vector.broadcast %79 : vector<1x1x1x128xf32> to vector<1x8x8x128xf32>
    %81 = arith.addf %77, %80 : vector<1x8x8x128xf32>
    %82 = vector.extract_strided_slice %71 {offsets = [0, 1, 0], sizes = [1, 1, 128], strides = [1, 1, 1]} : vector<5x5x128xf32> to vector<1x1x128xf32>
    %83 = vector.shape_cast %82 : vector<1x1x128xf32> to vector<128xf32>
    %c0_45 = arith.constant 0 : index
    %c0_46 = arith.constant 0 : index
    %c7 = arith.constant 7 : index
    %c0_47 = arith.constant 0 : index
    %84 = vector.load %arg14[%c0_45, %c0_46, %c7, %c0_47] : memref<1x12x24x128xf32, #tpu.memory_space<vmem>>, vector<1x8x8x128xf32>
    %85 = vector.shape_cast %83 : vector<128xf32> to vector<1x1x1x128xf32>
    %86 = vector.broadcast %85 : vector<1x1x1x128xf32> to vector<1x8x8x128xf32>
    %87 = arith.mulf %86, %84 : vector<1x8x8x128xf32>
    %88 = arith.addf %81, %87 : vector<1x8x8x128xf32>
    %89 = vector.extract_strided_slice %71 {offsets = [0, 2, 0], sizes = [1, 1, 128], strides = [1, 1, 1]} : vector<5x5x128xf32> to vector<1x1x128xf32>
    %90 = vector.shape_cast %89 : vector<1x1x128xf32> to vector<128xf32>
    %c0_48 = arith.constant 0 : index
    %c0_49 = arith.constant 0 : index
    %c8_50 = arith.constant 8 : index
    %c0_51 = arith.constant 0 : index
    %91 = vector.load %arg14[%c0_48, %c0_49, %c8_50, %c0_51] : memref<1x12x24x128xf32, #tpu.memory_space<vmem>>, vector<1x8x8x128xf32>
    %92 = vector.shape_cast %90 : vector<128xf32> to vector<1x1x1x128xf32>
    %93 = vector.broadcast %92 : vector<1x1x1x128xf32> to vector<1x8x8x128xf32>
    %94 = arith.mulf %93, %91 : vector<1x8x8x128xf32>
    %95 = arith.addf %88, %94 : vector<1x8x8x128xf32>
    %96 = vector.extract_strided_slice %71 {offsets = [0, 3, 0], sizes = [1, 1, 128], strides = [1, 1, 1]} : vector<5x5x128xf32> to vector<1x1x128xf32>
    %97 = vector.shape_cast %96 : vector<1x1x128xf32> to vector<128xf32>
    %c0_52 = arith.constant 0 : index
    %c0_53 = arith.constant 0 : index
    %c9 = arith.constant 9 : index
    %c0_54 = arith.constant 0 : index
    %98 = vector.load %arg14[%c0_52, %c0_53, %c9, %c0_54] : memref<1x12x24x128xf32, #tpu.memory_space<vmem>>, vector<1x8x8x128xf32>
    %99 = vector.shape_cast %97 : vector<128xf32> to vector<1x1x1x128xf32>
    %100 = vector.broadcast %99 : vector<1x1x1x128xf32> to vector<1x8x8x128xf32>
    %101 = arith.mulf %100, %98 : vector<1x8x8x128xf32>
    %102 = arith.addf %95, %101 : vector<1x8x8x128xf32>
    %103 = vector.extract_strided_slice %71 {offsets = [0, 4, 0], sizes = [1, 1, 128], strides = [1, 1, 1]} : vector<5x5x128xf32> to vector<1x1x128xf32>
    %104 = vector.shape_cast %103 : vector<1x1x128xf32> to vector<128xf32>
    %c0_55 = arith.constant 0 : index
    %c0_56 = arith.constant 0 : index
    %c10 = arith.constant 10 : index
    %c0_57 = arith.constant 0 : index
    %105 = vector.load %arg14[%c0_55, %c0_56, %c10, %c0_57] : memref<1x12x24x128xf32, #tpu.memory_space<vmem>>, vector<1x8x8x128xf32>
    %106 = vector.shape_cast %104 : vector<128xf32> to vector<1x1x1x128xf32>
    %107 = vector.broadcast %106 : vector<1x1x1x128xf32> to vector<1x8x8x128xf32>
    %108 = arith.mulf %107, %105 : vector<1x8x8x128xf32>
    %109 = arith.addf %102, %108 : vector<1x8x8x128xf32>
    %110 = vector.extract_strided_slice %71 {offsets = [1, 0, 0], sizes = [1, 1, 128], strides = [1, 1, 1]} : vector<5x5x128xf32> to vector<1x1x128xf32>
    %111 = vector.shape_cast %110 : vector<1x1x128xf32> to vector<128xf32>
    %c0_58 = arith.constant 0 : index
    %c1 = arith.constant 1 : index
    %c6_59 = arith.constant 6 : index
    %c0_60 = arith.constant 0 : index
    %112 = vector.load %arg14[%c0_58, %c1, %c6_59, %c0_60] : memref<1x12x24x128xf32, #tpu.memory_space<vmem>>, vector<1x8x8x128xf32>
    %113 = vector.shape_cast %111 : vector<128xf32> to vector<1x1x1x128xf32>
    %114 = vector.broadcast %113 : vector<1x1x1x128xf32> to vector<1x8x8x128xf32>
    %115 = arith.mulf %114, %112 : vector<1x8x8x128xf32>
    %116 = arith.addf %109, %115 : vector<1x8x8x128xf32>
    %117 = vector.extract_strided_slice %71 {offsets = [1, 1, 0], sizes = [1, 1, 128], strides = [1, 1, 1]} : vector<5x5x128xf32> to vector<1x1x128xf32>
    %118 = vector.shape_cast %117 : vector<1x1x128xf32> to vector<128xf32>
    %c0_61 = arith.constant 0 : index
    %c1_62 = arith.constant 1 : index
    %c7_63 = arith.constant 7 : index
    %c0_64 = arith.constant 0 : index
    %119 = vector.load %arg14[%c0_61, %c1_62, %c7_63, %c0_64] : memref<1x12x24x128xf32, #tpu.memory_space<vmem>>, vector<1x8x8x128xf32>
    %120 = vector.shape_cast %118 : vector<128xf32> to vector<1x1x1x128xf32>
    %121 = vector.broadcast %120 : vector<1x1x1x128xf32> to vector<1x8x8x128xf32>
    %122 = arith.mulf %121, %119 : vector<1x8x8x128xf32>
    %123 = arith.addf %116, %122 : vector<1x8x8x128xf32>
    %124 = vector.extract_strided_slice %71 {offsets = [1, 2, 0], sizes = [1, 1, 128], strides = [1, 1, 1]} : vector<5x5x128xf32> to vector<1x1x128xf32>
    %125 = vector.shape_cast %124 : vector<1x1x128xf32> to vector<128xf32>
    %c0_65 = arith.constant 0 : index
    %c1_66 = arith.constant 1 : index
    %c8_67 = arith.constant 8 : index
    %c0_68 = arith.constant 0 : index
    %126 = vector.load %arg14[%c0_65, %c1_66, %c8_67, %c0_68] : memref<1x12x24x128xf32, #tpu.memory_space<vmem>>, vector<1x8x8x128xf32>
    %127 = vector.shape_cast %125 : vector<128xf32> to vector<1x1x1x128xf32>
    %128 = vector.broadcast %127 : vector<1x1x1x128xf32> to vector<1x8x8x128xf32>
    %129 = arith.mulf %128, %126 : vector<1x8x8x128xf32>
    %130 = arith.addf %123, %129 : vector<1x8x8x128xf32>
    %131 = vector.extract_strided_slice %71 {offsets = [1, 3, 0], sizes = [1, 1, 128], strides = [1, 1, 1]} : vector<5x5x128xf32> to vector<1x1x128xf32>
    %132 = vector.shape_cast %131 : vector<1x1x128xf32> to vector<128xf32>
    %c0_69 = arith.constant 0 : index
    %c1_70 = arith.constant 1 : index
    %c9_71 = arith.constant 9 : index
    %c0_72 = arith.constant 0 : index
    %133 = vector.load %arg14[%c0_69, %c1_70, %c9_71, %c0_72] : memref<1x12x24x128xf32, #tpu.memory_space<vmem>>, vector<1x8x8x128xf32>
    %134 = vector.shape_cast %132 : vector<128xf32> to vector<1x1x1x128xf32>
    %135 = vector.broadcast %134 : vector<1x1x1x128xf32> to vector<1x8x8x128xf32>
    %136 = arith.mulf %135, %133 : vector<1x8x8x128xf32>
    %137 = arith.addf %130, %136 : vector<1x8x8x128xf32>
    %138 = vector.extract_strided_slice %71 {offsets = [1, 4, 0], sizes = [1, 1, 128], strides = [1, 1, 1]} : vector<5x5x128xf32> to vector<1x1x128xf32>
    %139 = vector.shape_cast %138 : vector<1x1x128xf32> to vector<128xf32>
    %c0_73 = arith.constant 0 : index
    %c1_74 = arith.constant 1 : index
    %c10_75 = arith.constant 10 : index
    %c0_76 = arith.constant 0 : index
    %140 = vector.load %arg14[%c0_73, %c1_74, %c10_75, %c0_76] : memref<1x12x24x128xf32, #tpu.memory_space<vmem>>, vector<1x8x8x128xf32>
    %141 = vector.shape_cast %139 : vector<128xf32> to vector<1x1x1x128xf32>
    %142 = vector.broadcast %141 : vector<1x1x1x128xf32> to vector<1x8x8x128xf32>
    %143 = arith.mulf %142, %140 : vector<1x8x8x128xf32>
    %144 = arith.addf %137, %143 : vector<1x8x8x128xf32>
    %145 = vector.extract_strided_slice %71 {offsets = [2, 0, 0], sizes = [1, 1, 128], strides = [1, 1, 1]} : vector<5x5x128xf32> to vector<1x1x128xf32>
    %146 = vector.shape_cast %145 : vector<1x1x128xf32> to vector<128xf32>
    %c0_77 = arith.constant 0 : index
    %c2_78 = arith.constant 2 : index
    %c6_79 = arith.constant 6 : index
    %c0_80 = arith.constant 0 : index
    %147 = vector.load %arg14[%c0_77, %c2_78, %c6_79, %c0_80] : memref<1x12x24x128xf32, #tpu.memory_space<vmem>>, vector<1x8x8x128xf32>
    %148 = vector.shape_cast %146 : vector<128xf32> to vector<1x1x1x128xf32>
    %149 = vector.broadcast %148 : vector<1x1x1x128xf32> to vector<1x8x8x128xf32>
    %150 = arith.mulf %149, %147 : vector<1x8x8x128xf32>
    %151 = arith.addf %144, %150 : vector<1x8x8x128xf32>
    %152 = vector.extract_strided_slice %71 {offsets = [2, 1, 0], sizes = [1, 1, 128], strides = [1, 1, 1]} : vector<5x5x128xf32> to vector<1x1x128xf32>
    %153 = vector.shape_cast %152 : vector<1x1x128xf32> to vector<128xf32>
    %c0_81 = arith.constant 0 : index
    %c2_82 = arith.constant 2 : index
    %c7_83 = arith.constant 7 : index
    %c0_84 = arith.constant 0 : index
    %154 = vector.load %arg14[%c0_81, %c2_82, %c7_83, %c0_84] : memref<1x12x24x128xf32, #tpu.memory_space<vmem>>, vector<1x8x8x128xf32>
    %155 = vector.shape_cast %153 : vector<128xf32> to vector<1x1x1x128xf32>
    %156 = vector.broadcast %155 : vector<1x1x1x128xf32> to vector<1x8x8x128xf32>
    %157 = arith.mulf %156, %154 : vector<1x8x8x128xf32>
    %158 = arith.addf %151, %157 : vector<1x8x8x128xf32>
    %159 = vector.extract_strided_slice %71 {offsets = [2, 2, 0], sizes = [1, 1, 128], strides = [1, 1, 1]} : vector<5x5x128xf32> to vector<1x1x128xf32>
    %160 = vector.shape_cast %159 : vector<1x1x128xf32> to vector<128xf32>
    %c0_85 = arith.constant 0 : index
    %c2_86 = arith.constant 2 : index
    %c8_87 = arith.constant 8 : index
    %c0_88 = arith.constant 0 : index
    %161 = vector.load %arg14[%c0_85, %c2_86, %c8_87, %c0_88] : memref<1x12x24x128xf32, #tpu.memory_space<vmem>>, vector<1x8x8x128xf32>
    %162 = vector.shape_cast %160 : vector<128xf32> to vector<1x1x1x128xf32>
    %163 = vector.broadcast %162 : vector<1x1x1x128xf32> to vector<1x8x8x128xf32>
    %164 = arith.mulf %163, %161 : vector<1x8x8x128xf32>
    %165 = arith.addf %158, %164 : vector<1x8x8x128xf32>
    %166 = vector.extract_strided_slice %71 {offsets = [2, 3, 0], sizes = [1, 1, 128], strides = [1, 1, 1]} : vector<5x5x128xf32> to vector<1x1x128xf32>
    %167 = vector.shape_cast %166 : vector<1x1x128xf32> to vector<128xf32>
    %c0_89 = arith.constant 0 : index
    %c2_90 = arith.constant 2 : index
    %c9_91 = arith.constant 9 : index
    %c0_92 = arith.constant 0 : index
    %168 = vector.load %arg14[%c0_89, %c2_90, %c9_91, %c0_92] : memref<1x12x24x128xf32, #tpu.memory_space<vmem>>, vector<1x8x8x128xf32>
    %169 = vector.shape_cast %167 : vector<128xf32> to vector<1x1x1x128xf32>
    %170 = vector.broadcast %169 : vector<1x1x1x128xf32> to vector<1x8x8x128xf32>
    %171 = arith.mulf %170, %168 : vector<1x8x8x128xf32>
    %172 = arith.addf %165, %171 : vector<1x8x8x128xf32>
    %173 = vector.extract_strided_slice %71 {offsets = [2, 4, 0], sizes = [1, 1, 128], strides = [1, 1, 1]} : vector<5x5x128xf32> to vector<1x1x128xf32>
    %174 = vector.shape_cast %173 : vector<1x1x128xf32> to vector<128xf32>
    %c0_93 = arith.constant 0 : index
    %c2_94 = arith.constant 2 : index
    %c10_95 = arith.constant 10 : index
    %c0_96 = arith.constant 0 : index
    %175 = vector.load %arg14[%c0_93, %c2_94, %c10_95, %c0_96] : memref<1x12x24x128xf32, #tpu.memory_space<vmem>>, vector<1x8x8x128xf32>
    %176 = vector.shape_cast %174 : vector<128xf32> to vector<1x1x1x128xf32>
    %177 = vector.broadcast %176 : vector<1x1x1x128xf32> to vector<1x8x8x128xf32>
    %178 = arith.mulf %177, %175 : vector<1x8x8x128xf32>
    %179 = arith.addf %172, %178 : vector<1x8x8x128xf32>
    %180 = vector.extract_strided_slice %71 {offsets = [3, 0, 0], sizes = [1, 1, 128], strides = [1, 1, 1]} : vector<5x5x128xf32> to vector<1x1x128xf32>
    %181 = vector.shape_cast %180 : vector<1x1x128xf32> to vector<128xf32>
    %c0_97 = arith.constant 0 : index
    %c3 = arith.constant 3 : index
    %c6_98 = arith.constant 6 : index
    %c0_99 = arith.constant 0 : index
    %182 = vector.load %arg14[%c0_97, %c3, %c6_98, %c0_99] : memref<1x12x24x128xf32, #tpu.memory_space<vmem>>, vector<1x8x8x128xf32>
    %183 = vector.shape_cast %181 : vector<128xf32> to vector<1x1x1x128xf32>
    %184 = vector.broadcast %183 : vector<1x1x1x128xf32> to vector<1x8x8x128xf32>
    %185 = arith.mulf %184, %182 : vector<1x8x8x128xf32>
    %186 = arith.addf %179, %185 : vector<1x8x8x128xf32>
    %187 = vector.extract_strided_slice %71 {offsets = [3, 1, 0], sizes = [1, 1, 128], strides = [1, 1, 1]} : vector<5x5x128xf32> to vector<1x1x128xf32>
    %188 = vector.shape_cast %187 : vector<1x1x128xf32> to vector<128xf32>
    %c0_100 = arith.constant 0 : index
    %c3_101 = arith.constant 3 : index
    %c7_102 = arith.constant 7 : index
    %c0_103 = arith.constant 0 : index
    %189 = vector.load %arg14[%c0_100, %c3_101, %c7_102, %c0_103] : memref<1x12x24x128xf32, #tpu.memory_space<vmem>>, vector<1x8x8x128xf32>
    %190 = vector.shape_cast %188 : vector<128xf32> to vector<1x1x1x128xf32>
    %191 = vector.broadcast %190 : vector<1x1x1x128xf32> to vector<1x8x8x128xf32>
    %192 = arith.mulf %191, %189 : vector<1x8x8x128xf32>
    %193 = arith.addf %186, %192 : vector<1x8x8x128xf32>
    %194 = vector.extract_strided_slice %71 {offsets = [3, 2, 0], sizes = [1, 1, 128], strides = [1, 1, 1]} : vector<5x5x128xf32> to vector<1x1x128xf32>
    %195 = vector.shape_cast %194 : vector<1x1x128xf32> to vector<128xf32>
    %c0_104 = arith.constant 0 : index
    %c3_105 = arith.constant 3 : index
    %c8_106 = arith.constant 8 : index
    %c0_107 = arith.constant 0 : index
    %196 = vector.load %arg14[%c0_104, %c3_105, %c8_106, %c0_107] : memref<1x12x24x128xf32, #tpu.memory_space<vmem>>, vector<1x8x8x128xf32>
    %197 = vector.shape_cast %195 : vector<128xf32> to vector<1x1x1x128xf32>
    %198 = vector.broadcast %197 : vector<1x1x1x128xf32> to vector<1x8x8x128xf32>
    %199 = arith.mulf %198, %196 : vector<1x8x8x128xf32>
    %200 = arith.addf %193, %199 : vector<1x8x8x128xf32>
    %201 = vector.extract_strided_slice %71 {offsets = [3, 3, 0], sizes = [1, 1, 128], strides = [1, 1, 1]} : vector<5x5x128xf32> to vector<1x1x128xf32>
    %202 = vector.shape_cast %201 : vector<1x1x128xf32> to vector<128xf32>
    %c0_108 = arith.constant 0 : index
    %c3_109 = arith.constant 3 : index
    %c9_110 = arith.constant 9 : index
    %c0_111 = arith.constant 0 : index
    %203 = vector.load %arg14[%c0_108, %c3_109, %c9_110, %c0_111] : memref<1x12x24x128xf32, #tpu.memory_space<vmem>>, vector<1x8x8x128xf32>
    %204 = vector.shape_cast %202 : vector<128xf32> to vector<1x1x1x128xf32>
    %205 = vector.broadcast %204 : vector<1x1x1x128xf32> to vector<1x8x8x128xf32>
    %206 = arith.mulf %205, %203 : vector<1x8x8x128xf32>
    %207 = arith.addf %200, %206 : vector<1x8x8x128xf32>
    %208 = vector.extract_strided_slice %71 {offsets = [3, 4, 0], sizes = [1, 1, 128], strides = [1, 1, 1]} : vector<5x5x128xf32> to vector<1x1x128xf32>
    %209 = vector.shape_cast %208 : vector<1x1x128xf32> to vector<128xf32>
    %c0_112 = arith.constant 0 : index
    %c3_113 = arith.constant 3 : index
    %c10_114 = arith.constant 10 : index
    %c0_115 = arith.constant 0 : index
    %210 = vector.load %arg14[%c0_112, %c3_113, %c10_114, %c0_115] : memref<1x12x24x128xf32, #tpu.memory_space<vmem>>, vector<1x8x8x128xf32>
    %211 = vector.shape_cast %209 : vector<128xf32> to vector<1x1x1x128xf32>
    %212 = vector.broadcast %211 : vector<1x1x1x128xf32> to vector<1x8x8x128xf32>
    %213 = arith.mulf %212, %210 : vector<1x8x8x128xf32>
    %214 = arith.addf %207, %213 : vector<1x8x8x128xf32>
    %215 = vector.extract_strided_slice %71 {offsets = [4, 0, 0], sizes = [1, 1, 128], strides = [1, 1, 1]} : vector<5x5x128xf32> to vector<1x1x128xf32>
    %216 = vector.shape_cast %215 : vector<1x1x128xf32> to vector<128xf32>
    %c0_116 = arith.constant 0 : index
    %c4 = arith.constant 4 : index
    %c6_117 = arith.constant 6 : index
    %c0_118 = arith.constant 0 : index
    %217 = vector.load %arg14[%c0_116, %c4, %c6_117, %c0_118] : memref<1x12x24x128xf32, #tpu.memory_space<vmem>>, vector<1x8x8x128xf32>
    %218 = vector.shape_cast %216 : vector<128xf32> to vector<1x1x1x128xf32>
    %219 = vector.broadcast %218 : vector<1x1x1x128xf32> to vector<1x8x8x128xf32>
    %220 = arith.mulf %219, %217 : vector<1x8x8x128xf32>
    %221 = arith.addf %214, %220 : vector<1x8x8x128xf32>
    %222 = vector.extract_strided_slice %71 {offsets = [4, 1, 0], sizes = [1, 1, 128], strides = [1, 1, 1]} : vector<5x5x128xf32> to vector<1x1x128xf32>
    %223 = vector.shape_cast %222 : vector<1x1x128xf32> to vector<128xf32>
    %c0_119 = arith.constant 0 : index
    %c4_120 = arith.constant 4 : index
    %c7_121 = arith.constant 7 : index
    %c0_122 = arith.constant 0 : index
    %224 = vector.load %arg14[%c0_119, %c4_120, %c7_121, %c0_122] : memref<1x12x24x128xf32, #tpu.memory_space<vmem>>, vector<1x8x8x128xf32>
    %225 = vector.shape_cast %223 : vector<128xf32> to vector<1x1x1x128xf32>
    %226 = vector.broadcast %225 : vector<1x1x1x128xf32> to vector<1x8x8x128xf32>
    %227 = arith.mulf %226, %224 : vector<1x8x8x128xf32>
    %228 = arith.addf %221, %227 : vector<1x8x8x128xf32>
    %229 = vector.extract_strided_slice %71 {offsets = [4, 2, 0], sizes = [1, 1, 128], strides = [1, 1, 1]} : vector<5x5x128xf32> to vector<1x1x128xf32>
    %230 = vector.shape_cast %229 : vector<1x1x128xf32> to vector<128xf32>
    %c0_123 = arith.constant 0 : index
    %c4_124 = arith.constant 4 : index
    %c8_125 = arith.constant 8 : index
    %c0_126 = arith.constant 0 : index
    %231 = vector.load %arg14[%c0_123, %c4_124, %c8_125, %c0_126] : memref<1x12x24x128xf32, #tpu.memory_space<vmem>>, vector<1x8x8x128xf32>
    %232 = vector.shape_cast %230 : vector<128xf32> to vector<1x1x1x128xf32>
    %233 = vector.broadcast %232 : vector<1x1x1x128xf32> to vector<1x8x8x128xf32>
    %234 = arith.mulf %233, %231 : vector<1x8x8x128xf32>
    %235 = arith.addf %228, %234 : vector<1x8x8x128xf32>
    %236 = vector.extract_strided_slice %71 {offsets = [4, 3, 0], sizes = [1, 1, 128], strides = [1, 1, 1]} : vector<5x5x128xf32> to vector<1x1x128xf32>
    %237 = vector.shape_cast %236 : vector<1x1x128xf32> to vector<128xf32>
    %c0_127 = arith.constant 0 : index
    %c4_128 = arith.constant 4 : index
    %c9_129 = arith.constant 9 : index
    %c0_130 = arith.constant 0 : index
    %238 = vector.load %arg14[%c0_127, %c4_128, %c9_129, %c0_130] : memref<1x12x24x128xf32, #tpu.memory_space<vmem>>, vector<1x8x8x128xf32>
    %239 = vector.shape_cast %237 : vector<128xf32> to vector<1x1x1x128xf32>
    %240 = vector.broadcast %239 : vector<1x1x1x128xf32> to vector<1x8x8x128xf32>
    %241 = arith.mulf %240, %238 : vector<1x8x8x128xf32>
    %242 = arith.addf %235, %241 : vector<1x8x8x128xf32>
    %243 = vector.extract_strided_slice %71 {offsets = [4, 4, 0], sizes = [1, 1, 128], strides = [1, 1, 1]} : vector<5x5x128xf32> to vector<1x1x128xf32>
    %244 = vector.shape_cast %243 : vector<1x1x128xf32> to vector<128xf32>
    %c0_131 = arith.constant 0 : index
    %c4_132 = arith.constant 4 : index
    %c10_133 = arith.constant 10 : index
    %c0_134 = arith.constant 0 : index
    %245 = vector.load %arg14[%c0_131, %c4_132, %c10_133, %c0_134] : memref<1x12x24x128xf32, #tpu.memory_space<vmem>>, vector<1x8x8x128xf32>
    %246 = vector.shape_cast %244 : vector<128xf32> to vector<1x1x1x128xf32>
    %247 = vector.broadcast %246 : vector<1x1x1x128xf32> to vector<1x8x8x128xf32>
    %248 = arith.mulf %247, %245 : vector<1x8x8x128xf32>
    %249 = arith.addf %242, %248 : vector<1x8x8x128xf32>
    %c0_135 = arith.constant 0 : index
    %c10_136 = arith.constant 10 : index
    %c16 = arith.constant 16 : index
    %c0_137 = arith.constant 0 : index
    %250 = vector.load %arg15[%c0_135, %c10_136, %c16, %c0_137] : memref<1x28x40x128xf32, #tpu.memory_space<vmem>>, vector<1x8x8x128xf32>
    tpu.vector_store %arg15[%c0_135, %c10_136, %c16, %c0_137], %249 {strides = array<i32>} : memref<1x28x40x128xf32, #tpu.memory_space<vmem>>, vector<1x8x8x128xf32>,
    %c0_138 = arith.constant 0 : index
    %c0_139 = arith.constant 0 : index
    %251 = vector.load %arg10[%c0_138, %c0_139] : memref<21x128xf32, #tpu.memory_space<vmem>>, vector<21x128xf32>
    %c0_140 = arith.constant 0 : index
    %c0_141 = arith.constant 0 : index
    %252 = vector.load %arg11[%c0_140, %c0_141] : memref<21x128xf32, #tpu.memory_space<vmem>>, vector<21x128xf32>
    %253 = vector.extract_strided_slice %251 {offsets = [0, 0], sizes = [1, 128], strides = [1, 1]} : vector<21x128xf32> to vector<1x128xf32>
    %254 = vector.shape_cast %253 : vector<1x128xf32> to vector<128xf32>
    %c0_142 = arith.constant 0 : index
    %c10_143 = arith.constant 10 : index
    %c6_144 = arith.constant 6 : index
    %c0_145 = arith.constant 0 : index
    %255 = vector.load %arg15[%c0_142, %c10_143, %c6_144, %c0_145] : memref<1x28x40x128xf32, #tpu.memory_space<vmem>>, vector<1x8x8x128xf32>
    %256 = vector.shape_cast %254 : vector<128xf32> to vector<1x1x1x128xf32>
    %257 = vector.broadcast %256 : vector<1x1x1x128xf32> to vector<1x8x8x128xf32>
    %258 = arith.mulf %257, %255 : vector<1x8x8x128xf32>
    %c0_146 = arith.constant 0 : index
    %c0_147 = arith.constant 0 : index
    %259 = vector.load %arg12[%c0_146, %c0_147] : memref<1x128xf32, #tpu.memory_space<vmem>>, vector<1x128xf32>
    %260 = vector.shape_cast %259 : vector<1x128xf32> to vector<1x1x1x128xf32>
    %261 = vector.broadcast %260 : vector<1x1x1x128xf32> to vector<1x8x8x128xf32>
    %262 = arith.addf %258, %261 : vector<1x8x8x128xf32>
    %263 = vector.extract_strided_slice %251 {offsets = [1, 0], sizes = [1, 128], strides = [1, 1]} : vector<21x128xf32> to vector<1x128xf32>
    %264 = vector.shape_cast %263 : vector<1x128xf32> to vector<128xf32>
    %c0_148 = arith.constant 0 : index
    %c10_149 = arith.constant 10 : index
    %c7_150 = arith.constant 7 : index
    %c0_151 = arith.constant 0 : index
    %265 = vector.load %arg15[%c0_148, %c10_149, %c7_150, %c0_151] : memref<1x28x40x128xf32, #tpu.memory_space<vmem>>, vector<1x8x8x128xf32>
    %266 = vector.shape_cast %264 : vector<128xf32> to vector<1x1x1x128xf32>
    %267 = vector.broadcast %266 : vector<1x1x1x128xf32> to vector<1x8x8x128xf32>
    %268 = arith.mulf %267, %265 : vector<1x8x8x128xf32>
    %269 = arith.addf %262, %268 : vector<1x8x8x128xf32>
    %270 = vector.extract_strided_slice %251 {offsets = [2, 0], sizes = [1, 128], strides = [1, 1]} : vector<21x128xf32> to vector<1x128xf32>
    %271 = vector.shape_cast %270 : vector<1x128xf32> to vector<128xf32>
    %c0_152 = arith.constant 0 : index
    %c10_153 = arith.constant 10 : index
    %c8_154 = arith.constant 8 : index
    %c0_155 = arith.constant 0 : index
    %272 = vector.load %arg15[%c0_152, %c10_153, %c8_154, %c0_155] : memref<1x28x40x128xf32, #tpu.memory_space<vmem>>, vector<1x8x8x128xf32>
    %273 = vector.shape_cast %271 : vector<128xf32> to vector<1x1x1x128xf32>
    %274 = vector.broadcast %273 : vector<1x1x1x128xf32> to vector<1x8x8x128xf32>
    %275 = arith.mulf %274, %272 : vector<1x8x8x128xf32>
    %276 = arith.addf %269, %275 : vector<1x8x8x128xf32>
    %277 = vector.extract_strided_slice %251 {offsets = [3, 0], sizes = [1, 128], strides = [1, 1]} : vector<21x128xf32> to vector<1x128xf32>
    %278 = vector.shape_cast %277 : vector<1x128xf32> to vector<128xf32>
    %c0_156 = arith.constant 0 : index
    %c10_157 = arith.constant 10 : index
    %c9_158 = arith.constant 9 : index
    %c0_159 = arith.constant 0 : index
    %279 = vector.load %arg15[%c0_156, %c10_157, %c9_158, %c0_159] : memref<1x28x40x128xf32, #tpu.memory_space<vmem>>, vector<1x8x8x128xf32>
    %280 = vector.shape_cast %278 : vector<128xf32> to vector<1x1x1x128xf32>
    %281 = vector.broadcast %280 : vector<1x1x1x128xf32> to vector<1x8x8x128xf32>
    %282 = arith.mulf %281, %279 : vector<1x8x8x128xf32>
    %283 = arith.addf %276, %282 : vector<1x8x8x128xf32>
    %284 = vector.extract_strided_slice %251 {offsets = [4, 0], sizes = [1, 128], strides = [1, 1]} : vector<21x128xf32> to vector<1x128xf32>
    %285 = vector.shape_cast %284 : vector<1x128xf32> to vector<128xf32>
    %c0_160 = arith.constant 0 : index
    %c10_161 = arith.constant 10 : index
    %c10_162 = arith.constant 10 : index
    %c0_163 = arith.constant 0 : index
    %286 = vector.load %arg15[%c0_160, %c10_161, %c10_162, %c0_163] : memref<1x28x40x128xf32, #tpu.memory_space<vmem>>, vector<1x8x8x128xf32>
    %287 = vector.shape_cast %285 : vector<128xf32> to vector<1x1x1x128xf32>
    %288 = vector.broadcast %287 : vector<1x1x1x128xf32> to vector<1x8x8x128xf32>
    %289 = arith.mulf %288, %286 : vector<1x8x8x128xf32>
    %290 = arith.addf %283, %289 : vector<1x8x8x128xf32>
    %291 = vector.extract_strided_slice %251 {offsets = [5, 0], sizes = [1, 128], strides = [1, 1]} : vector<21x128xf32> to vector<1x128xf32>
    %292 = vector.shape_cast %291 : vector<1x128xf32> to vector<128xf32>
    %c0_164 = arith.constant 0 : index
    %c10_165 = arith.constant 10 : index
    %c11 = arith.constant 11 : index
    %c0_166 = arith.constant 0 : index
    %293 = vector.load %arg15[%c0_164, %c10_165, %c11, %c0_166] : memref<1x28x40x128xf32, #tpu.memory_space<vmem>>, vector<1x8x8x128xf32>
    %294 = vector.shape_cast %292 : vector<128xf32> to vector<1x1x1x128xf32>
    %295 = vector.broadcast %294 : vector<1x1x1x128xf32> to vector<1x8x8x128xf32>
    %296 = arith.mulf %295, %293 : vector<1x8x8x128xf32>
    %297 = arith.addf %290, %296 : vector<1x8x8x128xf32>
    %298 = vector.extract_strided_slice %251 {offsets = [6, 0], sizes = [1, 128], strides = [1, 1]} : vector<21x128xf32> to vector<1x128xf32>
    %299 = vector.shape_cast %298 : vector<1x128xf32> to vector<128xf32>
    %c0_167 = arith.constant 0 : index
    %c10_168 = arith.constant 10 : index
    %c12 = arith.constant 12 : index
    %c0_169 = arith.constant 0 : index
    %300 = vector.load %arg15[%c0_167, %c10_168, %c12, %c0_169] : memref<1x28x40x128xf32, #tpu.memory_space<vmem>>, vector<1x8x8x128xf32>
    %301 = vector.shape_cast %299 : vector<128xf32> to vector<1x1x1x128xf32>
    %302 = vector.broadcast %301 : vector<1x1x1x128xf32> to vector<1x8x8x128xf32>
    %303 = arith.mulf %302, %300 : vector<1x8x8x128xf32>
    %304 = arith.addf %297, %303 : vector<1x8x8x128xf32>
    %305 = vector.extract_strided_slice %251 {offsets = [7, 0], sizes = [1, 128], strides = [1, 1]} : vector<21x128xf32> to vector<1x128xf32>
    %306 = vector.shape_cast %305 : vector<1x128xf32> to vector<128xf32>
    %c0_170 = arith.constant 0 : index
    %c10_171 = arith.constant 10 : index
    %c13 = arith.constant 13 : index
    %c0_172 = arith.constant 0 : index
    %307 = vector.load %arg15[%c0_170, %c10_171, %c13, %c0_172] : memref<1x28x40x128xf32, #tpu.memory_space<vmem>>, vector<1x8x8x128xf32>
    %308 = vector.shape_cast %306 : vector<128xf32> to vector<1x1x1x128xf32>
    %309 = vector.broadcast %308 : vector<1x1x1x128xf32> to vector<1x8x8x128xf32>
    %310 = arith.mulf %309, %307 : vector<1x8x8x128xf32>
    %311 = arith.addf %304, %310 : vector<1x8x8x128xf32>
    %312 = vector.extract_strided_slice %251 {offsets = [8, 0], sizes = [1, 128], strides = [1, 1]} : vector<21x128xf32> to vector<1x128xf32>
    %313 = vector.shape_cast %312 : vector<1x128xf32> to vector<128xf32>
    %c0_173 = arith.constant 0 : index
    %c10_174 = arith.constant 10 : index
    %c14 = arith.constant 14 : index
    %c0_175 = arith.constant 0 : index
    %314 = vector.load %arg15[%c0_173, %c10_174, %c14, %c0_175] : memref<1x28x40x128xf32, #tpu.memory_space<vmem>>, vector<1x8x8x128xf32>
    %315 = vector.shape_cast %313 : vector<128xf32> to vector<1x1x1x128xf32>
    %316 = vector.broadcast %315 : vector<1x1x1x128xf32> to vector<1x8x8x128xf32>
    %317 = arith.mulf %316, %314 : vector<1x8x8x128xf32>
    %318 = arith.addf %311, %317 : vector<1x8x8x128xf32>
    %319 = vector.extract_strided_slice %251 {offsets = [9, 0], sizes = [1, 128], strides = [1, 1]} : vector<21x128xf32> to vector<1x128xf32>
    %320 = vector.shape_cast %319 : vector<1x128xf32> to vector<128xf32>
    %c0_176 = arith.constant 0 : index
    %c10_177 = arith.constant 10 : index
    %c15 = arith.constant 15 : index
    %c0_178 = arith.constant 0 : index
    %321 = vector.load %arg15[%c0_176, %c10_177, %c15, %c0_178] : memref<1x28x40x128xf32, #tpu.memory_space<vmem>>, vector<1x8x8x128xf32>
    %322 = vector.shape_cast %320 : vector<128xf32> to vector<1x1x1x128xf32>
    %323 = vector.broadcast %322 : vector<1x1x1x128xf32> to vector<1x8x8x128xf32>
    %324 = arith.mulf %323, %321 : vector<1x8x8x128xf32>
    %325 = arith.addf %318, %324 : vector<1x8x8x128xf32>
    %326 = vector.extract_strided_slice %251 {offsets = [10, 0], sizes = [1, 128], strides = [1, 1]} : vector<21x128xf32> to vector<1x128xf32>
    %327 = vector.shape_cast %326 : vector<1x128xf32> to vector<128xf32>
    %c0_179 = arith.constant 0 : index
    %c10_180 = arith.constant 10 : index
    %c16_181 = arith.constant 16 : index
    %c0_182 = arith.constant 0 : index
    %328 = vector.load %arg15[%c0_179, %c10_180, %c16_181, %c0_182] : memref<1x28x40x128xf32, #tpu.memory_space<vmem>>, vector<1x8x8x128xf32>
    %329 = vector.shape_cast %327 : vector<128xf32> to vector<1x1x1x128xf32>
    %330 = vector.broadcast %329 : vector<1x1x1x128xf32> to vector<1x8x8x128xf32>
    %331 = arith.mulf %330, %328 : vector<1x8x8x128xf32>
    %332 = arith.addf %325, %331 : vector<1x8x8x128xf32>
    %333 = vector.extract_strided_slice %251 {offsets = [11, 0], sizes = [1, 128], strides = [1, 1]} : vector<21x128xf32> to vector<1x128xf32>
    %334 = vector.shape_cast %333 : vector<1x128xf32> to vector<128xf32>
    %c0_183 = arith.constant 0 : index
    %c10_184 = arith.constant 10 : index
    %c17 = arith.constant 17 : index
    %c0_185 = arith.constant 0 : index
    %335 = vector.load %arg15[%c0_183, %c10_184, %c17, %c0_185] : memref<1x28x40x128xf32, #tpu.memory_space<vmem>>, vector<1x8x8x128xf32>
    %336 = vector.shape_cast %334 : vector<128xf32> to vector<1x1x1x128xf32>
    %337 = vector.broadcast %336 : vector<1x1x1x128xf32> to vector<1x8x8x128xf32>
    %338 = arith.mulf %337, %335 : vector<1x8x8x128xf32>
    %339 = arith.addf %332, %338 : vector<1x8x8x128xf32>
    %340 = vector.extract_strided_slice %251 {offsets = [12, 0], sizes = [1, 128], strides = [1, 1]} : vector<21x128xf32> to vector<1x128xf32>
    %341 = vector.shape_cast %340 : vector<1x128xf32> to vector<128xf32>
    %c0_186 = arith.constant 0 : index
    %c10_187 = arith.constant 10 : index
    %c18 = arith.constant 18 : index
    %c0_188 = arith.constant 0 : index
    %342 = vector.load %arg15[%c0_186, %c10_187, %c18, %c0_188] : memref<1x28x40x128xf32, #tpu.memory_space<vmem>>, vector<1x8x8x128xf32>
    %343 = vector.shape_cast %341 : vector<128xf32> to vector<1x1x1x128xf32>
    %344 = vector.broadcast %343 : vector<1x1x1x128xf32> to vector<1x8x8x128xf32>
    %345 = arith.mulf %344, %342 : vector<1x8x8x128xf32>
    %346 = arith.addf %339, %345 : vector<1x8x8x128xf32>
    %347 = vector.extract_strided_slice %251 {offsets = [13, 0], sizes = [1, 128], strides = [1, 1]} : vector<21x128xf32> to vector<1x128xf32>
    %348 = vector.shape_cast %347 : vector<1x128xf32> to vector<128xf32>
    %c0_189 = arith.constant 0 : index
    %c10_190 = arith.constant 10 : index
    %c19 = arith.constant 19 : index
    %c0_191 = arith.constant 0 : index
    %349 = vector.load %arg15[%c0_189, %c10_190, %c19, %c0_191] : memref<1x28x40x128xf32, #tpu.memory_space<vmem>>, vector<1x8x8x128xf32>
    %350 = vector.shape_cast %348 : vector<128xf32> to vector<1x1x1x128xf32>
    %351 = vector.broadcast %350 : vector<1x1x1x128xf32> to vector<1x8x8x128xf32>
    %352 = arith.mulf %351, %349 : vector<1x8x8x128xf32>
    %353 = arith.addf %346, %352 : vector<1x8x8x128xf32>
    %354 = vector.extract_strided_slice %251 {offsets = [14, 0], sizes = [1, 128], strides = [1, 1]} : vector<21x128xf32> to vector<1x128xf32>
    %355 = vector.shape_cast %354 : vector<1x128xf32> to vector<128xf32>
    %c0_192 = arith.constant 0 : index
    %c10_193 = arith.constant 10 : index
    %c20 = arith.constant 20 : index
    %c0_194 = arith.constant 0 : index
    %356 = vector.load %arg15[%c0_192, %c10_193, %c20, %c0_194] : memref<1x28x40x128xf32, #tpu.memory_space<vmem>>, vector<1x8x8x128xf32>
    %357 = vector.shape_cast %355 : vector<128xf32> to vector<1x1x1x128xf32>
    %358 = vector.broadcast %357 : vector<1x1x1x128xf32> to vector<1x8x8x128xf32>
    %359 = arith.mulf %358, %356 : vector<1x8x8x128xf32>
    %360 = arith.addf %353, %359 : vector<1x8x8x128xf32>
    %361 = vector.extract_strided_slice %251 {offsets = [15, 0], sizes = [1, 128], strides = [1, 1]} : vector<21x128xf32> to vector<1x128xf32>
    %362 = vector.shape_cast %361 : vector<1x128xf32> to vector<128xf32>
    %c0_195 = arith.constant 0 : index
    %c10_196 = arith.constant 10 : index
    %c21 = arith.constant 21 : index
    %c0_197 = arith.constant 0 : index
    %363 = vector.load %arg15[%c0_195, %c10_196, %c21, %c0_197] : memref<1x28x40x128xf32, #tpu.memory_space<vmem>>, vector<1x8x8x128xf32>
    %364 = vector.shape_cast %362 : vector<128xf32> to vector<1x1x1x128xf32>
    %365 = vector.broadcast %364 : vector<1x1x1x128xf32> to vector<1x8x8x128xf32>
    %366 = arith.mulf %365, %363 : vector<1x8x8x128xf32>
    %367 = arith.addf %360, %366 : vector<1x8x8x128xf32>
    %368 = vector.extract_strided_slice %251 {offsets = [16, 0], sizes = [1, 128], strides = [1, 1]} : vector<21x128xf32> to vector<1x128xf32>
    %369 = vector.shape_cast %368 : vector<1x128xf32> to vector<128xf32>
    %c0_198 = arith.constant 0 : index
    %c10_199 = arith.constant 10 : index
    %c22 = arith.constant 22 : index
    %c0_200 = arith.constant 0 : index
    %370 = vector.load %arg15[%c0_198, %c10_199, %c22, %c0_200] : memref<1x28x40x128xf32, #tpu.memory_space<vmem>>, vector<1x8x8x128xf32>
    %371 = vector.shape_cast %369 : vector<128xf32> to vector<1x1x1x128xf32>
    %372 = vector.broadcast %371 : vector<1x1x1x128xf32> to vector<1x8x8x128xf32>
    %373 = arith.mulf %372, %370 : vector<1x8x8x128xf32>
    %374 = arith.addf %367, %373 : vector<1x8x8x128xf32>
    %375 = vector.extract_strided_slice %251 {offsets = [17, 0], sizes = [1, 128], strides = [1, 1]} : vector<21x128xf32> to vector<1x128xf32>
    %376 = vector.shape_cast %375 : vector<1x128xf32> to vector<128xf32>
    %c0_201 = arith.constant 0 : index
    %c10_202 = arith.constant 10 : index
    %c23 = arith.constant 23 : index
    %c0_203 = arith.constant 0 : index
    %377 = vector.load %arg15[%c0_201, %c10_202, %c23, %c0_203] : memref<1x28x40x128xf32, #tpu.memory_space<vmem>>, vector<1x8x8x128xf32>
    %378 = vector.shape_cast %376 : vector<128xf32> to vector<1x1x1x128xf32>
    %379 = vector.broadcast %378 : vector<1x1x1x128xf32> to vector<1x8x8x128xf32>
    %380 = arith.mulf %379, %377 : vector<1x8x8x128xf32>
    %381 = arith.addf %374, %380 : vector<1x8x8x128xf32>
    %382 = vector.extract_strided_slice %251 {offsets = [18, 0], sizes = [1, 128], strides = [1, 1]} : vector<21x128xf32> to vector<1x128xf32>
    %383 = vector.shape_cast %382 : vector<1x128xf32> to vector<128xf32>
    %c0_204 = arith.constant 0 : index
    %c10_205 = arith.constant 10 : index
    %c24 = arith.constant 24 : index
    %c0_206 = arith.constant 0 : index
    %384 = vector.load %arg15[%c0_204, %c10_205, %c24, %c0_206] : memref<1x28x40x128xf32, #tpu.memory_space<vmem>>, vector<1x8x8x128xf32>
    %385 = vector.shape_cast %383 : vector<128xf32> to vector<1x1x1x128xf32>
    %386 = vector.broadcast %385 : vector<1x1x1x128xf32> to vector<1x8x8x128xf32>
    %387 = arith.mulf %386, %384 : vector<1x8x8x128xf32>
    %388 = arith.addf %381, %387 : vector<1x8x8x128xf32>
    %389 = vector.extract_strided_slice %251 {offsets = [19, 0], sizes = [1, 128], strides = [1, 1]} : vector<21x128xf32> to vector<1x128xf32>
    %390 = vector.shape_cast %389 : vector<1x128xf32> to vector<128xf32>
    %c0_207 = arith.constant 0 : index
    %c10_208 = arith.constant 10 : index
    %c25 = arith.constant 25 : index
    %c0_209 = arith.constant 0 : index
    %391 = vector.load %arg15[%c0_207, %c10_208, %c25, %c0_209] : memref<1x28x40x128xf32, #tpu.memory_space<vmem>>, vector<1x8x8x128xf32>
    %392 = vector.shape_cast %390 : vector<128xf32> to vector<1x1x1x128xf32>
    %393 = vector.broadcast %392 : vector<1x1x1x128xf32> to vector<1x8x8x128xf32>
    %394 = arith.mulf %393, %391 : vector<1x8x8x128xf32>
    %395 = arith.addf %388, %394 : vector<1x8x8x128xf32>
    %396 = vector.extract_strided_slice %251 {offsets = [20, 0], sizes = [1, 128], strides = [1, 1]} : vector<21x128xf32> to vector<1x128xf32>
    %397 = vector.shape_cast %396 : vector<1x128xf32> to vector<128xf32>
    %c0_210 = arith.constant 0 : index
    %c10_211 = arith.constant 10 : index
    %c26 = arith.constant 26 : index
    %c0_212 = arith.constant 0 : index
    %398 = vector.load %arg15[%c0_210, %c10_211, %c26, %c0_212] : memref<1x28x40x128xf32, #tpu.memory_space<vmem>>, vector<1x8x8x128xf32>
    %399 = vector.shape_cast %397 : vector<128xf32> to vector<1x1x1x128xf32>
    %400 = vector.broadcast %399 : vector<1x1x1x128xf32> to vector<1x8x8x128xf32>
    %401 = arith.mulf %400, %398 : vector<1x8x8x128xf32>
    %402 = arith.addf %395, %401 : vector<1x8x8x128xf32>
    %403 = vector.extract_strided_slice %252 {offsets = [0, 0], sizes = [1, 128], strides = [1, 1]} : vector<21x128xf32> to vector<1x128xf32>
    %404 = vector.shape_cast %403 : vector<1x128xf32> to vector<128xf32>
    %c0_213 = arith.constant 0 : index
    %c0_214 = arith.constant 0 : index
    %c16_215 = arith.constant 16 : index
    %c0_216 = arith.constant 0 : index
    %405 = vector.load %arg15[%c0_213, %c0_214, %c16_215, %c0_216] : memref<1x28x40x128xf32, #tpu.memory_space<vmem>>, vector<1x8x8x128xf32>
    %406 = vector.shape_cast %404 : vector<128xf32> to vector<1x1x1x128xf32>
    %407 = vector.broadcast %406 : vector<1x1x1x128xf32> to vector<1x8x8x128xf32>
    %408 = arith.mulf %407, %405 : vector<1x8x8x128xf32>
    %409 = arith.addf %402, %408 : vector<1x8x8x128xf32>
    %410 = vector.extract_strided_slice %252 {offsets = [1, 0], sizes = [1, 128], strides = [1, 1]} : vector<21x128xf32> to vector<1x128xf32>
    %411 = vector.shape_cast %410 : vector<1x128xf32> to vector<128xf32>
    %c0_217 = arith.constant 0 : index
    %c1_218 = arith.constant 1 : index
    %c16_219 = arith.constant 16 : index
    %c0_220 = arith.constant 0 : index
    %412 = vector.load %arg15[%c0_217, %c1_218, %c16_219, %c0_220] : memref<1x28x40x128xf32, #tpu.memory_space<vmem>>, vector<1x8x8x128xf32>
    %413 = vector.shape_cast %411 : vector<128xf32> to vector<1x1x1x128xf32>
    %414 = vector.broadcast %413 : vector<1x1x1x128xf32> to vector<1x8x8x128xf32>
    %415 = arith.mulf %414, %412 : vector<1x8x8x128xf32>
    %416 = arith.addf %409, %415 : vector<1x8x8x128xf32>
    %417 = vector.extract_strided_slice %252 {offsets = [2, 0], sizes = [1, 128], strides = [1, 1]} : vector<21x128xf32> to vector<1x128xf32>
    %418 = vector.shape_cast %417 : vector<1x128xf32> to vector<128xf32>
    %c0_221 = arith.constant 0 : index
    %c2_222 = arith.constant 2 : index
    %c16_223 = arith.constant 16 : index
    %c0_224 = arith.constant 0 : index
    %419 = vector.load %arg15[%c0_221, %c2_222, %c16_223, %c0_224] : memref<1x28x40x128xf32, #tpu.memory_space<vmem>>, vector<1x8x8x128xf32>
    %420 = vector.shape_cast %418 : vector<128xf32> to vector<1x1x1x128xf32>
    %421 = vector.broadcast %420 : vector<1x1x1x128xf32> to vector<1x8x8x128xf32>
    %422 = arith.mulf %421, %419 : vector<1x8x8x128xf32>
    %423 = arith.addf %416, %422 : vector<1x8x8x128xf32>
    %424 = vector.extract_strided_slice %252 {offsets = [3, 0], sizes = [1, 128], strides = [1, 1]} : vector<21x128xf32> to vector<1x128xf32>
    %425 = vector.shape_cast %424 : vector<1x128xf32> to vector<128xf32>
    %c0_225 = arith.constant 0 : index
    %c3_226 = arith.constant 3 : index
    %c16_227 = arith.constant 16 : index
    %c0_228 = arith.constant 0 : index
    %426 = vector.load %arg15[%c0_225, %c3_226, %c16_227, %c0_228] : memref<1x28x40x128xf32, #tpu.memory_space<vmem>>, vector<1x8x8x128xf32>
    %427 = vector.shape_cast %425 : vector<128xf32> to vector<1x1x1x128xf32>
    %428 = vector.broadcast %427 : vector<1x1x1x128xf32> to vector<1x8x8x128xf32>
    %429 = arith.mulf %428, %426 : vector<1x8x8x128xf32>
    %430 = arith.addf %423, %429 : vector<1x8x8x128xf32>
    %431 = vector.extract_strided_slice %252 {offsets = [4, 0], sizes = [1, 128], strides = [1, 1]} : vector<21x128xf32> to vector<1x128xf32>
    %432 = vector.shape_cast %431 : vector<1x128xf32> to vector<128xf32>
    %c0_229 = arith.constant 0 : index
    %c4_230 = arith.constant 4 : index
    %c16_231 = arith.constant 16 : index
    %c0_232 = arith.constant 0 : index
    %433 = vector.load %arg15[%c0_229, %c4_230, %c16_231, %c0_232] : memref<1x28x40x128xf32, #tpu.memory_space<vmem>>, vector<1x8x8x128xf32>
    %434 = vector.shape_cast %432 : vector<128xf32> to vector<1x1x1x128xf32>
    %435 = vector.broadcast %434 : vector<1x1x1x128xf32> to vector<1x8x8x128xf32>
    %436 = arith.mulf %435, %433 : vector<1x8x8x128xf32>
    %437 = arith.addf %430, %436 : vector<1x8x8x128xf32>
    %438 = vector.extract_strided_slice %252 {offsets = [5, 0], sizes = [1, 128], strides = [1, 1]} : vector<21x128xf32> to vector<1x128xf32>
    %439 = vector.shape_cast %438 : vector<1x128xf32> to vector<128xf32>
    %c0_233 = arith.constant 0 : index
    %c5 = arith.constant 5 : index
    %c16_234 = arith.constant 16 : index
    %c0_235 = arith.constant 0 : index
    %440 = vector.load %arg15[%c0_233, %c5, %c16_234, %c0_235] : memref<1x28x40x128xf32, #tpu.memory_space<vmem>>, vector<1x8x8x128xf32>
    %441 = vector.shape_cast %439 : vector<128xf32> to vector<1x1x1x128xf32>
    %442 = vector.broadcast %441 : vector<1x1x1x128xf32> to vector<1x8x8x128xf32>
    %443 = arith.mulf %442, %440 : vector<1x8x8x128xf32>
    %444 = arith.addf %437, %443 : vector<1x8x8x128xf32>
    %445 = vector.extract_strided_slice %252 {offsets = [6, 0], sizes = [1, 128], strides = [1, 1]} : vector<21x128xf32> to vector<1x128xf32>
    %446 = vector.shape_cast %445 : vector<1x128xf32> to vector<128xf32>
    %c0_236 = arith.constant 0 : index
    %c6_237 = arith.constant 6 : index
    %c16_238 = arith.constant 16 : index
    %c0_239 = arith.constant 0 : index
    %447 = vector.load %arg15[%c0_236, %c6_237, %c16_238, %c0_239] : memref<1x28x40x128xf32, #tpu.memory_space<vmem>>, vector<1x8x8x128xf32>
    %448 = vector.shape_cast %446 : vector<128xf32> to vector<1x1x1x128xf32>
    %449 = vector.broadcast %448 : vector<1x1x1x128xf32> to vector<1x8x8x128xf32>
    %450 = arith.mulf %449, %447 : vector<1x8x8x128xf32>
    %451 = arith.addf %444, %450 : vector<1x8x8x128xf32>
    %452 = vector.extract_strided_slice %252 {offsets = [7, 0], sizes = [1, 128], strides = [1, 1]} : vector<21x128xf32> to vector<1x128xf32>
    %453 = vector.shape_cast %452 : vector<1x128xf32> to vector<128xf32>
    %c0_240 = arith.constant 0 : index
    %c7_241 = arith.constant 7 : index
    %c16_242 = arith.constant 16 : index
    %c0_243 = arith.constant 0 : index
    %454 = vector.load %arg15[%c0_240, %c7_241, %c16_242, %c0_243] : memref<1x28x40x128xf32, #tpu.memory_space<vmem>>, vector<1x8x8x128xf32>
    %455 = vector.shape_cast %453 : vector<128xf32> to vector<1x1x1x128xf32>
    %456 = vector.broadcast %455 : vector<1x1x1x128xf32> to vector<1x8x8x128xf32>
    %457 = arith.mulf %456, %454 : vector<1x8x8x128xf32>
    %458 = arith.addf %451, %457 : vector<1x8x8x128xf32>
    %459 = vector.extract_strided_slice %252 {offsets = [8, 0], sizes = [1, 128], strides = [1, 1]} : vector<21x128xf32> to vector<1x128xf32>
    %460 = vector.shape_cast %459 : vector<1x128xf32> to vector<128xf32>
    %c0_244 = arith.constant 0 : index
    %c8_245 = arith.constant 8 : index
    %c16_246 = arith.constant 16 : index
    %c0_247 = arith.constant 0 : index
    %461 = vector.load %arg15[%c0_244, %c8_245, %c16_246, %c0_247] : memref<1x28x40x128xf32, #tpu.memory_space<vmem>>, vector<1x8x8x128xf32>
    %462 = vector.shape_cast %460 : vector<128xf32> to vector<1x1x1x128xf32>
    %463 = vector.broadcast %462 : vector<1x1x1x128xf32> to vector<1x8x8x128xf32>
    %464 = arith.mulf %463, %461 : vector<1x8x8x128xf32>
    %465 = arith.addf %458, %464 : vector<1x8x8x128xf32>
    %466 = vector.extract_strided_slice %252 {offsets = [9, 0], sizes = [1, 128], strides = [1, 1]} : vector<21x128xf32> to vector<1x128xf32>
    %467 = vector.shape_cast %466 : vector<1x128xf32> to vector<128xf32>
    %c0_248 = arith.constant 0 : index
    %c9_249 = arith.constant 9 : index
    %c16_250 = arith.constant 16 : index
    %c0_251 = arith.constant 0 : index
    %468 = vector.load %arg15[%c0_248, %c9_249, %c16_250, %c0_251] : memref<1x28x40x128xf32, #tpu.memory_space<vmem>>, vector<1x8x8x128xf32>
    %469 = vector.shape_cast %467 : vector<128xf32> to vector<1x1x1x128xf32>
    %470 = vector.broadcast %469 : vector<1x1x1x128xf32> to vector<1x8x8x128xf32>
    %471 = arith.mulf %470, %468 : vector<1x8x8x128xf32>
    %472 = arith.addf %465, %471 : vector<1x8x8x128xf32>
    %473 = vector.extract_strided_slice %252 {offsets = [10, 0], sizes = [1, 128], strides = [1, 1]} : vector<21x128xf32> to vector<1x128xf32>
    %474 = vector.shape_cast %473 : vector<1x128xf32> to vector<128xf32>
    %c0_252 = arith.constant 0 : index
    %c10_253 = arith.constant 10 : index
    %c16_254 = arith.constant 16 : index
    %c0_255 = arith.constant 0 : index
    %475 = vector.load %arg15[%c0_252, %c10_253, %c16_254, %c0_255] : memref<1x28x40x128xf32, #tpu.memory_space<vmem>>, vector<1x8x8x128xf32>
    %476 = vector.shape_cast %474 : vector<128xf32> to vector<1x1x1x128xf32>
    %477 = vector.broadcast %476 : vector<1x1x1x128xf32> to vector<1x8x8x128xf32>
    %478 = arith.mulf %477, %475 : vector<1x8x8x128xf32>
    %479 = arith.addf %472, %478 : vector<1x8x8x128xf32>
    %480 = vector.extract_strided_slice %252 {offsets = [11, 0], sizes = [1, 128], strides = [1, 1]} : vector<21x128xf32> to vector<1x128xf32>
    %481 = vector.shape_cast %480 : vector<1x128xf32> to vector<128xf32>
    %c0_256 = arith.constant 0 : index
    %c11_257 = arith.constant 11 : index
    %c16_258 = arith.constant 16 : index
    %c0_259 = arith.constant 0 : index
    %482 = vector.load %arg15[%c0_256, %c11_257, %c16_258, %c0_259] : memref<1x28x40x128xf32, #tpu.memory_space<vmem>>, vector<1x8x8x128xf32>
    %483 = vector.shape_cast %481 : vector<128xf32> to vector<1x1x1x128xf32>
    %484 = vector.broadcast %483 : vector<1x1x1x128xf32> to vector<1x8x8x128xf32>
    %485 = arith.mulf %484, %482 : vector<1x8x8x128xf32>
    %486 = arith.addf %479, %485 : vector<1x8x8x128xf32>
    %487 = vector.extract_strided_slice %252 {offsets = [12, 0], sizes = [1, 128], strides = [1, 1]} : vector<21x128xf32> to vector<1x128xf32>
    %488 = vector.shape_cast %487 : vector<1x128xf32> to vector<128xf32>
    %c0_260 = arith.constant 0 : index
    %c12_261 = arith.constant 12 : index
    %c16_262 = arith.constant 16 : index
    %c0_263 = arith.constant 0 : index
    %489 = vector.load %arg15[%c0_260, %c12_261, %c16_262, %c0_263] : memref<1x28x40x128xf32, #tpu.memory_space<vmem>>, vector<1x8x8x128xf32>
    %490 = vector.shape_cast %488 : vector<128xf32> to vector<1x1x1x128xf32>
    %491 = vector.broadcast %490 : vector<1x1x1x128xf32> to vector<1x8x8x128xf32>
    %492 = arith.mulf %491, %489 : vector<1x8x8x128xf32>
    %493 = arith.addf %486, %492 : vector<1x8x8x128xf32>
    %494 = vector.extract_strided_slice %252 {offsets = [13, 0], sizes = [1, 128], strides = [1, 1]} : vector<21x128xf32> to vector<1x128xf32>
    %495 = vector.shape_cast %494 : vector<1x128xf32> to vector<128xf32>
    %c0_264 = arith.constant 0 : index
    %c13_265 = arith.constant 13 : index
    %c16_266 = arith.constant 16 : index
    %c0_267 = arith.constant 0 : index
    %496 = vector.load %arg15[%c0_264, %c13_265, %c16_266, %c0_267] : memref<1x28x40x128xf32, #tpu.memory_space<vmem>>, vector<1x8x8x128xf32>
    %497 = vector.shape_cast %495 : vector<128xf32> to vector<1x1x1x128xf32>
    %498 = vector.broadcast %497 : vector<1x1x1x128xf32> to vector<1x8x8x128xf32>
    %499 = arith.mulf %498, %496 : vector<1x8x8x128xf32>
    %500 = arith.addf %493, %499 : vector<1x8x8x128xf32>
    %501 = vector.extract_strided_slice %252 {offsets = [14, 0], sizes = [1, 128], strides = [1, 1]} : vector<21x128xf32> to vector<1x128xf32>
    %502 = vector.shape_cast %501 : vector<1x128xf32> to vector<128xf32>
    %c0_268 = arith.constant 0 : index
    %c14_269 = arith.constant 14 : index
    %c16_270 = arith.constant 16 : index
    %c0_271 = arith.constant 0 : index
    %503 = vector.load %arg15[%c0_268, %c14_269, %c16_270, %c0_271] : memref<1x28x40x128xf32, #tpu.memory_space<vmem>>, vector<1x8x8x128xf32>
    %504 = vector.shape_cast %502 : vector<128xf32> to vector<1x1x1x128xf32>
    %505 = vector.broadcast %504 : vector<1x1x1x128xf32> to vector<1x8x8x128xf32>
    %506 = arith.mulf %505, %503 : vector<1x8x8x128xf32>
    %507 = arith.addf %500, %506 : vector<1x8x8x128xf32>
    %508 = vector.extract_strided_slice %252 {offsets = [15, 0], sizes = [1, 128], strides = [1, 1]} : vector<21x128xf32> to vector<1x128xf32>
    %509 = vector.shape_cast %508 : vector<1x128xf32> to vector<128xf32>
    %c0_272 = arith.constant 0 : index
    %c15_273 = arith.constant 15 : index
    %c16_274 = arith.constant 16 : index
    %c0_275 = arith.constant 0 : index
    %510 = vector.load %arg15[%c0_272, %c15_273, %c16_274, %c0_275] : memref<1x28x40x128xf32, #tpu.memory_space<vmem>>, vector<1x8x8x128xf32>
    %511 = vector.shape_cast %509 : vector<128xf32> to vector<1x1x1x128xf32>
    %512 = vector.broadcast %511 : vector<1x1x1x128xf32> to vector<1x8x8x128xf32>
    %513 = arith.mulf %512, %510 : vector<1x8x8x128xf32>
    %514 = arith.addf %507, %513 : vector<1x8x8x128xf32>
    %515 = vector.extract_strided_slice %252 {offsets = [16, 0], sizes = [1, 128], strides = [1, 1]} : vector<21x128xf32> to vector<1x128xf32>
    %516 = vector.shape_cast %515 : vector<1x128xf32> to vector<128xf32>
    %c0_276 = arith.constant 0 : index
    %c16_277 = arith.constant 16 : index
    %c16_278 = arith.constant 16 : index
    %c0_279 = arith.constant 0 : index
    %517 = vector.load %arg15[%c0_276, %c16_277, %c16_278, %c0_279] : memref<1x28x40x128xf32, #tpu.memory_space<vmem>>, vector<1x8x8x128xf32>
    %518 = vector.shape_cast %516 : vector<128xf32> to vector<1x1x1x128xf32>
    %519 = vector.broadcast %518 : vector<1x1x1x128xf32> to vector<1x8x8x128xf32>
    %520 = arith.mulf %519, %517 : vector<1x8x8x128xf32>
    %521 = arith.addf %514, %520 : vector<1x8x8x128xf32>
    %522 = vector.extract_strided_slice %252 {offsets = [17, 0], sizes = [1, 128], strides = [1, 1]} : vector<21x128xf32> to vector<1x128xf32>
    %523 = vector.shape_cast %522 : vector<1x128xf32> to vector<128xf32>
    %c0_280 = arith.constant 0 : index
    %c17_281 = arith.constant 17 : index
    %c16_282 = arith.constant 16 : index
    %c0_283 = arith.constant 0 : index
    %524 = vector.load %arg15[%c0_280, %c17_281, %c16_282, %c0_283] : memref<1x28x40x128xf32, #tpu.memory_space<vmem>>, vector<1x8x8x128xf32>
    %525 = vector.shape_cast %523 : vector<128xf32> to vector<1x1x1x128xf32>
    %526 = vector.broadcast %525 : vector<1x1x1x128xf32> to vector<1x8x8x128xf32>
    %527 = arith.mulf %526, %524 : vector<1x8x8x128xf32>
    %528 = arith.addf %521, %527 : vector<1x8x8x128xf32>
    %529 = vector.extract_strided_slice %252 {offsets = [18, 0], sizes = [1, 128], strides = [1, 1]} : vector<21x128xf32> to vector<1x128xf32>
    %530 = vector.shape_cast %529 : vector<1x128xf32> to vector<128xf32>
    %c0_284 = arith.constant 0 : index
    %c18_285 = arith.constant 18 : index
    %c16_286 = arith.constant 16 : index
    %c0_287 = arith.constant 0 : index
    %531 = vector.load %arg15[%c0_284, %c18_285, %c16_286, %c0_287] : memref<1x28x40x128xf32, #tpu.memory_space<vmem>>, vector<1x8x8x128xf32>
    %532 = vector.shape_cast %530 : vector<128xf32> to vector<1x1x1x128xf32>
    %533 = vector.broadcast %532 : vector<1x1x1x128xf32> to vector<1x8x8x128xf32>
    %534 = arith.mulf %533, %531 : vector<1x8x8x128xf32>
    %535 = arith.addf %528, %534 : vector<1x8x8x128xf32>
    %536 = vector.extract_strided_slice %252 {offsets = [19, 0], sizes = [1, 128], strides = [1, 1]} : vector<21x128xf32> to vector<1x128xf32>
    %537 = vector.shape_cast %536 : vector<1x128xf32> to vector<128xf32>
    %c0_288 = arith.constant 0 : index
    %c19_289 = arith.constant 19 : index
    %c16_290 = arith.constant 16 : index
    %c0_291 = arith.constant 0 : index
    %538 = vector.load %arg15[%c0_288, %c19_289, %c16_290, %c0_291] : memref<1x28x40x128xf32, #tpu.memory_space<vmem>>, vector<1x8x8x128xf32>
    %539 = vector.shape_cast %537 : vector<128xf32> to vector<1x1x1x128xf32>
    %540 = vector.broadcast %539 : vector<1x1x1x128xf32> to vector<1x8x8x128xf32>
    %541 = arith.mulf %540, %538 : vector<1x8x8x128xf32>
    %542 = arith.addf %535, %541 : vector<1x8x8x128xf32>
    %543 = vector.extract_strided_slice %252 {offsets = [20, 0], sizes = [1, 128], strides = [1, 1]} : vector<21x128xf32> to vector<1x128xf32>
    %544 = vector.shape_cast %543 : vector<1x128xf32> to vector<128xf32>
    %c0_292 = arith.constant 0 : index
    %c20_293 = arith.constant 20 : index
    %c16_294 = arith.constant 16 : index
    %c0_295 = arith.constant 0 : index
    %545 = vector.load %arg15[%c0_292, %c20_293, %c16_294, %c0_295] : memref<1x28x40x128xf32, #tpu.memory_space<vmem>>, vector<1x8x8x128xf32>
    %546 = vector.shape_cast %544 : vector<128xf32> to vector<1x1x1x128xf32>
    %547 = vector.broadcast %546 : vector<1x1x1x128xf32> to vector<1x8x8x128xf32>
    %548 = arith.mulf %547, %545 : vector<1x8x8x128xf32>
    %549 = arith.addf %542, %548 : vector<1x8x8x128xf32>
    %550 = vector.shape_cast %549 : vector<1x8x8x128xf32> to vector<64x128xf32>
    %551 = arith.truncf %550 : vector<64x128xf32> to vector<64x128xbf16>
    %cst_296 = arith.constant dense<0.000000e+00> : vector<64x128xf32>
    %552 = tpu.matmul %551, %0, %cst_296 {dimension_numbers = #tpu.dot_dimension_numbers<[1], [0], [0], [1], [0, 0, 1, 1], [], []>} : vector<64x128xbf16>, vector<128x128xbf16>, vector<64x128xf32> -> vector<64x128xf32>
    %553 = vector.broadcast %1 : vector<1x128xf32> to vector<64x128xf32>
    %554 = arith.addf %552, %553 : vector<64x128xf32>
    %555 = vector.shape_cast %554 : vector<64x128xf32> to vector<1x8x8x128xf32>
    %c0_297 = arith.constant 0 : index
    %c2_298 = arith.constant 2 : index
    %c8_299 = arith.constant 8 : index
    %c0_300 = arith.constant 0 : index
    %556 = vector.load %arg14[%c0_297, %c2_298, %c8_299, %c0_300] : memref<1x12x24x128xf32, #tpu.memory_space<vmem>>, vector<1x8x8x128xf32>
    %557 = arith.mulf %555, %556 : vector<1x8x8x128xf32>
    %558 = vector.shape_cast %557 : vector<1x8x8x128xf32> to vector<64x128xf32>
    %559 = arith.truncf %558 : vector<64x128xf32> to vector<64x128xbf16>
    %cst_301 = arith.constant dense<0.000000e+00> : vector<64x128xf32>
    %560 = tpu.matmul %559, %0, %cst_301 {dimension_numbers = #tpu.dot_dimension_numbers<[1], [0], [0], [1], [0, 0, 1, 1], [], []>} : vector<64x128xbf16>, vector<128x128xbf16>, vector<64x128xf32> -> vector<64x128xf32>
    %561 = vector.broadcast %1 : vector<1x128xf32> to vector<64x128xf32>
    %562 = arith.addf %560, %561 : vector<64x128xf32>
    %563 = vector.shape_cast %562 : vector<64x128xf32> to vector<1x8x8x128xf32>
    %c0_302 = arith.constant 0 : index
    %c0_303 = arith.constant 0 : index
    %c0_304 = arith.constant 0 : index
    %c0_305 = arith.constant 0 : index
    %564 = vector.load %arg13[%c0_302, %c0_303, %c0_304, %c0_305] : memref<1x8x8x128xf32, #tpu.memory_space<vmem>>, vector<1x8x8x128xf32>
    tpu.vector_store %arg13[%c0_302, %c0_303, %c0_304, %c0_305], %563 {strides = array<i32>} : memref<1x8x8x128xf32, #tpu.memory_space<vmem>>, vector<1x8x8x128xf32>,
    return
  }
  func.func @transform_0(%arg0: i32) -> (i32, i32, i32, i32) {
    %c0_i32 = arith.constant 0 : i32
    %c0_i32_0 = arith.constant 0 : i32
    %c0_i32_1 = arith.constant 0 : i32
    %c0_i32_2 = arith.constant 0 : i32
    return %arg0, %c0_i32, %c0_i32_0, %c0_i32_1 : i32, i32, i32, i32
  }
  func.func @transform_1(%arg0: i32) -> (i32, i32) {
    %c0_i32 = arith.constant 0 : i32
    %c0_i32_0 = arith.constant 0 : i32
    %c0_i32_1 = arith.constant 0 : i32
    return %c0_i32, %c0_i32_0 : i32, i32
  }
  func.func @transform_2(%arg0: i32) -> (i32, i32) {
    %c0_i32 = arith.constant 0 : i32
    %c0_i32_0 = arith.constant 0 : i32
    %c0_i32_1 = arith.constant 0 : i32
    return %c0_i32, %c0_i32_0 : i32, i32
  }
  func.func @transform_3(%arg0: i32) -> (i32, i32) {
    %c0_i32 = arith.constant 0 : i32
    %c0_i32_0 = arith.constant 0 : i32
    %c0_i32_1 = arith.constant 0 : i32
    return %c0_i32, %c0_i32_0 : i32, i32
  }
  func.func @transform_4(%arg0: i32) -> (i32, i32) {
    %c0_i32 = arith.constant 0 : i32
    %c0_i32_0 = arith.constant 0 : i32
    %c0_i32_1 = arith.constant 0 : i32
    return %c0_i32, %c0_i32_0 : i32, i32
  }
  func.func @transform_5(%arg0: i32) -> (i32, i32) {
    %c0_i32 = arith.constant 0 : i32
    %c0_i32_0 = arith.constant 0 : i32
    %c0_i32_1 = arith.constant 0 : i32
    return %c0_i32, %c0_i32_0 : i32, i32
  }
  func.func @transform_6(%arg0: i32) -> (i32, i32) {
    %c0_i32 = arith.constant 0 : i32
    %c0_i32_0 = arith.constant 0 : i32
    %c0_i32_1 = arith.constant 0 : i32
    return %c0_i32, %c0_i32_0 : i32, i32
  }
  func.func @transform_7(%arg0: i32) -> (i32, i32, i32) {
    %c0_i32 = arith.constant 0 : i32
    %c0_i32_0 = arith.constant 0 : i32
    %c0_i32_1 = arith.constant 0 : i32
    %c0_i32_2 = arith.constant 0 : i32
    return %c0_i32, %c0_i32_0, %c0_i32_1 : i32, i32, i32
  }
  func.func @transform_8(%arg0: i32) -> (i32, i32) {
    %c0_i32 = arith.constant 0 : i32
    %c0_i32_0 = arith.constant 0 : i32
    %c0_i32_1 = arith.constant 0 : i32
    return %c0_i32, %c0_i32_0 : i32, i32
  }
  func.func @transform_9(%arg0: i32) -> (i32, i32) {
    %c0_i32 = arith.constant 0 : i32
    %c0_i32_0 = arith.constant 0 : i32
    %c0_i32_1 = arith.constant 0 : i32
    return %c0_i32, %c0_i32_0 : i32, i32
  }
  func.func @transform_10(%arg0: i32) -> (i32, i32) {
    %c0_i32 = arith.constant 0 : i32
    %c0_i32_0 = arith.constant 0 : i32
    %c0_i32_1 = arith.constant 0 : i32
    return %c0_i32, %c0_i32_0 : i32, i32
  }
  func.func @transform_11(%arg0: i32) -> (i32, i32) {
    %c0_i32 = arith.constant 0 : i32
    %c0_i32_0 = arith.constant 0 : i32
    %c0_i32_1 = arith.constant 0 : i32
    return %c0_i32, %c0_i32_0 : i32, i32
  }
  func.func @transform_12(%arg0: i32) -> (i32, i32, i32, i32) {
    %c0_i32 = arith.constant 0 : i32
    %c0_i32_0 = arith.constant 0 : i32
    %c0_i32_1 = arith.constant 0 : i32
    %c0_i32_2 = arith.constant 0 : i32
    return %arg0, %c0_i32, %c0_i32_0, %c0_i32_1 : i32, i32, i32, i32
  }
}

</mosaic_0001>

<bundles_post_ra>
// kernel: tpu_custom_call.1
= control target key start
LH: loop header
LB: loop body
LE: loop exit
PB: predicated region body
PF: predicated region fallthrough
CT: control target
= control target key end

     0   :  { %s6509_s0 = inlined_call_operand.vmem [shape: f32[2,8,8,128], index: 0, kind: input, shape index: {}]   ;;  %s6510_s1 = inlined_call_operand.hbm [shape: bf16[128,128], index: 1, kind: input, shape index: {}]   ;;  %s6511_s2 = inlined_call_operand.hbm [shape: f32[1,128], index: 2, kind: input, shape index: {}]   ;;  %s6512_s3 = inlined_call_operand.vmem [shape: f32[128,2], index: 3, kind: input, shape index: {}]   ;;  %s6513_s4 = inlined_call_operand.hbm [shape: f32[1,2], index: 4, kind: input, shape index: {}]   ;;  %s6514_s5 = inlined_call_operand.hbm [shape: f32[2,128], index: 5, kind: input, shape index: {}]   ;;  %s6515_s6 = inlined_call_operand.hbm [shape: f32[1,128], index: 6, kind: input, shape index: {}]   ;;  %s6516_s7 = inlined_call_operand.hbm [shape: f32[5,5,128], index: 7, kind: input, shape index: {}]   ;;  %s6517_s8 = inlined_call_operand.vmem [shape: f32[1,128], index: 8, kind: input, shape index: {}]   ;;  %s6518_s9 = inlined_call_operand.vmem [shape: f32[21,128], index: 9, kind: input, shape index: {}]   ;;  %s6519_s10 = inlined_call_operand.hbm [shape: f32[21,128], index: 10, kind: input, shape index: {}]   ;;  %s6520_s11 = inlined_call_operand.vmem [shape: f32[1,128], index: 11, kind: input, shape index: {}]   ;;  %s6521_s12 = inlined_call_operand.hbm [shape: f32[2,8,8,128], index: 12, kind: output, shape index: {}]  }
   0x1   :  { %6740 = sst [smem:[#allocation81_spill]] %s6511_s2 }
   0x2   :  { %6741 = sst [smem:[#allocation82_spill]] %s6514_s5 }
   0x3   :  { %17 = vsyncpa [#allocation5], 0 }
   0x4   :  { %18 = vsyncpa [#allocation8], 0 }
   0x5   :  { %19 = vsyncpa [#allocation11], 0 }
   0x6   :  { %20 = vsyncpa [#allocation14], 0 }
   0x7   :  { %21 = vsyncpa [#allocation6], 0 }
   0x8   :  { %23 = vsyncpa [#allocation6 + $0x1], 0  ;;  %s4461_s21 = smov 0   ;;  %s4463_s22 = smov 0  }
   0x9   :  { %s4465_s23 = smov 0   ;;  %s4467_s24 = smov 0  }
   0xa LB: > { %6742 = sst [smem:[#allocation22_spill]] %s4347_s21  ;;  %s4482_s25 = sadd.s32 4294967295, %s4359_s24   ;;  %s4359_s24 = sphi %s4467_s24, %s7012_s24   ;;  %s4355_s23 = sphi %s4465_s23, %s7014_s23   ;;  %s4351_s22 = sphi %s4463_s22, %s7016_s22   ;;  %s4347_s21 = sphi %s4461_s21, %s7015_s21  }
   0xb   : > { %6743 = sst [smem:[#allocation23_spill]] %s4355_s23  ;;  %s3566_s26 = sadd.s32 4294967294, %s4359_s24  }
   0xc   : > { %6744 = sst [smem:[#allocation24_spill]] %s4359_s24  ;;  %s4486_s27 = sadd.s32 1, %s4359_s24  }
   0xd   : > { %6745 = sst [smem:[#allocation25_spill]] %s4486_s27  ;;  %s293_s28 = sadd.s32 1, %s4355_s23 }
   0xe   : > { %s290_s29 = ssub.s32 %s4359_s24, %s4486_s27  ;;  %p303_p0 = scmp.ne.s32.totalorder %s4355_s23, %s4351_s22 }
   0xf   : > { %p291_p1 = scmp.eq.s32.totalorder %s290_s29, 0  ;;  %p304_p2 = scmp.eq.s32.totalorder %s4482_s25, 1 }
  0x10   : > { %p309_p3 = scmp.ne.s32.totalorder %s4351_s22, %s4347_s21  ;;  %p310_p4 = scmp.eq.s32.totalorder %s3566_s26, 1 }
  0x11   : > { %s4497_s30 = scalar_select %p291_p1, %s4355_s23, %s293_s28  }
  0x12   : > { %p4499_p5 = por %p304_p2, %p303_p0  ;;  %p4503_p6 = por %p310_p4, %p309_p3 }
  0x13   : > { %6746 = sst [smem:[#allocation26_spill]] %s4497_s30  ;;  %p3567_p7 = scmp.ge.s32.totalorder %s4359_s24, 1 }
  0x14   : > { %s6747_s13 = scalar_select %p4499_p5, 1, 0 }
  0x15   : > { %s6748_s14 = scalar_select %p4503_p6, 1, 0 }
  0x16   : > { %p317_p8 = scmp.lt.s32.totalorder %s4359_s24, 3  ;;  %p6526_p10 = scmp.eq.s32.totalorder %s4482_s25, 0 }
  0x17   : > { %6749 = sst [smem:[#allocation27_spill]] %s6748_s14  ;;  %s4373_s16 = smov [#allocation7]  }
  0x18   : > { %p4511_p11 = pnand %p3567_p7, %p317_p8  ;;  %s343_s17 = sshll.u32 %s4373_s16, 4  ;;  %s344_s17 = int_to_ptr.vmem [resolvable:$true] %s343_s17 }
  0x19   : > { %s4374_s18 = smov [#allocation10]   ;;  %s4375_s26 = smov [#allocation13]  }
  0x1a   : > { %s6750_s15 = scalar_select %p4511_p11, 1, 0 }
  0x1b   : > { %p3923_p12 = pneg %p4511_p11  ;;  %s368_s19 = sshll.u32 %s4374_s18, 4  ;;  %s4523_s19 = int_to_ptr.vmem [resolvable:$true] %s368_s19 }
  0x1c   : > { %s389_s28 = sshll.u32 %s4375_s26, 4  ;;  %s6752_s2 = sld [smem:[#allocation81_spill]]  ;;  %s4525_s28 = int_to_ptr.vmem [resolvable:$true] %s389_s28 }
  0x1d   : > { %p4519_p13 = pnand %p6526_p10, %p3923_p12 }
  0x1f   : > { %p4535_p1 = pneg %p4519_p13 }
  0x22   : > { %s4073_s16 = scalar_lea.hbm %s6752_s2, 16 }
  0x23   : > { %p4074_p0 = scmp.ne.s32.totalorder %s6752_s2, %s4073_s16  ;;  %p4080_p4 = scmp.lt.u32.totalorder %s4073_s16, %s6752_s2 }
  0x25   : > { %p4076_p2 = pnand %p4535_p1, %p4074_p0 }
  0x27   : > { %p4077_p3 = pneg %p4076_p2 }
  0x29   : > { %p4082_p7 = pnand %p4080_p4, %p4077_p3 }
  0x2b   : > { %4085 = shalt.err (!%p4082_p7)
}
  0x2c   : > { %s4086_s30 = scalar_lea.vmem %s344_s17, 16  ;;  %s4093_s23 = scalar_lea.vmem %s344_s17, 32 }
  0x2d   : > { %p4087_p8 = scmp.ne.s32.totalorder %s344_s17, %s4086_s30  ;;  %p4094_p10 = scmp.lt.s32.totalorder %s344_s17, %s344_s17 }
  0x2e   : > { %p4095_p6 = scmp.lt.s32.totalorder %s4093_s23, %s4086_s30 }
  0x2f   : > { %p4089_p12 = pnand %p4087_p8, %p4535_p1 }
  0x30   : > { %p4096_p5 = por %p4095_p6, %p4094_p10 }
  0x31   : > { %p4090_p9 = pneg %p4089_p12 }
  0x33   : > { %p4097_p11 = pnand %p4096_p5, %p4090_p9 }
  0x35   : > { %4100 = shalt.err (!%p4097_p11)
}
  0x36   : > { %3929 = dma.hbm_to_vmem [thread:$0]  (!%p4519_p13), %s6752_s2, 16, %s344_s17, [#allocation8]  }
  0x37   : > { %s6754_s5 = sld [smem:[#allocation82_spill]] }
  0x3d   : > { %s4101_s26 = scalar_lea.hbm %s6754_s5, 32 }
  0x3e   : > { %p4102_p0 = scmp.ne.s32.totalorder %s6754_s5, %s4101_s26  ;;  %p4108_p5 = scmp.lt.u32.totalorder %s4101_s26, %s6754_s5 }
  0x40   : > { %p4104_p2 = pnand %p4102_p0, %p4535_p1 }
  0x42   : > { %p4105_p6 = pneg %p4104_p2 }
  0x44   : > { %p4110_p9 = pnand %p4108_p5, %p4105_p6 }
  0x46   : > { %4113 = shalt.err (!%p4110_p9)
}
  0x47   : > { %s4114_s17 = scalar_lea.vmem %s4523_s19, 32  ;;  %p4122_p4 = scmp.lt.s32.totalorder %s4523_s19, %s4523_s19 }
  0x48   : > { %p4115_p10 = scmp.ne.s32.totalorder %s4523_s19, %s4114_s17  ;;  %p4123_p7 = scmp.lt.s32.totalorder %s4114_s17, %s4114_s17 }
  0x4a   : > { %p4117_p11 = pnand %p4115_p10, %p4535_p1  ;;  %p4124_p8 = por %p4123_p7, %p4122_p4 }
  0x4c   : > { %p4118_p3 = pneg %p4117_p11 }
  0x4e   : > { %p4125_p12 = pnand %p4124_p8, %p4118_p3 }
  0x50   : > { %4128 = shalt.err (!%p4125_p12)
}
  0x51   : > { %3935 = dma.hbm_to_vmem [thread:$0]  (!%p4519_p13), %s6754_s5, 32, %s4523_s19, [#allocation11]  }
  0x52   : > { %s4129_s14 = scalar_lea.hbm %s6516_s7, 640 }
  0x53   : > { %p4130_p0 = scmp.ne.s32.totalorder %s6516_s7, %s4129_s14  ;;  %p4136_p5 = scmp.lt.u32.totalorder %s4129_s14, %s6516_s7 }
  0x55   : > { %p4132_p2 = pnand %p4130_p0, %p4535_p1 }
  0x57   : > { %p4133_p6 = pneg %p4132_p2 }
  0x59   : > { %p4138_p9 = pnand %p4136_p5, %p4133_p6 }
  0x5b   : > { %4141 = shalt.err (!%p4138_p9)
}
  0x5c   : > { %s4142_s19 = scalar_lea.vmem %s4525_s28, 640  ;;  %p4150_p4 = scmp.lt.s32.totalorder %s4525_s28, %s4525_s28 }
  0x5d   : > { %p4143_p10 = scmp.ne.s32.totalorder %s4525_s28, %s4142_s19  ;;  %p4151_p7 = scmp.lt.s32.totalorder %s4142_s19, %s4142_s19 }
  0x5f   : > { %p4145_p11 = pnand %p4143_p10, %p4535_p1  ;;  %p4152_p8 = por %p4151_p7, %p4150_p4 }
  0x61   : > { %p4146_p3 = pneg %p4145_p11 }
  0x63   : > { %p4153_p12 = pnand %p4152_p8, %p4146_p3 }
  0x65   : > { %4156 = shalt.err (!%p4153_p12)
}
  0x66   : > { %s6531_s17 = smov 128   ;;  %s6532_s21 = smov 8  }
  0x67   : > { %3941 = dma.hbm_to_vmem [thread:$0]  (!%p4519_p13), %s6516_s7, 640, %s4525_s28, [#allocation14], %s6531_s17, %s6531_s17, %s6532_s21  }
  0x68   : > { %s4378_s29 = smov [#allocation4]   ;;  %s4157_s30 = scalar_lea.hbm %s6510_s1, 1024 }
  0x69   : > { %s329_s14 = sshll.u32 %s4378_s29, 4  ;;  %p4158_p0 = scmp.ne.s32.totalorder %s6510_s1, %s4157_s30  ;;  %s330_s14 = int_to_ptr.vmem [resolvable:$true] %s329_s14 }
  0x6a   : > { %p4164_p5 = scmp.lt.u32.totalorder %s4157_s30, %s6510_s1 }
  0x6b   : > { %p4160_p2 = pnand %p4158_p0, %p4535_p1 }
  0x6d   : > { %p4161_p6 = pneg %p4160_p2 }
  0x6f   : > { %p4166_p9 = pnand %p4164_p5, %p4161_p6 }
  0x71   : > { %4169 = shalt.err (!%p4166_p9)
}
  0x72   : > { %s4170_s28 = scalar_lea.vmem %s330_s14, 1024  ;;  %p4178_p4 = scmp.lt.s32.totalorder %s330_s14, %s330_s14 }
  0x73   : > { %p4171_p10 = scmp.ne.s32.totalorder %s330_s14, %s4170_s28  ;;  %p4179_p7 = scmp.lt.s32.totalorder %s4170_s28, %s4170_s28 }
  0x75   : > { %p4173_p11 = pnand %p4171_p10, %p4535_p1  ;;  %p4180_p8 = por %p4179_p7, %p4178_p4 }
  0x77   : > { %p4174_p3 = pneg %p4173_p11 }
  0x79   : > { %p4181_p12 = pnand %p4180_p8, %p4174_p3 }
  0x7b   : > { %4184 = shalt.err (!%p4181_p12)
}
  0x7c   : > { %s4379_s24 = smov 64   ;;  %s4380_s27 = smov 4  }
  0x7d   : > { %3926 = dma.hbm_to_vmem [thread:$0]  (!%p4519_p13), %s6510_s1, 1024, %s330_s14, [#allocation5], %s4379_s24, %s4379_s24, %s4380_s27  }
  0x7e   : > { %s4381_s29 = smov [#allocation9]   ;;  %s4382_s26 = smov [#allocation12]  }
  0x7f   : > { %s357_s16 = sshll.u32 %s4381_s29, 4  ;;  %s379_s30 = sshll.u32 %s4382_s26, 4  ;;  %s358_s16 = int_to_ptr.vmem [resolvable:$true] %s357_s16  ;;  %s4618_s30 = int_to_ptr.vmem [resolvable:$true] %s379_s30 }
  0x80   : > { %s4185_s28 = scalar_lea.hbm %s6513_s4, 16 }
  0x81   : > { %p4186_p0 = scmp.ne.s32.totalorder %s6513_s4, %s4185_s28  ;;  %p4192_p5 = scmp.lt.u32.totalorder %s4185_s28, %s6513_s4 }
  0x83   : > { %p4188_p2 = pnand %p4186_p0, %p4535_p1 }
  0x85   : > { %p4189_p6 = pneg %p4188_p2 }
  0x87   : > { %p4194_p9 = pnand %p4192_p5, %p4189_p6 }
  0x89   : > { %4197 = shalt.err (!%p4194_p9)
}
  0x8a   : > { %s4198_s24 = scalar_lea.vmem %s358_s16, 16  ;;  %s4205_s27 = scalar_lea.vmem %s358_s16, 32 }
  0x8b   : > { %p4199_p10 = scmp.ne.s32.totalorder %s358_s16, %s4198_s24  ;;  %p4206_p4 = scmp.lt.s32.totalorder %s358_s16, %s358_s16 }
  0x8c   : > { %p4207_p7 = scmp.lt.s32.totalorder %s4205_s27, %s4198_s24 }
  0x8d   : > { %p4201_p11 = pnand %p4199_p10, %p4535_p1 }
  0x8e   : > { %p4208_p8 = por %p4207_p7, %p4206_p4 }
  0x8f   : > { %p4202_p3 = pneg %p4201_p11 }
  0x91   : > { %p4209_p12 = pnand %p4208_p8, %p4202_p3 }
  0x93   : > { %4212 = shalt.err (!%p4209_p12)
}
  0x94   : > { %3932 = dma.hbm_to_vmem [thread:$0]  (!%p4519_p13), %s6513_s4, 16, %s358_s16, [#allocation8]  }
  0x95   : > { %s4213_s26 = scalar_lea.hbm %s6515_s6, 16 }
  0x96   : > { %p4214_p0 = scmp.ne.s32.totalorder %s6515_s6, %s4213_s26  ;;  %p4220_p5 = scmp.lt.u32.totalorder %s4213_s26, %s6515_s6 }
  0x98   : > { %p4216_p2 = pnand %p4214_p0, %p4535_p1 }
  0x9a   : > { %p4217_p6 = pneg %p4216_p2 }
  0x9c   : > { %p4222_p9 = pnand %p4220_p5, %p4217_p6 }
  0x9e   : > { %4225 = shalt.err (!%p4222_p9)
}
  0x9f   : > { %s4226_s16 = scalar_lea.vmem %s4618_s30, 16  ;;  %s4233_s14 = scalar_lea.vmem %s4618_s30, 32 }
  0xa0   : > { %p4227_p10 = scmp.ne.s32.totalorder %s4618_s30, %s4226_s16  ;;  %p4234_p4 = scmp.lt.s32.totalorder %s4618_s30, %s4618_s30 }
  0xa1   : > { %p4235_p7 = scmp.lt.s32.totalorder %s4233_s14, %s4226_s16 }
  0xa2   : > { %p4229_p11 = pnand %p4227_p10, %p4535_p1 }
  0xa3   : > { %p4236_p8 = por %p4235_p7, %p4234_p4 }
  0xa4   : > { %p4230_p3 = pneg %p4229_p11 }
  0xa6   : > { %p4237_p12 = pnand %p4236_p8, %p4230_p3 }
  0xa8   : > { %4240 = shalt.err (!%p4237_p12)
}
  0xa9   : > { %3938 = dma.hbm_to_vmem [thread:$0]  (!%p4519_p13), %s6515_s6, 16, %s4618_s30, [#allocation11]  }
  0xaa   : > { %s4383_s17 = smov [#allocation15]   ;;  %s4241_s26 = scalar_lea.hbm %s6519_s10, 384 }
  0xab   : > { %s408_s21 = sshll.u32 %s4383_s17, 4  ;;  %p4242_p0 = scmp.ne.s32.totalorder %s6519_s10, %s4241_s26  ;;  %s409_s21 = int_to_ptr.vmem [resolvable:$true] %s408_s21 }
  0xac   : > { %p4248_p5 = scmp.lt.u32.totalorder %s4241_s26, %s6519_s10 }
  0xad   : > { %p4244_p2 = pnand %p4242_p0, %p4535_p1 }
  0xaf   : > { %p4245_p6 = pneg %p4244_p2 }
  0xb1   : > { %p4250_p9 = pnand %p4248_p5, %p4245_p6 }
  0xb3   : > { %4253 = shalt.err (!%p4250_p9)
}
  0xb4   : > { %s4254_s30 = scalar_lea.vmem %s409_s21, 384  ;;  %p4262_p4 = scmp.lt.s32.totalorder %s409_s21, %s409_s21 }
  0xb5   : > { %p4255_p10 = scmp.ne.s32.totalorder %s409_s21, %s4254_s30  ;;  %p4263_p7 = scmp.lt.s32.totalorder %s4254_s30, %s4254_s30 }
  0xb7   : > { %p4257_p11 = pnand %p4255_p10, %p4535_p1  ;;  %p4264_p8 = por %p4263_p7, %p4262_p4 }
  0xb9   : > { %p4258_p3 = pneg %p4257_p11 }
  0xbb   : > { %p4265_p12 = pnand %p4264_p8, %p4258_p3 }
  0xbd   : > { %4268 = shalt.err (!%p4265_p12)
}
  0xbe   : > { %s6755_s16 = smov 8   ;;  %s6756_s14 = smov 128  }
  0xbf   : > { %3944 = dma.hbm_to_vmem [thread:$0]  (!%p4519_p13), %s6519_s10, 384, %s409_s21, [#allocation14], %s6756_s14, %s6756_s14, %s6755_s16  }
  0xc0   : > { %p6757_p0 = scmp.ne.s32.totalorder %s6750_s15, 0 }
  0xc2   : > { %435 = sbr.rel (%p6757_p0) target bundleno = 2260 (0x8d4), region = 68 }
  0xc9   : > { %p6758_p1 = scmp.eq.s32.totalorder %s4482_s25, 0 }
  0xcb   : > { %4326 = dma.done.wait (%p6758_p1), [#allocation5], 1024   ;;  %p6759_p2 = pmov %p6758_p1 }
  0xcc   : > { %p6760_p6 = pmov %p6758_p1 }
  0xcd   : > { %4328 = vsyncadd (%p6759_p2), [#allocation5], 4294966272 }
  0xce   : > { %4330 = dma.done.wait (%p6760_p6), [#allocation8], 32   ;;  %p6761_p5 = pmov %p6758_p1 }
  0xcf   : > { %p6762_p9 = pmov %p6758_p1 }
  0xd0   : > { %4332 = vsyncadd (%p6761_p5), [#allocation8], 4294967264 }
  0xd1   : > { %4334 = dma.done.wait (%p6762_p9), [#allocation11], 48   ;;  %p6763_p13 = pmov %p6758_p1 }
  0xd2   : > { %p6764_p10 = pmov %p6758_p1 }
  0xd3   : > { %4336 = vsyncadd (%p6763_p13), [#allocation11], 4294967248 }
  0xd4   : > { %4338 = dma.done.wait (%p6764_p10), [#allocation14], 1024   ;;  %p6765_p11 = pmov %p6758_p1 }
  0xd5   : > { %s498_s15 = sand.u32 1, %s4351_s22   ;;  %p501_p3 = scmp.lt.s32.totalorder %s4482_s25, 1  ;;  %v4708_v0 = vld [vmem:[#allocation4] sm:$0xff]   ;;  %v4710_v1 = vld [vmem:[#allocation4 + $0x8] sm:$0xff]   ;;  %v4715_v2 = vld [vmem:[#allocation4 + $0x10] sm:$0xff]   ;;  %v4384_v20 = vmov 0.0|0.0  }
  0xd6   : > { %4340 = vsyncadd (%p6765_p11), [#allocation14], 4294966272  ;;  %s4704_s20 = sshll.u32 %s498_s15, 6  ;;  %6766 = vst [vmem:[#allocation28_spill] sm:$0xff] %v4708_v0  ;;  %3698 = vmatprep.subr.bf16.mxu0 %v4708_v0  ;;  %v4724_v3 = vld [vmem:[#allocation4 + $0x18] sm:$0xff]   ;;  %v4730_v7 = vld [vmem:[#allocation4 + $0x20] sm:$0xff]   ;;  %3841 = vmatprep.subr.bf16.mxu1 %v4384_v20 }
  0xd7   : > { %s502_s18 = scalar_select %p501_p3, %s4482_s25, 1  ;;  %6767 = vst [vmem:[#allocation29_spill] sm:$0xff] %v4710_v1  ;;  %3699 = vmatpush3.bf16.msra.mxu0 %v4708_v0  ;;  %6768 = vst [vmem:[#allocation30_spill] sm:$0xff] %v4715_v2  ;;  %v4734_v8 = vld [vmem:[#allocation4 + $0x28] sm:$0xff]   ;;  %v4738_v9 = vld [vmem:[#allocation4 + $0x30] sm:$0xff]   ;;  %vm4385_vm0 = vmmov 0  }
  0xd8   : > { %3700 = vmatprep.subr.bf16.mxu0 %v4710_v1  ;;  %6769 = vst [vmem:[#allocation31_spill] sm:$0xff] %v4724_v3  ;;  %6770 = vst [vmem:[#allocation32_spill] sm:$0xff] %v4730_v7  ;;  %v4742_v10 = vld [vmem:[#allocation4 + $0x38] sm:$0xff]   ;;  %v4386_v21 = vmov 0.0   ;;  %v4756_v22 = vld [vmem:[#allocation7] ss:$0 sm:$0xff] }
  0xd9   : > { %s3627_s17 = sshll.u32 %s502_s18, 6  ;;  %6771 = vst [vmem:[#allocation33_spill] sm:$0xff] %v4734_v8  ;;  %6772 = vst [vmem:[#allocation34_spill] sm:$0xff] %v4738_v9  ;;  %3738 = vmatprep.mubr.msk.f32.mxu1 %vm4385_vm0, %v4386_v21  ;;  %vm728_vm9 = vcmask 523264   ;;  %s4896_s26 = scalar_lea.vmem [#allocation16], %s4704_s20 }
  0xda   : > { %s4720_s29 = scalar_lea.vmem %s6509_s0, %s3627_s17  ;;  %6773 = vst [vmem:[#allocation35_spill] sm:$0xff] %v4742_v10  ;;  %6774 = vst [vmem:[#allocation36_spill] sm:$0xff] %v4756_v22  ;;  %s4898_s23 = smov 0  }
  0xdb   : > { %3701 = vmatpush3.bf16.msra.mxu0 %v4710_v1  ;;  %v525_v4 = vld [vmem:[%s4720_s29] sm:$0xff]  ;;  %v526_v5 = vld [vmem:[%s4720_s29 + $0x8] sm:$0xff]  ;;  %v527_v11 = vld [vmem:[%s4720_s29 + $0x10] sm:$0xff] }
  0xdc   : > { %3702 = vmatprep.subr.bf16.mxu0 %v4715_v2  ;;  %v533_v6 = vpack.c.bf16 %v526_v5, %v525_v4  ;;  %v528_v12 = vld [vmem:[%s4720_s29 + $0x18] sm:$0xff]  ;;  %v529_v13 = vld [vmem:[%s4720_s29 + $0x20] sm:$0xff]  ;;  %v530_v14 = vld [vmem:[%s4720_s29 + $0x28] sm:$0xff] }
  0xdd   : > { %v534_v15 = vpack.c.bf16 %v528_v12, %v527_v11  ;;  %v535_v16 = vpack.c.bf16 %v530_v14, %v529_v13  ;;  %v531_v17 = vld [vmem:[%s4720_s29 + $0x30] sm:$0xff]  ;;  %v532_v18 = vld [vmem:[%s4720_s29 + $0x38] sm:$0xff] }
  0xde   : > { %3714 = vmatprep.mubr.bf16.mxu0 %v533_v6  ;;  %v536_v19 = vpack.c.bf16 %v532_v18, %v531_v17 }
  0xdf   : > { %3703 = vmatpush3.bf16.msra.mxu0 %v4715_v2 }
  0xe0   : > { %3704 = vmatprep.subr.bf16.mxu0 %v4724_v3 }
  0xe3   : > { %3705 = vmatpush3.bf16.msra.mxu0 %v4724_v3 }
  0xe4   : > { %3706 = vmatprep.subr.bf16.mxu0 %v4730_v7 }
  0xe7   : > { %3707 = vmatpush3.bf16.msra.mxu0 %v4730_v7 }
  0xe8   : > { %3708 = vmatprep.subr.bf16.mxu0 %v4734_v8 }
  0xeb   : > { %3709 = vmatpush3.bf16.msra.mxu0 %v4734_v8 }
  0xec   : > { %3710 = vmatprep.subr.bf16.mxu0 %v4738_v9 }
  0xef   : > { %3711 = vmatpush3.bf16.msra.mxu0 %v4738_v9 }
  0xf0   : > { %3712 = vmatprep.subr.bf16.mxu0 %v4742_v10 }
  0xf3   : > { %3713 = vmatpush3.bf16.msra.mxu0 %v4742_v10 }
  0xf6   : > { %3715 = vmatmul.mubr.bf16.vlgmr.msra.gmra.mrb[0].mxu0 %v534_v15 }
  0xf7   : > { %3718 = vmatprep.mubr.bf16.mxu0 %v535_v16 }
  0xfe   : > { %3719 = vmatmul.mubr.bf16.gmra.mrb[4].mxu0 %v536_v19 }
 0x1c9   : > { %v3716_v23 = vpop.f32.mrb[0].mxu0 }
 0x1ca   : > { %v634_v24 = vadd.f32 %v3716_v23, %v4756_v22  ;;  %v625_v25 = vpop.f32.mrb[1].mxu0 }
 0x1cb   : > { %v4760_v26 = vadd.f32 %v4756_v22, %v625_v25  ;;  %v3717_v27 = vpop.f32.mrb[2].mxu0 }
 0x1cc   : > { %v666_v28 = vmul.f32 0.044715, %v634_v24  ;;  %v4763_v29 = vadd.f32 %v3717_v27, %v4756_v22  ;;  %v628_v30 = vpop.f32.mrb[3].mxu0 }
 0x1cd   : > { %v664_v31 = vmul.f32 0.044715, %v4760_v26  ;;  %v4767_v32 = vadd.f32 %v4756_v22, %v628_v30  ;;  %v658_v30 = vmul.f32 0.5, %v634_v24 }
 0x1ce   : > { %v674_v33 = vmul.f32 %v666_v28, %v634_v24  ;;  %v667_v34 = vmul.f32 0.044715, %v4763_v29 }
 0x1cf   : > { %v672_v35 = vmul.f32 %v664_v31, %v4760_v26  ;;  %v665_v36 = vmul.f32 0.044715, %v4767_v32 }
 0x1d0   : > { %v682_v37 = vmul.f32 %v674_v33, %v634_v24  ;;  %v675_v38 = vmul.f32 %v667_v34, %v4763_v29 }
 0x1d1   : > { %v680_v39 = vmul.f32 %v672_v35, %v4760_v26  ;;  %v673_v40 = vmul.f32 %v665_v36, %v4767_v32  ;;  %v3720_v41 = vpop.f32.mrb[4].mxu0  ;;  %v656_v35 = vmul.f32 0.5, %v4760_v26 }
 0x1d2   : > { %v690_v42 = vadd.f32 %v682_v37, %v634_v24  ;;  %v683_v43 = vmul.f32 %v675_v38, %v4763_v29  ;;  %v4777_v44 = vadd.f32 %v3720_v41, %v4756_v22  ;;  %v641_v45 = vpop.f32.mrb[5].mxu0  ;;  %v657_v41 = vmul.f32 0.5, %v4767_v32 }
 0x1d3   : > { %v688_v46 = vadd.f32 %v680_v39, %v4760_v26  ;;  %v681_v47 = vmul.f32 %v673_v40, %v4767_v32  ;;  %v4782_v48 = vadd.f32 %v4756_v22, %v641_v45  ;;  %v3721_v49 = vpop.f32.mrb[6].mxu0  ;;  %v659_v39 = vmul.f32 0.5, %v4763_v29 }
 0x1d4   : > { %v698_v50 = vmul.f32 0.7978846, %v690_v42  ;;  %v691_v51 = vadd.f32 %v683_v43, %v4763_v29  ;;  %v670_v52 = vmul.f32 0.044715, %v4777_v44  ;;  %v644_v53 = vpop.f32.mrb[7].mxu0  ;;  %v4790_v59 = vadd.f32 %v3721_v49, %v4756_v22 }
 0x1d5   : > { %v696_v54 = vmul.f32 0.7978846, %v688_v46  ;;  %v689_v55 = vadd.f32 %v681_v47, %v4767_v32  ;;  %v668_v56 = vmul.f32 0.044715, %v4782_v48  ;;  %v4794_v62 = vadd.f32 %v4756_v22, %v644_v53 }
 0x1d6   : > { %4050 = vtanh.f32 %v698_v50  ;;  %v699_v57 = vmul.f32 0.7978846, %v691_v51  ;;  %v678_v58 = vmul.f32 %v670_v52, %v4777_v44  ;;  %v671_v4 = vmul.f32 0.044715, %v4790_v59 }
 0x1d7   : > { %4052 = vtanh.f32 %v696_v54  ;;  %v697_v60 = vmul.f32 0.7978846, %v689_v55  ;;  %v676_v61 = vmul.f32 %v668_v56, %v4782_v48  ;;  %v669_v6 = vmul.f32 0.044715, %v4794_v62 }
 0x1d8   : > { %4054 = vtanh.f32 %v699_v57  ;;  %v686_v63 = vmul.f32 %v678_v58, %v4777_v44  ;;  %v679_v12 = vmul.f32 %v671_v4, %v4790_v59  ;;  %v662_v55 = vmul.f32 0.5, %v4777_v44 }
 0x1d9   : > { %4056 = vtanh.f32 %v697_v60  ;;  %v684_v5 = vmul.f32 %v676_v61, %v4782_v48  ;;  %v677_v14 = vmul.f32 %v669_v6, %v4794_v62  ;;  %v660_v57 = vmul.f32 0.5, %v4782_v48 }
 0x1da   : > { %v694_v11 = vadd.f32 %v686_v63, %v4777_v44  ;;  %v687_v16 = vmul.f32 %v679_v12, %v4790_v59  ;;  %v661_v6 = vmul.f32 0.5, %v4794_v62 }
 0x1db   : > { %v692_v13 = vadd.f32 %v684_v5, %v4782_v48  ;;  %v685_v18 = vmul.f32 %v677_v14, %v4794_v62  ;;  %v663_v5 = vmul.f32 0.5, %v4790_v59 }
 0x1dc   : > { %v702_v15 = vmul.f32 0.7978846, %v694_v11  ;;  %v695_v19 = vadd.f32 %v687_v16, %v4790_v59 }
 0x1dd   : > { %v700_v17 = vmul.f32 0.7978846, %v692_v13  ;;  %v693_v23 = vadd.f32 %v685_v18, %v4794_v62 }
 0x1de   : > { %4058 = vtanh.f32 %v702_v15  ;;  %v703_v27 = vmul.f32 0.7978846, %v695_v19 }
 0x1df   : > { %4060 = vtanh.f32 %v700_v17  ;;  %v701_v33 = vmul.f32 0.7978846, %v693_v23 }
 0x1e0   : > { %v4051_v25 = vpop.eup %4050  ;;  %4062 = vtanh.f32 %v703_v27 }
 0x1e1   : > { %v4053_v28 = vpop.eup %4052  ;;  %v714_v31 = vadd.f32 1.0, %v4051_v25  ;;  %4064 = vtanh.f32 %v701_v33 }
 0x1e2   : > { %v4055_v34 = vpop.eup %4054  ;;  %v712_v36 = vadd.f32 1.0, %v4053_v28 }
 0x1e3   : > { %v4057_v37 = vpop.eup %4056  ;;  %v4809_v38 = vmul.f32 %v714_v31, %v658_v30  ;;  %v715_v40 = vadd.f32 1.0, %v4055_v34 }
 0x1e4   : > { %v713_v42 = vadd.f32 1.0, %v4057_v37  ;;  %v4813_v43 = vmul.f32 %v712_v36, %v656_v35 }
 0x1e5   : > { %vm825_vm1 = vcmp.lt.s32.totalorder %v4809_v38, 0  ;;  %v833_v24 = vsub.s32 2147483648, %v4809_v38  ;;  %v4817_v45 = vmul.f32 %v715_v40, %v659_v39  ;;  %v4387_v39 = vmov 0.015625  }
 0x1e6   : > { %v4819_v26 = vmul.f32 %v713_v42, %v657_v41  ;;  %vm823_vm2 = vcmp.lt.s32.totalorder %v4813_v43, 0  ;;  %v831_v46 = vsub.s32 2147483648, %v4813_v43 }
 0x1e7   : > { %v4824_v29 = vsel %vm825_vm1, %v833_v24, %v4809_v38  ;;  %vm826_vm3 = vcmp.lt.s32.totalorder %v4817_v45, 0  ;;  %v834_v32 = vsub.s32 2147483648, %v4817_v45  ;;  %v3845_v47 = vpack.c.bf16 %v4817_v45, %v4809_v38 }
 0x1e8   : > { %v4059_v49 = vpop.eup %4058  ;;  %v3842_v50 = vpack.c.bf16 %v4819_v26, %v4813_v43  ;;  %vm824_vm4 = vcmp.lt.s32.totalorder %v4819_v26, 0  ;;  %v832_v51 = vsub.s32 2147483648, %v4819_v26  ;;  %v4835_v52 = vsel %vm823_vm2, %v831_v46, %v4813_v43 }
 0x1e9   : > { %v4061_v53 = vpop.eup %4060  ;;  %v4838_v54 = vsel %vm826_vm3, %v834_v32, %v4817_v45  ;;  %v718_v56 = vadd.f32 1.0, %v4059_v49  ;;  %v4365_v49 = vmov 2147483648  }
 0x1ea   : > { %v716_v58 = vadd.f32 1.0, %v4061_v53  ;;  %3843 = vmatpush3.bf16.msra.mxu1 %v3842_v50  ;;  %v4843_v60 = vsel %vm824_vm4, %v832_v51, %v4819_v26  ;;  %v4063_v63 = vpop.eup %4062 }
 0x1eb   : > { %v4845_v61 = vmul.f32 %v718_v56, %v662_v55  ;;  %3844 = vmatprep.subr.bf16.mxu1 %v4384_v20  ;;  %v4065_v44 = vpop.eup %4064  ;;  %v719_v12 = vadd.f32 1.0, %v4063_v63 }
 0x1ec   : > { %v4848_v4 = vmul.f32 %v716_v58, %v660_v57  ;;  %v717_v14 = vadd.f32 1.0, %v4065_v44 }
 0x1ed   : > { %v804_v48 = vmax.f32 %v4809_v38, %v4845_v61  ;;  %vm829_vm5 = vcmp.lt.s32.totalorder %v4845_v61, 0  ;;  %v837_v11 = vsub.s32 2147483648, %v4845_v61  ;;  %v4863_v62 = vmul.f32 %v719_v12, %v663_v5 }
 0x1ee   : > { %vm827_vm6 = vcmp.lt.s32.totalorder %v4848_v4, 0  ;;  %v835_v13 = vsub.s32 2147483648, %v4848_v4  ;;  %v802_v15 = vmax.f32 %v4813_v43, %v4848_v4  ;;  %3846 = vmatpush3.bf16.msra.mxu1 %v3845_v47  ;;  %v4869_v17 = vmul.f32 %v717_v14, %v661_v6 }
 0x1ef   : > { %v4861_v59 = vsel %vm829_vm5, %v837_v11, %v4845_v61  ;;  %3847 = vmatprep.subr.bf16.mxu1 %v4384_v20  ;;  %v805_v18 = vmax.f32 %v4817_v45, %v4863_v62  ;;  %vm830_vm7 = vcmp.lt.s32.totalorder %v4863_v62, 0  ;;  %v838_v19 = vsub.s32 2147483648, %v4863_v62 }
 0x1f0   : > { %v4867_v16 = vsel %vm827_vm6, %v835_v13, %v4848_v4  ;;  %v3851_v23 = vpack.c.bf16 %v4863_v62, %v4845_v61  ;;  %vm828_vm8 = vcmp.lt.s32.totalorder %v4869_v17, 0  ;;  %v836_v25 = vsub.s32 2147483648, %v4869_v17 }
 0x1f1   : > { %v803_v27 = vmax.f32 %v4819_v26, %v4869_v17  ;;  %v3848_v28 = vpack.c.bf16 %v4869_v17, %v4848_v4  ;;  %v807_v30 = vmax.f32 %v804_v48, %v805_v18  ;;  %v4884_v31 = vsel %vm830_vm7, %v838_v19, %v4863_v62 }
 0x1f2   : > { %v4887_v33 = vsel %vm828_vm8, %v836_v25, %v4869_v17  ;;  %v4361_v47 = vmov 2147483647  }
 0x1f3   : > { %v806_v34 = vmax.f32 %v802_v15, %v803_v27  ;;  %3849 = vmatpush3.bf16.msra.mxu1 %v3848_v28 }
 0x1f4   : > { %3850 = vmatprep.subr.bf16.mxu1 %v4384_v20 }
 0x1f5   : > { %v808_v35 = vmax.f32 %v806_v34, %v807_v30 }
 0x1f7   : > { %v809_v36 = vrot.slane %v808_v35, 4  ;;  %3852 = vmatpush3.bf16.msra.mxu1 %v3851_v23 }
 0x1f9   : > { %v810_v37 = vmax.f32 %v808_v35, %v809_v36 }
 0x1fa   : > { %3739 = vmatmul.mubr.msk.f32.vlgmr.msra.gmra.mrb[0].mxu1 %vm728_vm9, %v4387_v39 }
 0x1fb   : > { %v811_v40 = vrot.slane %v810_v37, 2 }
 0x1fd   : > { %v812_v41 = vmax.f32 %v810_v37, %v811_v40 }
 0x1ff   : > { %v813_v42 = vrot.slane %v812_v41, 1 }
 0x201   : > { %v4891_v24 = vmax.f32 %v812_v41, %v813_v42 }
 0x2cd   : > { %v4893_v46 = vpop.f32.mrb[0].mxu1 }
 0x2ce   : > { %v3740_v32 = vpop.f32.mrb[1].mxu1 }
 0x2cf LB: >> { %v859_v50 = vlaneseq  ;;  %v4388_v51 = vmov 0.0   ;;  %v855_v53 = vxor.u32 %v4363_v47, %v4367_v49  ;;  %v857_v55 = vand.u32 %v4363_v47, %v4367_v49  ;;  %s852_s23 = sadd.s32 1, %s4371_s23   ;;  %s4371_s23 = sphi %s4898_s23, %s852_s23   ;;  %v4367_v49 = vphi %v4365_v49, %v935_v49   ;;  %v4363_v47 = vphi %v4361_v47, %v4362_v47  }
 0x2d0   : >> { %3741 = vmatprep.subr.bf16.mxu0 %v4388_v51  ;;  %vm4389_vm10 = vmmov 0   ;;  %v4390_v6 = vmov 1.0|1.0   ;;  %v4391_v44 = vmov 1065369472   ;;  %p849_p4 = scmp.ge.s32.totalorder %s852_s23, 32  }
 0x2d1   : >> { %v4903_v56 = vshrl.u32 %v859_v50, 7  ;;  %3749 = vmatprep.mubr.msk.bf16.mxu0 %vm4389_vm10, %v4388_v51  ;;  %v856_v57 = vshra.s32 %v855_v53, 1  ;;  %v946_v15 = vld [vmem:[%s6512_s3] sm:$0xff] (%p849_p4)  ;;  %v947_v18 = vld [vmem:[%s6512_s3 + $0x8] sm:$0xff] (%p849_p4)  ;;  %v948_v19 = vld [vmem:[%s6512_s3 + $0x10] sm:$0xff] (%p849_p4)  ;;  %3788 = vmatprep.subr.mxu1 (%p849_p4), %v4386_v21  ;;  %vm944_vm10 = vcmask (%p849_p4), 1041408  }
 0x2d2   : > { %v3854_v23 = vpack.c.bf16 (%p849_p4), %v947_v18, %v946_v15  ;;  %3790 = vmatprep.mubr.msk.f32.mxu1 (%p849_p4), %vm4385_vm0, %v4386_v21  ;;  %v954_v27 = vld [vmem:[%s6512_s3 + $0x40] sm:$0xff] (%p849_p4)  ;;  %v955_v28 = vld [vmem:[%s6512_s3 + $0x48] sm:$0xff] (%p849_p4)  ;;  %v960_v40 = vld [vmem:[%s6512_s3 + $0x70] sm:$0xff] (%p849_p4)  ;;  %p6785_p7 = scmp.ne.s32.totalorder (%p849_p4), %s4482_s25, 0 }
 0x2d3   : >> { %6775 = vst [vmem:[#allocation37_spill] sm:$0xff] %v4903_v56  ;;  %v4906_v58 = vsub.s32 0, %v4903_v56  ;;  %v858_v63 = vadd.s32 %v857_v55, %v856_v57  ;;  %v3866_v30 = vpack.c.bf16 (%p849_p4), %v955_v28, %v954_v27  ;;  %v958_v35 = vld [vmem:[%s6512_s3 + $0x60] sm:$0xff] (%p849_p4)  ;;  %v959_v36 = vld [vmem:[%s6512_s3 + $0x68] sm:$0xff] (%p849_p4)  ;;  %v961_v41 = vld [vmem:[%s6512_s3 + $0x78] sm:$0xff] (%p849_p4) }
 0x2d4   : > { %v3872_v39 = vpack.c.bf16 (%p849_p4), %v959_v36, %v958_v35  ;;  %v3875_v32 = vpack.c.bf16 (%p849_p4), %v961_v41, %v960_v40  ;;  %v3614_v53 = vld [vmem:[#allocation9] ss:$0 sm:$0xff] (%p849_p4) }
 0x2d5   : >> { %6776 = vst [vmem:[#allocation38_spill] sm:$0xff] %v4906_v58  ;;  %v862_v5 = vrot.slane %v858_v63, %v4906_v58 }
 0x2d7   : >> { %vm863_vm11 = vcmp.le.s32.totalorder %v4835_v52, %v862_v5  ;;  %vm864_vm12 = vcmp.le.s32.totalorder %v4843_v60, %v862_v5  ;;  %vm865_vm13 = vcmp.le.s32.totalorder %v4824_v29, %v862_v5  ;;  %vm866_vm14 = vcmp.le.s32.totalorder %v4838_v54, %v862_v5  ;;  %v949_v29 = vld [vmem:[%s6512_s3 + $0x18] sm:$0xff] (%p849_p4)  ;;  %v950_v54 = vld [vmem:[%s6512_s3 + $0x20] sm:$0xff] (%p849_p4)  ;;  %v951_v60 = vld [vmem:[%s6512_s3 + $0x28] sm:$0xff] (%p849_p4) }
 0x2d8   : >> { %vm3605_vm15 = vmpackc.low %vm864_vm12, %vm863_vm11  ;;  %vm867_vm2 = vcmp.le.s32.totalorder %v4867_v16, %v862_v5  ;;  %vm868_vm3 = vcmp.le.s32.totalorder %v4887_v33, %v862_v5  ;;  %vm869_vm5 = vcmp.le.s32.totalorder %v4861_v59, %v862_v5  ;;  %vm870_vm6 = vcmp.le.s32.totalorder %v4884_v31, %v862_v5  ;;  %v953_v16 = vld [vmem:[%s6512_s3 + $0x38] sm:$0xff] (%p849_p4)  ;;  %v956_v31 = vld [vmem:[%s6512_s3 + $0x50] sm:$0xff] (%p849_p4) }
 0x2d9   : >> { %3742 = vmatpush3.bf16.msk.msra.mxu0 %vm3605_vm15, %v4390_v6  ;;  %vm3607_vm1 = vmpackc.low %vm866_vm14, %vm865_vm13  ;;  %v3857_v52 = vpack.c.bf16 (%p849_p4), %v949_v29, %v948_v19  ;;  %v3860_v59 = vpack.c.bf16 (%p849_p4), %v951_v60, %v950_v54  ;;  %v957_v33 = vld [vmem:[%s6512_s3 + $0x58] sm:$0xff] (%p849_p4)  ;;  %vm1048_vm11 = vcmask (%p849_p4), 15360   ;;  %vm1125_vm12 = vcmask (%p849_p4), 1042432  }
 0x2da   : >> { %3743 = vmatprep.subr.bf16.mxu0 %v4388_v51  ;;  %vm3609_vm4 = vmpackc.low %vm868_vm3, %vm867_vm2  ;;  %v3869_v34 = vpack.c.bf16 (%p849_p4), %v957_v33, %v956_v31 }
 0x2db   : >> { %vm3611_vm7 = vmpackc.low %vm870_vm6, %vm869_vm5 }
 0x2dd   : >> { %3744 = vmatpush3.bf16.msk.msra.mxu0 %vm3607_vm1, %v4390_v6 }
 0x2de   : >> { %3745 = vmatprep.subr.bf16.mxu0 %v4388_v51 }
 0x2e1   : >> { %3746 = vmatpush3.bf16.msk.msra.mxu0 %vm3609_vm4, %v4390_v6 }
 0x2e2   : >> { %3747 = vmatprep.subr.bf16.mxu0 %v4388_v51  ;;  %v1040_v51 = vld [vmem:[#allocation10] sm:$0x3] (%p849_p4) }
 0x2e3   : > { %3789 = vmatpush3.msk.msra.mxu1 (%p849_p4), %vm944_vm10, %v1040_v51 }
 0x2e5   : >> { %3748 = vmatpush3.bf16.msk.msra.mxu0 %vm3611_vm7, %v4390_v6  ;;  %v3615_v6 = vld [vmem:[#allocation12] ss:$0 sm:$0xff] (%p849_p4) }
 0x2e6   : > { %3853 = vmatprep.subr.bf16.mxu0 (%p849_p4), %v4384_v20 }
 0x2e8   : >> { %3750 = vmatmul.mubr.msk.bf16.vlgmr.msra.gmra.mrb[0].mxu0 %vm728_vm9, %v4391_v44  ;;  %vm942_vm9 = vcmask (%p849_p4), 1040384  }
 0x2e9   : > { %3785 = vmatprep.mubr.msk.f32.mxu0 (%p849_p4), %vm4385_vm0, %v4386_v21  ;;  %3855 = vmatpush3.bf16.msra.mxu0 (%p849_p4), %v3854_v23  ;;  %v952_v21 = vld [vmem:[%s6512_s3 + $0x30] sm:$0xff] (%p849_p4) }
 0x2ea   : > { %3856 = vmatprep.subr.bf16.mxu0 (%p849_p4), %v4384_v20  ;;  %v3863_v25 = vpack.c.bf16 (%p849_p4), %v953_v16, %v952_v21 }
 0x2ed   : > { %3858 = vmatpush3.bf16.msra.mxu0 (%p849_p4), %v3857_v52 }
 0x2ee   : > { %3859 = vmatprep.subr.bf16.mxu0 (%p849_p4), %v4384_v20 }
 0x2f1   : > { %3861 = vmatpush3.bf16.msra.mxu0 (%p849_p4), %v3860_v59 }
 0x2f2   : > { %3862 = vmatprep.subr.bf16.mxu0 (%p849_p4), %v4384_v20 }
 0x2f5   : > { %3864 = vmatpush3.bf16.msra.mxu0 (%p849_p4), %v3863_v25 }
 0x2f6   : > { %3865 = vmatprep.subr.bf16.mxu0 (%p849_p4), %v4384_v20 }
 0x2f9   : > { %3867 = vmatpush3.bf16.msra.mxu0 (%p849_p4), %v3866_v30 }
 0x2fa   : > { %3868 = vmatprep.subr.bf16.mxu0 (%p849_p4), %v4384_v20 }
 0x2fd   : > { %3870 = vmatpush3.bf16.msra.mxu0 (%p849_p4), %v3869_v34 }
 0x2fe   : > { %3871 = vmatprep.subr.bf16.mxu0 (%p849_p4), %v4384_v20 }
 0x301   : > { %3873 = vmatpush3.bf16.msra.mxu0 (%p849_p4), %v3872_v39 }
 0x302   : > { %3874 = vmatprep.subr.bf16.mxu0 (%p849_p4), %v4384_v20 }
 0x305   : > { %3876 = vmatpush3.bf16.msra.mxu0 (%p849_p4), %v3875_v32 }
 0x3b8   : > { %851 = sbr.rel (!%p849_p4) target bundleno = 719 (0x2cf), region = 171 }
 0x3bb   : >> { %v928_v48 = vpop.f32.mrb[0].mxu0 }
 0x3bc   : >> { %vm934_vm8 = vcmp.ge.f32.partialorder %v928_v48, 32.0  ;;  %v3751_v11 = vpop.f32.mrb[1].mxu0 }
 0x3bd   : >> { %v935_v49 = vsel %vm934_vm8, %v4367_v49, %v858_v63   ;;  %v936_v12 = vsel %vm934_vm8, %v858_v63, %v4363_v47   ;;  %v931_v13 = vpop.f32.mrb[2].mxu0 }
 0x3be   : >> { %v3752_v14 = vpop.f32.mrb[3].mxu0  ;;  %v4362_v47 = vmov %v936_v12   ;;  %v938_v37 = vsub.s32 (%p849_p4), 2147483648, %v936_v12  ;;  %vm937_vm0 = vcmp.lt.s32.totalorder (%p849_p4), %v936_v12, 0  ;;  %v943_v49 = vsel (%p849_p4), %vm942_vm9, %v4893_v46, %v4891_v24 }
 0x3c0   : > { %v939_v42 = vsel %vm937_vm0, %v938_v37, %v936_v12 }
 0x3c1   : > { %v940_v47 = vrot.slane %v939_v42, 6 }
 0x3c3   : > { %v945_v50 = vsel %vm944_vm10, %v943_v49, %v940_v47 }
 0x3c4   : > { %3786 = vmatmul.mubr.f32.vlgmr.msra.gmra.mrb[0].mxu0 %v945_v50 }
 0x497   : > { %v1035_v55 = vpop.f32.mrb[0].mxu0 }
 0x498   : > { %v1036_v57 = vadd.f32 %v3614_v53, %v1035_v55  ;;  %v3787_v63 = vpop.f32.mrb[1].mxu0 }
 0x49a   : > { %v1039_v5 = vmax.f32 %v1036_v57, 0.0 }
 0x49c   : > { %3791 = vmatmul.mubr.msk.f32.vlgmr.msra.gmra.mrb[0].mxu1 %vm1048_vm11, %v1039_v5 }
 0x56f   : > { %v1121_v44 = vpop.f32.mrb[0].mxu1 }
 0x570   : > { %v1122_v20 = vadd.f32 %v3615_v6, %v1121_v44  ;;  %v3792_v48 = vpop.f32.mrb[1].mxu1 }
 0x572   : > { %v1126_v11 = vsel %vm1125_vm12, %v1122_v20, 0.0 }
 0x573   : > { %v1127_v24 = vrot.slane %v1126_v11, 4 }
 0x575   : > { %v1128_v46 = vadd.f32 %v1127_v24, %v1126_v11 }
 0x577   : > { %v1129_v12 = vrot.slane %v1128_v46, 2 }
 0x579   : > { %v1130_v13 = vadd.f32 %v1129_v12, %v1128_v46 }
 0x57b   : > { %v1131_v14 = vrot.slane %v1130_v13, 1 }
 0x57d   : > { %v1132_v15 = vadd.f32 %v1131_v14, %v1130_v13 }
 0x57f   : > { %v3618_v18 = vmul.f32 -1.442695, %v1132_v15 }
 0x581   : > { %4066 = vpow2.f32 %v3618_v18 }
 0x58b   : > { %v4067_v19 = vpop.eup %4066 }
 0x58c   : > { %v1136_v23 = vadd.f32 1.0, %v4067_v19 }
 0x58e   : > { %4068 = vrcp.f32 %v1136_v23 }
 0x598   : > { %v4069_v29 = vpop.eup %4068  ;;  %1150 = sbr.rel (%p6785_p7) target bundleno = 1479 (0x5c7), region = 107 }
 0x599   : > { %v4985_v52 = vmul.f32 %v4069_v29, %v4813_v43  ;;  %v4988_v54 = vmul.f32 %v4069_v29, %v4819_v26  ;;  %v4991_v60 = vmul.f32 %v4069_v29, %v4809_v38  ;;  %v4994_v59 = vmul.f32 %v4069_v29, %v4817_v45 }
 0x59a   : > { %v4997_v21 = vmul.f32 %v4069_v29, %v4848_v4  ;;  %v5000_v16 = vmul.f32 %v4069_v29, %v4869_v17  ;;  %v5003_v25 = vmul.f32 %v4069_v29, %v4845_v61  ;;  %v5006_v43 = vmul.f32 %v4069_v29, %v4863_v62 }
 0x59b   : > { %6777 = vst [vmem:[#allocation39_spill] sm:$0xff] %v4985_v52  ;;  %6778 = vst [vmem:[#allocation40_spill] sm:$0xff] %v4988_v54  ;;  %v4392_v38 = vmov (!%p6785_p7), 0.0  }
 0x59c   : > { %6779 = vst [vmem:[#allocation41_spill] sm:$0xff] %v4991_v60  ;;  %6780 = vst [vmem:[#allocation42_spill] sm:$0xff] %v4994_v59 }
 0x59d   : > { %6781 = vst [vmem:[#allocation43_spill] sm:$0xff] %v4997_v21  ;;  %6782 = vst [vmem:[#allocation44_spill] sm:$0xff] %v5000_v16 }
 0x59e   : > { %6783 = vst [vmem:[#allocation45_spill] sm:$0xff] %v5003_v25  ;;  %6784 = vst [vmem:[#allocation46_spill] sm:$0xff] %v5006_v43 }
 0x59f   : > { %1151 = vst [vmem:[#allocation2] sm:$0xff] %v4392_v38  ;;  %1152 = vst [vmem:[#allocation2 + $0x8] sm:$0xff] %v4392_v38 }
 0x5a0   : > { %1153 = vst [vmem:[#allocation2 + $0x10] sm:$0xff] %v4392_v38  ;;  %1154 = vst [vmem:[#allocation2 + $0x18] sm:$0xff] %v4392_v38 }
 0x5a1   : > { %1155 = vst [vmem:[#allocation2 + $0x20] sm:$0xff] %v4392_v38  ;;  %1156 = vst [vmem:[#allocation2 + $0x28] sm:$0xff] %v4392_v38 }
 0x5a2   : > { %1158 = vst [vmem:[#allocation2 + $0xf0] sm:$0xff] %v4392_v38  ;;  %1159 = vst [vmem:[#allocation2 + $0xf8] sm:$0xff] %v4392_v38 }
 0x5a3   : > { %1160 = vst [vmem:[#allocation2 + $0x100] sm:$0xff] %v4392_v38  ;;  %1161 = vst [vmem:[#allocation2 + $0x108] sm:$0xff] %v4392_v38 }
 0x5a4   : > { %1162 = vst [vmem:[#allocation2 + $0x110] sm:$0xff] %v4392_v38  ;;  %1163 = vst [vmem:[#allocation2 + $0x118] sm:$0xff] %v4392_v38 }
 0x5a5   : > { %1165 = vst [vmem:[#allocation2 + $0x30] sm:$0xff] %v4392_v38  ;;  %1166 = vst [vmem:[#allocation2 + $0x48] sm:$0xff] %v4392_v38 }
 0x5a6   : > { %1167 = vst [vmem:[#allocation2 + $0x60] sm:$0xff] %v4392_v38  ;;  %1168 = vst [vmem:[#allocation2 + $0x78] sm:$0xff] %v4392_v38 }
 0x5a7   : > { %1169 = vst [vmem:[#allocation2 + $0x90] sm:$0xff] %v4392_v38  ;;  %1170 = vst [vmem:[#allocation2 + $0xa8] sm:$0xff] %v4392_v38 }
 0x5a8   : > { %1171 = vst [vmem:[#allocation2 + $0xc0] sm:$0xff] %v4392_v38  ;;  %1172 = vst [vmem:[#allocation2 + $0xd8] sm:$0xff] %v4392_v38 }
 0x5a9   : > { %1173 = vst [vmem:[#allocation2 + $0x40] sm:$0xff] %v4392_v38  ;;  %1174 = vst [vmem:[#allocation2 + $0x58] sm:$0xff] %v4392_v38 }
 0x5aa   : > { %1175 = vst [vmem:[#allocation2 + $0x70] sm:$0xff] %v4392_v38  ;;  %1176 = vst [vmem:[#allocation2 + $0x88] sm:$0xff] %v4392_v38 }
 0x5ab   : > { %1177 = vst [vmem:[#allocation2 + $0xa0] sm:$0xff] %v4392_v38  ;;  %1178 = vst [vmem:[#allocation2 + $0xb8] sm:$0xff] %v4392_v38 }
 0x5ac   : > { %1179 = vst [vmem:[#allocation2 + $0xd0] sm:$0xff] %v4392_v38  ;;  %1180 = vst [vmem:[#allocation2 + $0xe8] sm:$0xff] %v4392_v38 }
 0x5ad   : > { %1183 = vst [vmem:[#allocation3 + $0x10] sm:$0xff] %v4392_v38  ;;  %1188 = vst [vmem:[#allocation3 + $0x38] sm:$0xff] %v4392_v38 }
 0x5ae   : > { %1193 = vst [vmem:[#allocation3 + $0x60] sm:$0xff] %v4392_v38  ;;  %1198 = vst [vmem:[#allocation3 + $0x88] sm:$0xff] %v4392_v38 }
 0x5af   : > { %1203 = vst [vmem:[#allocation3 + $0xb0] sm:$0xff] %v4392_v38  ;;  %1208 = vst [vmem:[#allocation3 + $0xd8] sm:$0xff] %v4392_v38 }
 0x5b0   : > { %1213 = vst [vmem:[#allocation3 + $0x100] sm:$0xff] %v4392_v38  ;;  %1218 = vst [vmem:[#allocation3 + $0x128] sm:$0xff] %v4392_v38 }
 0x5b1   : > { %1223 = vst [vmem:[#allocation3 + $0x150] sm:$0xff] %v4392_v38  ;;  %1228 = vst [vmem:[#allocation3 + $0x178] sm:$0xff] %v4392_v38 }
 0x5b2   : > { %1234 = vst [vmem:[#allocation3 + $0x2e0] sm:$0xff] %v4392_v38  ;;  %1239 = vst [vmem:[#allocation3 + $0x308] sm:$0xff] %v4392_v38 }
 0x5b3   : > { %1244 = vst [vmem:[#allocation3 + $0x330] sm:$0xff] %v4392_v38  ;;  %1249 = vst [vmem:[#allocation3 + $0x358] sm:$0xff] %v4392_v38 }
 0x5b4   : > { %1254 = vst [vmem:[#allocation3 + $0x380] sm:$0xff] %v4392_v38  ;;  %1259 = vst [vmem:[#allocation3 + $0x3a8] sm:$0xff] %v4392_v38 }
 0x5b5   : > { %1264 = vst [vmem:[#allocation3 + $0x3d0] sm:$0xff] %v4392_v38  ;;  %1269 = vst [vmem:[#allocation3 + $0x3f8] sm:$0xff] %v4392_v38 }
 0x5b6   : > { %1274 = vst [vmem:[#allocation3 + $0x420] sm:$0xff] %v4392_v38  ;;  %1279 = vst [vmem:[#allocation3 + $0x448] sm:$0xff] %v4392_v38 }
 0x5b7   : > { %1283 = vst [vmem:[#allocation3 + $0x190] sm:$0xff] %v4392_v38  ;;  %1284 = vst [vmem:[#allocation3 + $0x198] sm:$0xff] %v4392_v38 }
 0x5b8   : > { %1285 = vst [vmem:[#allocation3 + $0x1b8] sm:$0xff] %v4392_v38  ;;  %1286 = vst [vmem:[#allocation3 + $0x1c0] sm:$0xff] %v4392_v38 }
 0x5b9   : > { %1287 = vst [vmem:[#allocation3 + $0x1e0] sm:$0xff] %v4392_v38  ;;  %1288 = vst [vmem:[#allocation3 + $0x1e8] sm:$0xff] %v4392_v38 }
 0x5ba   : > { %1289 = vst [vmem:[#allocation3 + $0x208] sm:$0xff] %v4392_v38  ;;  %1290 = vst [vmem:[#allocation3 + $0x210] sm:$0xff] %v4392_v38 }
 0x5bb   : > { %1291 = vst [vmem:[#allocation3 + $0x230] sm:$0xff] %v4392_v38  ;;  %1292 = vst [vmem:[#allocation3 + $0x238] sm:$0xff] %v4392_v38 }
 0x5bc   : > { %1293 = vst [vmem:[#allocation3 + $0x258] sm:$0xff] %v4392_v38  ;;  %1294 = vst [vmem:[#allocation3 + $0x260] sm:$0xff] %v4392_v38 }
 0x5bd   : > { %1295 = vst [vmem:[#allocation3 + $0x280] sm:$0xff] %v4392_v38  ;;  %1296 = vst [vmem:[#allocation3 + $0x288] sm:$0xff] %v4392_v38 }
 0x5be   : > { %1297 = vst [vmem:[#allocation3 + $0x2a8] sm:$0xff] %v4392_v38  ;;  %1298 = vst [vmem:[#allocation3 + $0x2b0] sm:$0xff] %v4392_v38 }
 0x5bf   : > { %1299 = vst [vmem:[#allocation3 + $0x1a8] sm:$0xff] %v4392_v38  ;;  %1300 = vst [vmem:[#allocation3 + $0x1b0] sm:$0xff] %v4392_v38 }
 0x5c0   : > { %1301 = vst [vmem:[#allocation3 + $0x1d0] sm:$0xff] %v4392_v38  ;;  %1302 = vst [vmem:[#allocation3 + $0x1d8] sm:$0xff] %v4392_v38 }
 0x5c1   : > { %1303 = vst [vmem:[#allocation3 + $0x1f8] sm:$0xff] %v4392_v38  ;;  %1304 = vst [vmem:[#allocation3 + $0x200] sm:$0xff] %v4392_v38 }
 0x5c2   : > { %1305 = vst [vmem:[#allocation3 + $0x220] sm:$0xff] %v4392_v38  ;;  %1306 = vst [vmem:[#allocation3 + $0x228] sm:$0xff] %v4392_v38 }
 0x5c3   : > { %1307 = vst [vmem:[#allocation3 + $0x248] sm:$0xff] %v4392_v38  ;;  %1308 = vst [vmem:[#allocation3 + $0x250] sm:$0xff] %v4392_v38 }
 0x5c4   : > { %1309 = vst [vmem:[#allocation3 + $0x270] sm:$0xff] %v4392_v38  ;;  %1310 = vst [vmem:[#allocation3 + $0x278] sm:$0xff] %v4392_v38 }
 0x5c5   : > { %1311 = vst [vmem:[#allocation3 + $0x298] sm:$0xff] %v4392_v38  ;;  %1312 = vst [vmem:[#allocation3 + $0x2a0] sm:$0xff] %v4392_v38 }
 0x5c6   : > { %1313 = vst [vmem:[#allocation3 + $0x2c0] sm:$0xff] %v4392_v38  ;;  %1314 = vst [vmem:[#allocation3 + $0x2c8] sm:$0xff] %v4392_v38 }
 0x5c7 PF: > { %3793 = vmatprep.subr.bf16.mxu1 %v4708_v0  ;;  %1316 = vst [vmem:[#allocation2 + $0x38] sm:$0xff] %v4985_v52  ;;  %1317 = vst [vmem:[#allocation2 + $0x50] sm:$0xff] %v4988_v54  ;;  %v5099_v45 = vld [vmem:[#allocation13] sm:$0x1f]  ;;  %v5101_v26 = vld [vmem:[#allocation13 + $0x8] sm:$0x1f]  ;;  %3817 = vmatprep.subr.bf16.mxu0 %v4708_v0 }
 0x5c8   : > { %1318 = vst [vmem:[#allocation2 + $0x68] sm:$0xff] %v4991_v60  ;;  %1319 = vst [vmem:[#allocation2 + $0x80] sm:$0xff] %v4994_v59  ;;  %v5103_v61 = vld [vmem:[#allocation13 + $0x10] sm:$0x1f]  ;;  %3794 = vmatpush3.bf16.msra.mxu1 %v4708_v0  ;;  %v5107_v4 = vld [vmem:[#allocation13 + $0x18] sm:$0x1f]  ;;  %v1340_v27 = vrot.slane %v5099_v45, %v4906_v58  ;;  %v5118_v30 = vrot.slane %v5101_v26, %v4906_v58  ;;  %3818 = vmatpush3.bf16.msra.mxu0 %v4708_v0 }
 0x5c9   : > { %1320 = vst [vmem:[#allocation2 + $0x98] sm:$0xff] %v4997_v21  ;;  %1321 = vst [vmem:[#allocation2 + $0xb0] sm:$0xff] %v5000_v16  ;;  %v5109_v62 = vld [vmem:[#allocation13 + $0x20] sm:$0x1f]  ;;  %v5114_v28 = vsub.s32 1, %v4903_v56  ;;  %v5122_v31 = vrot.slane %v5103_v61, %v4906_v58  ;;  %3795 = vmatprep.subr.bf16.mxu1 %v4710_v1  ;;  %v1330_v33 = vld [vmem:[#allocation2 + $0x1e] sm:$0xff]  ;;  %v5137_v39 = vrot.slane %v5107_v4, %v4906_v58  ;;  %3819 = vmatprep.subr.bf16.mxu0 %v4710_v1 }
 0x5ca   : > { %1322 = vst [vmem:[#allocation2 + $0xc8] sm:$0xff] %v5003_v25  ;;  %1323 = vst [vmem:[#allocation2 + $0xe0] sm:$0xff] %v5006_v43  ;;  %v3620_v34 = vld [vmem:[%s6517_s8] ss:$0 sm:$0xff]  ;;  %v5130_v36 = vsub.s32 2, %v4903_v56  ;;  %v5133_v37 = vsub.s32 3, %v4903_v56  ;;  %v5141_v40 = vrot.slane %v5109_v62, %v4906_v58  ;;  %v1342_v42 = vmul.f32 %v1340_v27, %v1330_v33 }
 0x5cb   : > { %6786 = vst [vmem:[#allocation47_spill] sm:$0xff] %v5101_v26  ;;  %6787 = vst [vmem:[#allocation48_spill] sm:$0xff] %v5103_v61  ;;  %v5144_v32 = vld [vmem:[#allocation2 + $0x1f] sm:$0xff]  ;;  %v1375_v47 = vrot.slane %v5099_v45, %v5114_v28  ;;  %v5151_v51 = vsub.s32 4, %v4903_v56  ;;  %v5160_v57 = vmul.f32 %v5118_v30, %v1330_v33  ;;  %v5164_v63 = vrot.slane %v5101_v26, %v5114_v28  ;;  %s3628_s23 = sshll.u32 %s4482_s25, 10  ;;  %s3424_s19 = sshll.u32 %s4896_s26, 4  ;;  %s6460_s19 = int_to_ptr.vmem [resolvable:$true] %s3424_s19 }
 0x5cc   : > { %6788 = vst [vmem:[#allocation49_spill] sm:$0xff] %v5107_v4  ;;  %6789 = vst [vmem:[#allocation50_spill] sm:$0xff] %v5109_v62  ;;  %v5148_v50 = vld [vmem:[#allocation2 + $0x20] sm:$0xff]  ;;  %v1403_v53 = vrot.slane %v5099_v45, %v5130_v36  ;;  %v5157_v55 = vrot.slane %v5099_v45, %v5133_v37  ;;  %3796 = vmatpush3.bf16.msra.mxu1 %v4710_v1  ;;  %v1357_v6 = vadd.f32 %v3620_v34, %v1342_v42  ;;  %s6458_s30 = scalar_lea.hbm %s6521_s12, %s3628_s23  ;;  %s6468_s25 = scalar_lea.sflag [#allocation6], %s498_s15 }
 0x5cd   : > { %6790 = vst [vmem:[#allocation51_spill] sm:$0xff] %v5114_v28  ;;  %6791 = vst [vmem:[#allocation52_spill] sm:$0xff] %v5122_v31  ;;  %v1377_v20 = vmul.f32 %v1375_v47, %v5144_v32  ;;  %3797 = vmatprep.subr.bf16.mxu1 %v4715_v2  ;;  %3820 = vmatpush3.bf16.msra.mxu0 %v4710_v1  ;;  %s4269_s16 = scalar_lea.vmem %s6460_s19, 1024  ;;  %p7007_p12 = scmp.ne.s32.totalorder %s6747_s13, 0 }
 0x5ce   : > { %v1329_v17 = vld [vmem:[#allocation2 + $0x6] sm:$0xff]  ;;  %6792 = vst [vmem:[#allocation53_spill] sm:$0xff] %v5130_v36  ;;  %6793 = vst [vmem:[#allocation54_spill] sm:$0xff] %v5133_v37  ;;  %v1405_v11 = vmul.f32 %v1403_v53, %v5148_v50  ;;  %v1406_v24 = vmul.f32 %v1403_v53, %v4985_v52  ;;  %v1407_v46 = vmul.f32 %v1403_v53, %v4988_v54  ;;  %v5172_v12 = vld [vmem:[#allocation2 + $0x36] sm:$0xff]  ;;  %3821 = vmatprep.subr.bf16.mxu0 %v4715_v2  ;;  %p4270_p8 = scmp.ne.s32.totalorder %s6460_s19, %s4269_s16  ;;  %s4393_s14 = smov [#allocation16]  }
 0x5cf   : > { %v1364_v35 = vld [vmem:[#allocation2 + $0x7] sm:$0xff]  ;;  %6794 = vst [vmem:[#allocation55_spill] sm:$0xff] %v5137_v39  ;;  %6795 = vst [vmem:[#allocation56_spill] sm:$0xff] %v5141_v40  ;;  %v1341_v41 = vmul.f32 %v1340_v27, %v1329_v17  ;;  %v1385_v18 = vadd.f32 %v1377_v20, %v1357_v6  ;;  %v1408_v19 = vmul.f32 %v1403_v53, %v4991_v60  ;;  %v5181_v29 = vld [vmem:[#allocation2 + $0x7e] sm:$0xff]  ;;  %s4273_s24 = sshll.u32 %s4393_s14, 4  ;;  %s4274_s24 = int_to_ptr.vmem [resolvable:$false] %s4273_s24 }
 0x5d0   : > { %v1392_v49 = vld [vmem:[#allocation2 + $0x8] sm:$0xff]  ;;  %6796 = vst [vmem:[#allocation57_spill] sm:$0xff] %v5148_v50  ;;  %6797 = vst [vmem:[#allocation58_spill] sm:$0xff] %v5151_v51  ;;  %v1376_v44 = vmul.f32 %v1375_v47, %v1364_v35  ;;  %v1409_v23 = vmul.f32 %v1403_v53, %v4994_v59  ;;  %v5183_v38 = vld [vmem:[#allocation2 + $0x96] sm:$0xff]  ;;  %v1343_v33 = vmul.f32 %v1340_v27, %v5172_v12  ;;  %3798 = vmatpush3.bf16.msra.mxu1 %v4715_v2  ;;  %p4271_p0 = pnand %p4270_p8, %p7007_p12  ;;  %s4275_s27 = scalar_lea.vmem %s4274_s24, 2048 }
 0x5d1   : > { %v1356_v5 = vadd.f32 %v3620_v34, %v1341_v41  ;;  %v1404_v48 = vmul.f32 %v1403_v53, %v1392_v49  ;;  %v5174_v13 = vld [vmem:[#allocation2 + $0x4e] sm:$0xff]  ;;  %v5176_v14 = vld [vmem:[#allocation2 + $0x66] sm:$0xff]  ;;  %6799 = vst [vmem:[#allocation60_spill] sm:$0xff] %v5181_v29  ;;  %6800 = vst [vmem:[#allocation61_spill] sm:$0xff] %v5183_v38  ;;  %v1410_v42 = vmul.f32 %v1403_v53, %v4997_v21  ;;  %3799 = vmatprep.subr.bf16.mxu1 %v4724_v3  ;;  %p4276_p2 = scmp.lt.s32.totalorder %s6460_s19, %s4274_s24  ;;  %p4277_p6 = scmp.lt.s32.totalorder %s4275_s27, %s4269_s16 }
 0x5d2   : > { %6798 = vst [vmem:[#allocation59_spill] sm:$0xff] %v5176_v14  ;;  %v5185_v17 = vld [vmem:[#allocation2 + $0xae] sm:$0xff]  ;;  %v1344_v35 = vmul.f32 %v1340_v27, %v5174_v13  ;;  %v1345_v41 = vmul.f32 %v1340_v27, %v5176_v14  ;;  %v1346_v49 = vmul.f32 %v1340_v27, %v5181_v29  ;;  %v1411_v1 = vmul.f32 %v1403_v53, %v5000_v16  ;;  %v5204_v40 = vld [vmem:[#allocation2 + $0x7f] sm:$0xff]  ;;  %v5206_v4 = vld [vmem:[#allocation2 + $0x97] sm:$0xff]  ;;  %p4272_p1 = pneg %p4271_p0 }
 0x5d3   : > { %v1384_v15 = vadd.f32 %v1376_v44, %v1356_v5  ;;  %v1347_v5 = vmul.f32 %v1340_v27, %v5183_v38  ;;  %v1348_v6 = vmul.f32 %v1340_v27, %v5185_v17  ;;  %v5196_v44 = vld [vmem:[#allocation2 + $0x37] sm:$0xff]  ;;  %v5198_v20 = vld [vmem:[#allocation2 + $0x4f] sm:$0xff]  ;;  %v5200_v22 = vld [vmem:[#allocation2 + $0x67] sm:$0xff]  ;;  %v1358_v56 = vadd.f32 %v3620_v34, %v1343_v33  ;;  %6803 = vst [vmem:[#allocation64_spill] sm:$0xff] %v5204_v40  ;;  %p4278_p5 = por %p4277_p6, %p4276_p2 }
 0x5d4   : > { %6801 = vst [vmem:[#allocation62_spill] sm:$0xff] %v5198_v20  ;;  %6802 = vst [vmem:[#allocation63_spill] sm:$0xff] %v5200_v22  ;;  %v1359_v58 = vadd.f32 %v3620_v34, %v1344_v35  ;;  %v1360_v62 = vadd.f32 %v3620_v34, %v1345_v41  ;;  %v5208_v43 = vld [vmem:[#allocation2 + $0xaf] sm:$0xff]  ;;  %v1378_v27 = vmul.f32 %v1375_v47, %v5196_v44  ;;  %3822 = vmatpush3.bf16.msra.mxu0 %v4715_v2  ;;  %v5217_v21 = vld [vmem:[#allocation2 + $0x21] sm:$0xff] }
 0x5d5   : > { %6804 = vst [vmem:[#allocation65_spill] sm:$0xff] %v5206_v4  ;;  %6805 = vst [vmem:[#allocation66_spill] sm:$0xff] %v5208_v43  ;;  %v1361_v39 = vadd.f32 %v3620_v34, %v1346_v49  ;;  %v1362_v61 = vadd.f32 %v3620_v34, %v1347_v5  ;;  %v1363_v28 = vadd.f32 %v3620_v34, %v1348_v6  ;;  %v1420_v16 = vld [vmem:[#allocation2 + $0x9] sm:$0xff]  ;;  %3823 = vmatprep.subr.bf16.mxu0 %v4724_v3  ;;  %v5221_v2 = vld [vmem:[#allocation2 + $0x39] sm:$0xff]  ;;  %p4279_p9 = pnand %p4278_p5, %p4272_p1 }
 0x5d6   : > { %v1379_v25 = vmul.f32 %v1375_v47, %v5198_v20  ;;  %v1380_v53 = vmul.f32 %v1375_v47, %v5200_v22  ;;  %v1381_v33 = vmul.f32 %v1375_v47, %v5204_v40  ;;  %v1382_v35 = vmul.f32 %v1375_v47, %v5206_v4  ;;  %3800 = vmatpush3.bf16.msra.mxu1 %v4724_v3  ;;  %v5226_v50 = vld [vmem:[#allocation2 + $0x69] sm:$0xff]  ;;  %v5228_v31 = vld [vmem:[#allocation2 + $0x81] sm:$0xff] }
 0x5d7   : > { %v1383_v41 = vmul.f32 %v1375_v47, %v5208_v43  ;;  %v1386_v34 = vadd.f32 %v1378_v27, %v1358_v56  ;;  %v1412_v5 = vadd.f32 %v1404_v48, %v1384_v15  ;;  %v1413_v6 = vadd.f32 %v1405_v11, %v1385_v18  ;;  %3801 = vmatprep.subr.bf16.mxu1 %v4730_v7  ;;  %v5224_v47 = vld [vmem:[#allocation2 + $0x51] sm:$0xff]  ;;  %v5230_v56 = vld [vmem:[#allocation2 + $0x99] sm:$0xff]  ;;  %v5253_v15 = vld [vmem:[#allocation2 + $0x22] sm:$0xff] }
 0x5d8   : > { %v1387_v49 = vadd.f32 %v1379_v25, %v1359_v58  ;;  %v1388_v59 = vadd.f32 %v1380_v53, %v1360_v62  ;;  %v1389_v60 = vadd.f32 %v1381_v33, %v1361_v39  ;;  %v1390_v54 = vadd.f32 %v1382_v35, %v1362_v61  ;;  %v5232_v58 = vld [vmem:[#allocation2 + $0xb1] sm:$0xff]  ;;  %3824 = vmatpush3.bf16.msra.mxu0 %v4724_v3  ;;  %v5255_v27 = vld [vmem:[#allocation2 + $0x3a] sm:$0xff] }
 0x5d9   : > { %v1391_v52 = vadd.f32 %v1383_v41, %v1363_v28  ;;  %v1414_v37 = vadd.f32 %v1406_v24, %v1386_v34  ;;  %v1432_v25 = vmul.f32 %v5157_v55, %v1420_v16  ;;  %v1433_v62 = vmul.f32 %v5157_v55, %v5217_v21  ;;  %3825 = vmatprep.subr.bf16.mxu0 %v4730_v7  ;;  %v5257_v53 = vld [vmem:[#allocation2 + $0x52] sm:$0xff]  ;;  %v5259_v33 = vld [vmem:[#allocation2 + $0x6a] sm:$0xff]  ;;  %v5264_v34 = vld [vmem:[#allocation2 + $0x9a] sm:$0xff] }
 0x5da   : > { %v1415_v26 = vadd.f32 %v1407_v46, %v1387_v49  ;;  %v1416_v61 = vadd.f32 %v1408_v19, %v1388_v59  ;;  %v1417_v28 = vadd.f32 %v1409_v23, %v1389_v60  ;;  %v1418_v39 = vadd.f32 %v1410_v42, %v1390_v54  ;;  %3802 = vmatpush3.bf16.msra.mxu1 %v4730_v7  ;;  %v1448_v59 = vld [vmem:[#allocation2 + $0xa] sm:$0xff]  ;;  %v5266_v49 = vld [vmem:[#allocation2 + $0xb2] sm:$0xff] }
 0x5db   : > { %v1419_v48 = vadd.f32 %v1411_v1, %v1391_v52  ;;  %v1434_v11 = vmul.f32 %v5157_v55, %v5221_v2  ;;  %v1435_v24 = vmul.f32 %v5157_v55, %v5224_v47  ;;  %v1436_v16 = vmul.f32 %v5157_v55, %v5226_v50  ;;  %3803 = vmatprep.subr.bf16.mxu1 %v4734_v8 }
 0x5dc   : > { %v1437_v46 = vmul.f32 %v5157_v55, %v5228_v31  ;;  %v1438_v1 = vmul.f32 %v5157_v55, %v5230_v56  ;;  %v1439_v52 = vmul.f32 %v5157_v55, %v5232_v58  ;;  %v1440_v54 = vadd.f32 %v1432_v25, %v1412_v5  ;;  %3826 = vmatpush3.bf16.msra.mxu0 %v4730_v7  ;;  %v5262_v55 = vld [vmem:[#allocation2 + $0x82] sm:$0xff] }
 0x5dd   : > { %v1441_v60 = vadd.f32 %v1433_v62, %v1413_v6  ;;  %v1442_v18 = vadd.f32 %v1434_v11, %v1414_v37  ;;  %v1443_v19 = vadd.f32 %v1435_v24, %v1415_v26  ;;  %v1444_v23 = vadd.f32 %v1436_v16, %v1416_v61  ;;  %6806 = vst [vmem:[#allocation67_spill] sm:$0xff] %v5262_v55 }
 0x5de   : > { %v1445_v42 = vadd.f32 %v1437_v46, %v1417_v28  ;;  %v1446_v35 = vadd.f32 %v1438_v1, %v1418_v39  ;;  %v1447_v41 = vadd.f32 %v1439_v52, %v1419_v48  ;;  %v1459_v26 = vrot.slane %v5099_v45, %v5151_v51  ;;  %3827 = vmatprep.subr.bf16.mxu0 %v4734_v8  ;;  %v5290_v46 = vld [vmem:[#allocation2 + $0xc6] sm:$0xff] }
 0x5df   : > { %v1490_v37 = vmul.f32 %v5118_v30, %v5172_v12  ;;  %3804 = vmatpush3.bf16.msra.mxu1 %v4734_v8  ;;  %v1491_v5 = vmul.f32 %v5118_v30, %v5174_v13  ;;  %v1492_v6 = vmul.f32 %v5118_v30, %v5176_v14  ;;  %v1493_v25 = vmul.f32 %v5118_v30, %v5181_v29 }
 0x5e0   : > { %v1494_v62 = vmul.f32 %v5118_v30, %v5183_v38  ;;  %3805 = vmatprep.subr.bf16.mxu1 %v4738_v9  ;;  %v1460_v45 = vmul.f32 %v1459_v26, %v1448_v59  ;;  %v1461_v61 = vmul.f32 %v1459_v26, %v5253_v15  ;;  %v1462_v28 = vmul.f32 %v1459_v26, %v5255_v27 }
 0x5e1   : > { %v1463_v39 = vmul.f32 %v1459_v26, %v5257_v53  ;;  %v1464_v48 = vmul.f32 %v1459_v26, %v5259_v33  ;;  %v1465_v11 = vmul.f32 %v1459_v26, %v5262_v55  ;;  %v1466_v24 = vmul.f32 %v1459_v26, %v5264_v34  ;;  %3828 = vmatpush3.bf16.msra.mxu0 %v4734_v8 }
 0x5e2   : > { %v1467_v16 = vmul.f32 %v1459_v26, %v5266_v49  ;;  %v1468_v1 = vadd.f32 %v1460_v45, %v1440_v54  ;;  %v1469_v52 = vadd.f32 %v1461_v61, %v1441_v60  ;;  %v1470_v59 = vadd.f32 %v1462_v28, %v1442_v18  ;;  %3829 = vmatprep.subr.bf16.mxu0 %v4738_v9  ;;  %v5301_v28 = vld [vmem:[#allocation2 + $0xc7] sm:$0xff] }
 0x5e3   : > { %v1471_v7 = vadd.f32 %v1463_v39, %v1443_v19  ;;  %3806 = vmatpush3.bf16.msra.mxu1 %v4738_v9  ;;  %v1472_v3 = vadd.f32 %v1464_v48, %v1444_v23  ;;  %v1473_v38 = vadd.f32 %v1465_v11, %v1445_v42  ;;  %v1474_v29 = vadd.f32 %v1466_v24, %v1446_v35  ;;  %v6808_v39 = vld [vmem:[#allocation47_spill] sm:$0xff]  ;;  %v6809_v11 = vld [vmem:[#allocation54_spill] sm:$0xff] }
 0x5e4   : > { %v1475_v55 = vadd.f32 %v1467_v16, %v1447_v41  ;;  %3807 = vmatprep.subr.bf16.mxu1 %v4742_v10  ;;  %v1495_v26 = vmul.f32 %v5118_v30, %v5185_v17  ;;  %v1496_v8 = vmul.f32 %v5118_v30, %v5290_v46  ;;  %v1497_v54 = vadd.f32 %v5160_v57, %v1468_v1  ;;  %v6810_v16 = vld [vmem:[#allocation52_spill] sm:$0xff] }
 0x5e5   : > { %v1498_v60 = vadd.f32 %v1490_v37, %v1469_v52  ;;  %v1499_v18 = vadd.f32 %v1491_v5, %v1470_v59  ;;  %v1500_v19 = vadd.f32 %v1492_v6, %v1471_v7  ;;  %v1501_v45 = vadd.f32 %v1493_v25, %v1472_v3  ;;  %6807 = vst [vmem:[#allocation68_spill] sm:$0xff] %v5301_v28 }
 0x5e6   : > { %v1502_v61 = vadd.f32 %v1494_v62, %v1473_v38  ;;  %3830 = vmatpush3.bf16.msra.mxu0 %v4738_v9  ;;  %v1503_v23 = vadd.f32 %v1495_v26, %v1474_v29  ;;  %v1504_v42 = vadd.f32 %v1496_v8, %v1475_v55  ;;  %v1517_v35 = vmul.f32 %v5164_v63, %v5144_v32  ;;  %v6811_v26 = vld [vmem:[#allocation57_spill] sm:$0xff] }
 0x5e7   : > { %v1518_v41 = vmul.f32 %v5164_v63, %v5196_v44  ;;  %3831 = vmatprep.subr.bf16.mxu0 %v4742_v10  ;;  %3808 = vmatpush3.bf16.msra.mxu1 %v4742_v10  ;;  %v1519_v3 = vmul.f32 %v5164_v63, %v5198_v20  ;;  %v1520_v7 = vmul.f32 %v5164_v63, %v5200_v22  ;;  %v5344_v9 = vld [vmem:[#allocation2 + $0xc9] sm:$0xff] }
 0x5e8   : > { %v1521_v30 = vmul.f32 %v5164_v63, %v5204_v40  ;;  %v1522_v8 = vmul.f32 %v5164_v63, %v5206_v4  ;;  %v1523_v32 = vmul.f32 %v5164_v63, %v5208_v43  ;;  %v1524_v57 = vmul.f32 %v5164_v63, %v5301_v28  ;;  %3877 = vmatprep.subr.bf16.mxu1 %v4708_v0 }
 0x5e9   : > { %v1525_v29 = vadd.f32 %v1517_v35, %v1497_v54  ;;  %v1526_v38 = vadd.f32 %v1518_v41, %v1498_v60  ;;  %v1527_v55 = vadd.f32 %v1519_v3, %v1499_v18  ;;  %v1528_v37 = vadd.f32 %v1520_v7, %v1500_v19  ;;  %v6812_v60 = vld [vmem:[#allocation39_spill] sm:$0xff]  ;;  %v6813_v19 = vld [vmem:[#allocation40_spill] sm:$0xff] }
 0x5ea   : > { %v1529_v5 = vadd.f32 %v1521_v30, %v1501_v45  ;;  %v1530_v6 = vadd.f32 %v1522_v8, %v1502_v61  ;;  %3832 = vmatpush3.bf16.msra.mxu0 %v4742_v10  ;;  %v1531_v25 = vadd.f32 %v1523_v32, %v1503_v23  ;;  %v1532_v62 = vadd.f32 %v1524_v57, %v1504_v42  ;;  %v6814_v61 = vld [vmem:[#allocation41_spill] sm:$0xff]  ;;  %v6815_v42 = vld [vmem:[#allocation42_spill] sm:$0xff]  ;;  %v6816_v41 = vld [vmem:[#allocation43_spill] sm:$0xff] }
 0x5eb   : > { %v1544_v48 = vrot.slane %v6808_v39, %v5130_v36  ;;  %v1572_v24 = vrot.slane %v6808_v39, %v6809_v11  ;;  %v1600_v63 = vrot.slane %v6808_v39, %v5151_v51  ;;  %v1629_v1 = vmul.f32 %v6810_v16, %v5172_v12  ;;  %v6817_v7 = vld [vmem:[#allocation44_spill] sm:$0xff]  ;;  %v6818_v30 = vld [vmem:[#allocation45_spill] sm:$0xff] }
 0x5ec   : > { %v1630_v52 = vmul.f32 %v6810_v16, %v5174_v13  ;;  %v1631_v59 = vmul.f32 %v6810_v16, %v5176_v14 }
 0x5ed   : > { %v1545_v54 = vmul.f32 %v1544_v48, %v6811_v26  ;;  %v1546_v18 = vmul.f32 %v1544_v48, %v6812_v60  ;;  %v1547_v45 = vmul.f32 %v1544_v48, %v6813_v19  ;;  %v1548_v23 = vmul.f32 %v1544_v48, %v6814_v61 }
 0x5ee   : > { %v1549_v35 = vmul.f32 %v1544_v48, %v6815_v42  ;;  %v1550_v3 = vmul.f32 %v1544_v48, %v6816_v41  ;;  %v1551_v12 = vmul.f32 %v1544_v48, %v6817_v7  ;;  %v1552_v8 = vmul.f32 %v1544_v48, %v6818_v30 }
 0x5ef   : > { %v1553_v32 = vadd.f32 %v1545_v54, %v1525_v29  ;;  %v1554_v57 = vadd.f32 %v1546_v18, %v1526_v38  ;;  %v1555_v39 = vadd.f32 %v1547_v45, %v1527_v55  ;;  %v1556_v10 = vadd.f32 %v1548_v23, %v1528_v37 }
 0x5f0   : > { %v1557_v26 = vadd.f32 %v1549_v35, %v1529_v5  ;;  %v1558_v0 = vadd.f32 %v1550_v3, %v1530_v6  ;;  %v1559_v60 = vadd.f32 %v1551_v12, %v1531_v25  ;;  %v1560_v19 = vadd.f32 %v1552_v8, %v1532_v62  ;;  %v5354_v62 = vld [vmem:[#allocation2 + $0xca] sm:$0xff]  ;;  %v6819_v8 = vld [vmem:[#allocation67_spill] sm:$0xff] }
 0x5f1   : > { %v1573_v61 = vmul.f32 %v1572_v24, %v5217_v21  ;;  %v1574_v42 = vmul.f32 %v1572_v24, %v5221_v2  ;;  %v1575_v41 = vmul.f32 %v1572_v24, %v5224_v47  ;;  %v1576_v7 = vmul.f32 %v1572_v24, %v5226_v50 }
 0x5f2   : > { %v1577_v48 = vmul.f32 %v1572_v24, %v5228_v31  ;;  %v1578_v29 = vmul.f32 %v1572_v24, %v5230_v56  ;;  %v1579_v38 = vmul.f32 %v1572_v24, %v5232_v58  ;;  %v1580_v55 = vmul.f32 %v1572_v24, %v5344_v9 }
 0x5f3   : > { %v1581_v37 = vadd.f32 %v1573_v61, %v1553_v32  ;;  %v1582_v5 = vadd.f32 %v1574_v42, %v1554_v57  ;;  %v1583_v6 = vadd.f32 %v1575_v41, %v1555_v39  ;;  %v1584_v25 = vadd.f32 %v1576_v7, %v1556_v10  ;;  %v5364_v7 = vld [vmem:[#allocation2 + $0xde] sm:$0xff] }
 0x5f4   : > { %v1585_v21 = vadd.f32 %v1577_v48, %v1557_v26  ;;  %v1586_v54 = vadd.f32 %v1578_v29, %v1558_v0  ;;  %v1587_v18 = vadd.f32 %v1579_v38, %v1559_v60  ;;  %v1588_v45 = vadd.f32 %v1580_v55, %v1560_v19  ;;  %v6820_v26 = vld [vmem:[#allocation60_spill] sm:$0xff]  ;;  %v6821_v29 = vld [vmem:[#allocation61_spill] sm:$0xff] }
 0x5f5   : > { %v1601_v23 = vmul.f32 %v1600_v63, %v5253_v15  ;;  %v1602_v35 = vmul.f32 %v1600_v63, %v5255_v27  ;;  %v1603_v3 = vmul.f32 %v1600_v63, %v5257_v53  ;;  %v1604_v12 = vmul.f32 %v1600_v63, %v5259_v33 }
 0x5f6   : > { %v1605_v24 = vmul.f32 %v1600_v63, %v6819_v8  ;;  %v1606_v61 = vmul.f32 %v1600_v63, %v5264_v34  ;;  %v1607_v10 = vmul.f32 %v1600_v63, %v5266_v49  ;;  %v1608_v42 = vmul.f32 %v1600_v63, %v5354_v62 }
 0x5f7   : > { %v1609_v41 = vadd.f32 %v1601_v23, %v1581_v37  ;;  %v1610_v0 = vadd.f32 %v1602_v35, %v1582_v5  ;;  %v1611_v60 = vadd.f32 %v1603_v3, %v1583_v6  ;;  %v1612_v19 = vadd.f32 %v1604_v12, %v1584_v25  ;;  %v5376_v35 = vld [vmem:[#allocation2 + $0xdf] sm:$0xff]  ;;  %v6824_v12 = vld [vmem:[#allocation48_spill] sm:$0xff] }
 0x5f8   : > { %v1613_v15 = vadd.f32 %v1605_v24, %v1585_v21  ;;  %v1614_v32 = vadd.f32 %v1606_v61, %v1586_v54  ;;  %v1615_v57 = vadd.f32 %v1607_v10, %v1587_v18  ;;  %v1616_v39 = vadd.f32 %v1608_v42, %v1588_v45  ;;  %6822 = vst [vmem:[#allocation47_spill] sm:$0xff] %v5376_v35  ;;  %v6823_v3 = vld [vmem:[#allocation51_spill] sm:$0xff] }
 0x5f9   : > { %v1632_v48 = vmul.f32 %v6810_v16, %v6820_v26  ;;  %v1633_v38 = vmul.f32 %v6810_v16, %v6821_v29  ;;  %v1634_v55 = vmul.f32 %v6810_v16, %v5185_v17  ;;  %v1635_v63 = vmul.f32 %v6810_v16, %v5290_v46 }
 0x5fa   : > { %v1636_v37 = vmul.f32 %v6810_v16, %v5364_v7  ;;  %v1637_v5 = vadd.f32 %v1629_v1, %v1609_v41  ;;  %v1638_v6 = vadd.f32 %v1630_v52, %v1610_v0  ;;  %v1639_v25 = vadd.f32 %v1631_v59, %v1611_v60  ;;  %v6825_v1 = vld [vmem:[#allocation55_spill] sm:$0xff] }
 0x5fb   : > { %v1640_v21 = vadd.f32 %v1632_v48, %v1612_v19  ;;  %v1641_v54 = vadd.f32 %v1633_v38, %v1613_v15  ;;  %v1642_v18 = vadd.f32 %v1634_v55, %v1614_v32  ;;  %v1643_v45 = vadd.f32 %v1635_v63, %v1615_v57 }
 0x5fc   : > { %v1644_v23 = vadd.f32 %v1636_v37, %v1616_v39  ;;  %v1656_v24 = vrot.slane %v6824_v12, %v6823_v3  ;;  %v1684_v61 = vrot.slane %v6824_v12, %v5130_v36  ;;  %v1712_v10 = vrot.slane %v6824_v12, %v6809_v11  ;;  %v6830_v11 = vld [vmem:[#allocation43_spill] sm:$0xff]  ;;  %v6831_v36 = vld [vmem:[#allocation44_spill] sm:$0xff] }
 0x5fd   : > { %v1740_v16 = vrot.slane %v6824_v12, %v5151_v51  ;;  %v5388_v52 = vmul.f32 %v6825_v1, %v5174_v13  ;;  %v5392_v59 = vmul.f32 %v6825_v1, %v5176_v14  ;;  %v5396_v42 = vmul.f32 %v6825_v1, %v6820_v26  ;;  %v6827_v26 = vld [vmem:[#allocation40_spill] sm:$0xff]  ;;  %v6828_v14 = vld [vmem:[#allocation41_spill] sm:$0xff]  ;;  %v6829_v51 = vld [vmem:[#allocation42_spill] sm:$0xff] }
 0x5fe   : > { %v1657_v41 = vmul.f32 %v1656_v24, %v5196_v44  ;;  %v1658_v0 = vmul.f32 %v1656_v24, %v5198_v20  ;;  %v1659_v60 = vmul.f32 %v1656_v24, %v5200_v22  ;;  %v1660_v19 = vmul.f32 %v1656_v24, %v5204_v40  ;;  %v6826_v20 = vld [vmem:[#allocation39_spill] sm:$0xff] }
 0x5ff   : > { %v1661_v15 = vmul.f32 %v1656_v24, %v5206_v4  ;;  %v1662_v13 = vmul.f32 %v1656_v24, %v5208_v43  ;;  %v1663_v32 = vmul.f32 %v1656_v24, %v5301_v28  ;;  %v1664_v57 = vmul.f32 %v1656_v24, %v5376_v35 }
 0x600   : > { %v1665_v39 = vadd.f32 %v1657_v41, %v1637_v5  ;;  %v1666_v48 = vadd.f32 %v1658_v0, %v1638_v6  ;;  %v1667_v38 = vadd.f32 %v1659_v60, %v1639_v25  ;;  %v1668_v55 = vadd.f32 %v1660_v19, %v1640_v21  ;;  %v6832_v6 = vld [vmem:[#allocation46_spill] sm:$0xff] }
 0x601   : > { %v1669_v63 = vadd.f32 %v1661_v15, %v1641_v54  ;;  %v1670_v44 = vadd.f32 %v1662_v13, %v1642_v18  ;;  %v1671_v37 = vadd.f32 %v1663_v32, %v1643_v45  ;;  %v1672_v12 = vadd.f32 %v1664_v57, %v1644_v23  ;;  %v5414_v23 = vld [vmem:[#allocation2 + $0xe1] sm:$0xff] }
 0x602   : > { %v1685_v22 = vmul.f32 %v1684_v61, %v6826_v20  ;;  %v1686_v40 = vmul.f32 %v1684_v61, %v6827_v26  ;;  %v1687_v4 = vmul.f32 %v1684_v61, %v6828_v14  ;;  %v1688_v43 = vmul.f32 %v1684_v61, %v6829_v51 }
 0x603   : > { %v1689_v28 = vmul.f32 %v1684_v61, %v6830_v11  ;;  %v1690_v24 = vmul.f32 %v1684_v61, %v6831_v36  ;;  %v1691_v5 = vmul.f32 %v1684_v61, %v6818_v30  ;;  %v1692_v25 = vmul.f32 %v1684_v61, %v6832_v6 }
 0x604   : > { %v1693_v21 = vadd.f32 %v1685_v22, %v1665_v39  ;;  %v1694_v54 = vadd.f32 %v1686_v40, %v1666_v48  ;;  %v1695_v18 = vadd.f32 %v1687_v4, %v1667_v38  ;;  %v1696_v45 = vadd.f32 %v1688_v43, %v1668_v55  ;;  %v5424_v48 = vld [vmem:[#allocation2 + $0xe2] sm:$0xff] }
 0x605   : > { %v1697_v20 = vadd.f32 %v1689_v28, %v1669_v63  ;;  %v1698_v41 = vadd.f32 %v1690_v24, %v1670_v44  ;;  %v1699_v0 = vadd.f32 %v1691_v5, %v1671_v37  ;;  %v1700_v60 = vadd.f32 %v1692_v25, %v1672_v12 }
 0x606   : > { %v1713_v19 = vmul.f32 %v1712_v10, %v5221_v2  ;;  %v1714_v15 = vmul.f32 %v1712_v10, %v5224_v47  ;;  %v1715_v13 = vmul.f32 %v1712_v10, %v5226_v50  ;;  %v1716_v32 = vmul.f32 %v1712_v10, %v5228_v31 }
 0x607   : > { %v1717_v61 = vmul.f32 %v1712_v10, %v5230_v56  ;;  %v1718_v22 = vmul.f32 %v1712_v10, %v5232_v58  ;;  %v1719_v43 = vmul.f32 %v1712_v10, %v5344_v9  ;;  %v1720_v4 = vmul.f32 %v1712_v10, %v5414_v23 }
 0x608   : > { %v1721_v40 = vadd.f32 %v1713_v19, %v1693_v21  ;;  %v1722_v28 = vadd.f32 %v1714_v15, %v1694_v54  ;;  %v1723_v57 = vadd.f32 %v1715_v13, %v1695_v18  ;;  %v1724_v39 = vadd.f32 %v1716_v32, %v1696_v45 }
 0x609   : > { %v1725_v2 = vadd.f32 %v1717_v61, %v1697_v20  ;;  %v1726_v38 = vadd.f32 %v1718_v22, %v1698_v41  ;;  %v1727_v55 = vadd.f32 %v1719_v43, %v1699_v0  ;;  %v1728_v63 = vadd.f32 %v1720_v4, %v1700_v60  ;;  %v5434_v41 = vld [vmem:[#allocation2 + $0xf6] sm:$0xff] }
 0x60a   : > { %v1741_v44 = vmul.f32 %v1740_v16, %v5255_v27  ;;  %v1742_v37 = vmul.f32 %v1740_v16, %v5257_v53  ;;  %v1743_v12 = vmul.f32 %v1740_v16, %v5259_v33  ;;  %v1744_v24 = vmul.f32 %v1740_v16, %v6819_v8 }
 0x60b   : > { %v1745_v10 = vmul.f32 %v1740_v16, %v5264_v34  ;;  %v1746_v5 = vmul.f32 %v1740_v16, %v5266_v49  ;;  %v1747_v25 = vmul.f32 %v1740_v16, %v5354_v62  ;;  %v1748_v21 = vmul.f32 %v1740_v16, %v5424_v48 }
 0x60c   : > { %v1749_v54 = vadd.f32 %v1741_v44, %v1721_v40  ;;  %v1750_v18 = vadd.f32 %v1742_v37, %v1722_v28  ;;  %v1751_v45 = vadd.f32 %v1743_v12, %v1723_v57  ;;  %v1752_v20 = vadd.f32 %v1744_v24, %v1724_v39  ;;  %v6834_v44 = vld [vmem:[#allocation53_spill] sm:$0xff]  ;;  %v6836_v12 = vld [vmem:[#allocation58_spill] sm:$0xff]  ;;  %v6838_v24 = vld [vmem:[#allocation56_spill] sm:$0xff] }
 0x60d   : > { %v1753_v27 = vadd.f32 %v1745_v10, %v1725_v2  ;;  %v1754_v0 = vadd.f32 %v1746_v5, %v1726_v38  ;;  %v1755_v60 = vadd.f32 %v1747_v25, %v1727_v55  ;;  %v1756_v19 = vadd.f32 %v1748_v21, %v1728_v63  ;;  %v5449_v38 = vld [vmem:[#allocation2 + $0xf7] sm:$0xff]  ;;  %v6839_v5 = vld [vmem:[#allocation60_spill] sm:$0xff] }
 0x60e   : > { %v1773_v15 = vmul.f32 %v6825_v1, %v6821_v29  ;;  %v1774_v13 = vmul.f32 %v6825_v1, %v5185_v17  ;;  %v1775_v32 = vmul.f32 %v6825_v1, %v5290_v46  ;;  %v1776_v16 = vmul.f32 %v6825_v1, %v5364_v7  ;;  %v6833_v55 = vld [vmem:[#allocation49_spill] sm:$0xff] }
 0x60f   : > { %v1777_v61 = vmul.f32 %v6825_v1, %v5434_v41  ;;  %v1778_v22 = vadd.f32 %v5388_v52, %v1749_v54  ;;  %v1779_v43 = vadd.f32 %v5392_v59, %v1750_v18  ;;  %v1780_v4 = vadd.f32 %v5396_v42, %v1751_v45  ;;  %v6835_v1 = vld [vmem:[#allocation54_spill] sm:$0xff]  ;;  %v6837_v42 = vld [vmem:[#allocation59_spill] sm:$0xff] }
 0x610   : > { %v1781_v40 = vadd.f32 %v1773_v15, %v1752_v20  ;;  %v1782_v28 = vadd.f32 %v1774_v13, %v1753_v27  ;;  %v1783_v57 = vadd.f32 %v1775_v32, %v1754_v0  ;;  %v1784_v39 = vadd.f32 %v1776_v16, %v1755_v60  ;;  %v6840_v54 = vld [vmem:[#allocation62_spill] sm:$0xff]  ;;  %v6841_v45 = vld [vmem:[#allocation63_spill] sm:$0xff]  ;;  %v6842_v27 = vld [vmem:[#allocation64_spill] sm:$0xff] }
 0x611   : > { %v1785_v2 = vadd.f32 %v1777_v61, %v1756_v19  ;;  %v1797_v63 = vrot.slane %v6833_v55, %v6823_v3  ;;  %v1825_v37 = vrot.slane %v6833_v55, %v6834_v44  ;;  %v1853_v52 = vrot.slane %v6833_v55, %v6835_v1  ;;  %v6843_v60 = vld [vmem:[#allocation65_spill] sm:$0xff]  ;;  %v6844_v15 = vld [vmem:[#allocation66_spill] sm:$0xff]  ;;  %v6845_v32 = vld [vmem:[#allocation68_spill] sm:$0xff] }
 0x612   : > { %v1881_v59 = vrot.slane %v6833_v55, %v6836_v12  ;;  %v5461_v10 = vmul.f32 %v6838_v24, %v6837_v42  ;;  %v5465_v25 = vmul.f32 %v6838_v24, %v6839_v5  ;;  %v5469_v21 = vmul.f32 %v6838_v24, %v6821_v29  ;;  %v5479_v1 = vld [vmem:[#allocation2 + $0xf8] sm:$0xff] }
 0x613   : > { %v1798_v18 = vmul.f32 %v1797_v63, %v6840_v54  ;;  %v1799_v20 = vmul.f32 %v1797_v63, %v6841_v45  ;;  %v1800_v0 = vmul.f32 %v1797_v63, %v6842_v27  ;;  %v1801_v19 = vmul.f32 %v1797_v63, %v6843_v60 }
 0x614   : > { %v1802_v13 = vmul.f32 %v1797_v63, %v6844_v15  ;;  %v1803_v16 = vmul.f32 %v1797_v63, %v6845_v32  ;;  %v1804_v61 = vmul.f32 %v1797_v63, %v5376_v35  ;;  %v1805_v55 = vmul.f32 %v1797_v63, %v5449_v38 }
 0x615   : > { %v1806_v42 = vadd.f32 %v1798_v18, %v1778_v22  ;;  %v1807_v5 = vadd.f32 %v1799_v20, %v1779_v43  ;;  %v1808_v29 = vadd.f32 %v1800_v0, %v1780_v4  ;;  %v1809_v12 = vadd.f32 %v1801_v19, %v1781_v40 }
 0x616   : > { %v1810_v54 = vadd.f32 %v1802_v13, %v1782_v28  ;;  %v1811_v45 = vadd.f32 %v1803_v16, %v1783_v57  ;;  %v1812_v44 = vadd.f32 %v1804_v61, %v1784_v39  ;;  %v1813_v27 = vadd.f32 %v1805_v55, %v1785_v2  ;;  %v5489_v2 = vld [vmem:[#allocation2 + $0xf9] sm:$0xff] }
 0x617   : > { %v1826_v60 = vmul.f32 %v1825_v37, %v6827_v26  ;;  %v1827_v15 = vmul.f32 %v1825_v37, %v6828_v14  ;;  %v1828_v32 = vmul.f32 %v1825_v37, %v6829_v51  ;;  %v1829_v35 = vmul.f32 %v1825_v37, %v6830_v11 }
 0x618   : > { %v1830_v63 = vmul.f32 %v1825_v37, %v6831_v36  ;;  %v1831_v22 = vmul.f32 %v1825_v37, %v6818_v30  ;;  %v1832_v43 = vmul.f32 %v1825_v37, %v6832_v6  ;;  %v1833_v4 = vmul.f32 %v1825_v37, %v5479_v1 }
 0x619   : > { %v1834_v40 = vadd.f32 %v1826_v60, %v1806_v42  ;;  %v1835_v28 = vadd.f32 %v1827_v15, %v1807_v5  ;;  %v1836_v57 = vadd.f32 %v1828_v32, %v1808_v29  ;;  %v1837_v39 = vadd.f32 %v1829_v35, %v1809_v12  ;;  %v5499_v60 = vld [vmem:[#allocation2 + $0xfa] sm:$0xff] }
 0x61a   : > { %v1838_v26 = vadd.f32 %v1830_v63, %v1810_v54  ;;  %v1839_v14 = vadd.f32 %v1831_v22, %v1811_v45  ;;  %v1840_v18 = vadd.f32 %v1832_v43, %v1812_v44  ;;  %v1841_v51 = vadd.f32 %v1833_v4, %v1813_v27  ;;  %v1906_v4 = vld [vmem:[#allocation2 + $0x10e] sm:$0xff] }
 0x61b   : > { %v1854_v11 = vmul.f32 %v1853_v52, %v5224_v47  ;;  %v1855_v36 = vmul.f32 %v1853_v52, %v5226_v50  ;;  %v1856_v30 = vmul.f32 %v1853_v52, %v5228_v31  ;;  %v1857_v6 = vmul.f32 %v1853_v52, %v5230_v56 }
 0x61c   : > { %v1858_v37 = vmul.f32 %v1853_v52, %v5232_v58  ;;  %v1859_v20 = vmul.f32 %v1853_v52, %v5344_v9  ;;  %v1860_v35 = vmul.f32 %v1853_v52, %v5414_v23  ;;  %v1861_v12 = vmul.f32 %v1853_v52, %v5489_v2 }
 0x61d   : > { %v1862_v0 = vadd.f32 %v1854_v11, %v1834_v40  ;;  %v1863_v45 = vadd.f32 %v1855_v36, %v1835_v28  ;;  %v1864_v44 = vadd.f32 %v1856_v30, %v1836_v57  ;;  %v1865_v27 = vadd.f32 %v1857_v6, %v1837_v39 }
 0x61e   : > { %v1866_v47 = vadd.f32 %v1858_v37, %v1838_v26  ;;  %v1867_v19 = vadd.f32 %v1859_v20, %v1839_v14  ;;  %v1868_v15 = vadd.f32 %v1860_v35, %v1840_v18  ;;  %v1869_v13 = vadd.f32 %v1861_v12, %v1841_v51  ;;  %v1934_v20 = vld [vmem:[#allocation2 + $0x10f] sm:$0xff]  ;;  %v6849_v12 = vld [vmem:[#allocation58_spill] sm:$0xff] }
 0x61f   : > { %v1882_v32 = vmul.f32 %v1881_v59, %v5257_v53  ;;  %v1883_v16 = vmul.f32 %v1881_v59, %v5259_v33  ;;  %v1884_v61 = vmul.f32 %v1881_v59, %v6819_v8  ;;  %v1885_v55 = vmul.f32 %v1881_v59, %v5264_v34  ;;  %v6847_v35 = vld [vmem:[#allocation53_spill] sm:$0xff] }
 0x620   : > { %v1886_v52 = vmul.f32 %v1881_v59, %v5266_v49  ;;  %v1887_v42 = vmul.f32 %v1881_v59, %v5354_v62  ;;  %v1888_v5 = vmul.f32 %v1881_v59, %v5424_v48  ;;  %v1889_v29 = vmul.f32 %v1881_v59, %v5499_v60 }
 0x621   : > { %v1890_v54 = vadd.f32 %v1882_v32, %v1862_v0  ;;  %v1891_v63 = vadd.f32 %v1883_v16, %v1863_v45  ;;  %v1892_v22 = vadd.f32 %v1884_v61, %v1864_v44  ;;  %v1893_v43 = vadd.f32 %v1885_v55, %v1865_v27  ;;  %v6850_v45 = vld [vmem:[#allocation38_spill] sm:$0xff]  ;;  %v6854_v16 = vld [vmem:[#allocation65_spill] sm:$0xff] }
 0x622   : > { %v1894_v53 = vadd.f32 %v1886_v52, %v1866_v47  ;;  %v1895_v40 = vadd.f32 %v1887_v42, %v1867_v19  ;;  %v1896_v28 = vadd.f32 %v1888_v5, %v1868_v15  ;;  %v1897_v57 = vadd.f32 %v1889_v29, %v1869_v13  ;;  %v6852_v19 = vld [vmem:[#allocation63_spill] sm:$0xff]  ;;  %v6853_v13 = vld [vmem:[#allocation64_spill] sm:$0xff]  ;;  %v6855_v55 = vld [vmem:[#allocation66_spill] sm:$0xff] }
 0x623   : > { %v1914_v39 = vmul.f32 %v6838_v24, %v5185_v17  ;;  %v1915_v26 = vmul.f32 %v6838_v24, %v5290_v46  ;;  %v1916_v14 = vmul.f32 %v6838_v24, %v5364_v7  ;;  %v1917_v59 = vmul.f32 %v6838_v24, %v5434_v41  ;;  %v5524_v17 = vld [vmem:[%s6518_s9] sm:$0xff]  ;;  %v6846_v41 = vld [vmem:[#allocation50_spill] sm:$0xff]  ;;  %v1955_v42 = vld [vmem:[#allocation2 + $0x68] sm:$0xff] }
 0x624   : > { %v1918_v18 = vmul.f32 %v6838_v24, %v1906_v4  ;;  %v1919_v51 = vadd.f32 %v5461_v10, %v1890_v54  ;;  %v1920_v11 = vadd.f32 %v5465_v25, %v1891_v63  ;;  %v1921_v36 = vadd.f32 %v5469_v21, %v1892_v22  ;;  %v6848_v25 = vld [vmem:[#allocation54_spill] sm:$0xff]  ;;  %v6856_v5 = vld [vmem:[#allocation68_spill] sm:$0xff]  ;;  %v6857_v54 = vld [vmem:[#allocation47_spill] sm:$0xff] }
 0x625   : > { %v1922_v46 = vadd.f32 %v1914_v39, %v1893_v43  ;;  %v1923_v30 = vadd.f32 %v1915_v26, %v1894_v53  ;;  %v1924_v6 = vadd.f32 %v1916_v14, %v1895_v40  ;;  %v1925_v7 = vadd.f32 %v1917_v59, %v1896_v28  ;;  %v1956_v4 = vld [vmem:[#allocation2 + $0x80] sm:$0xff]  ;;  %v1957_v53 = vld [vmem:[#allocation2 + $0x98] sm:$0xff]  ;;  %v1958_v40 = vld [vmem:[#allocation2 + $0xb0] sm:$0xff] }
 0x626   : > { %v1926_v37 = vadd.f32 %v1918_v18, %v1897_v57  ;;  %v1938_v24 = vrot.slane %v6846_v41, %v6823_v3  ;;  %v1966_v10 = vrot.slane %v6846_v41, %v6847_v35  ;;  %v1994_v21 = vrot.slane %v6846_v41, %v6848_v25  ;;  %v1959_v14 = vld [vmem:[#allocation2 + $0xc8] sm:$0xff]  ;;  %v1960_v59 = vld [vmem:[#allocation2 + $0xe0] sm:$0xff]  ;;  %v1962_v18 = vld [vmem:[#allocation2 + $0x110] sm:$0xff] }
 0x627   : > { %v5534_v0 = vrot.slane %v6846_v41, %v6849_v12  ;;  %v5538_v44 = vrot.slane %v5524_v17, %v6850_v45  ;;  %v5542_v27 = vrot.slane %v5524_v17, %v6823_v3  ;;  %v5546_v47 = vrot.slane %v5524_v17, %v6847_v35 }
 0x628   : > { %v1939_v15 = vmul.f32 %v1938_v24, %v6852_v19  ;;  %v1940_v32 = vmul.f32 %v1938_v24, %v6853_v13  ;;  %v1941_v61 = vmul.f32 %v1938_v24, %v6854_v16  ;;  %v1942_v52 = vmul.f32 %v1938_v24, %v6855_v55 }
 0x629   : > { %6851 = vst [vmem:[#allocation52_spill] sm:$0xff] %v5538_v44  ;;  %v1943_v29 = vmul.f32 %v1938_v24, %v6856_v5  ;;  %v1944_v63 = vmul.f32 %v1938_v24, %v6857_v54  ;;  %v1945_v22 = vmul.f32 %v1938_v24, %v5449_v38  ;;  %v1946_v43 = vmul.f32 %v1938_v24, %v1934_v20 }
 0x62a   : > { %v1947_v28 = vadd.f32 %v1939_v15, %v1919_v51  ;;  %v1948_v57 = vadd.f32 %v1940_v32, %v1920_v11  ;;  %v1949_v39 = vadd.f32 %v1941_v61, %v1921_v36  ;;  %v1950_v26 = vadd.f32 %v1942_v52, %v1922_v46  ;;  %v1990_v15 = vld [vmem:[#allocation2 + $0x111] sm:$0xff] }
 0x62b   : > { %v1951_v41 = vadd.f32 %v1943_v29, %v1923_v30  ;;  %v1952_v19 = vadd.f32 %v1944_v63, %v1924_v6  ;;  %v1953_v13 = vadd.f32 %v1945_v22, %v1925_v7  ;;  %v1954_v16 = vadd.f32 %v1946_v43, %v1926_v37 }
 0x62c   : > { %v1967_v55 = vmul.f32 %v1966_v10, %v1955_v42  ;;  %v1968_v5 = vmul.f32 %v1966_v10, %v1956_v4  ;;  %v1969_v54 = vmul.f32 %v1966_v10, %v1957_v53  ;;  %v1970_v35 = vmul.f32 %v1966_v10, %v1958_v40 }
 0x62d   : > { %v1971_v38 = vmul.f32 %v1966_v10, %v1959_v14  ;;  %v1972_v20 = vmul.f32 %v1966_v10, %v1960_v59  ;;  %v1973_v24 = vmul.f32 %v1966_v10, %v5479_v1  ;;  %v1974_v3 = vmul.f32 %v1966_v10, %v1962_v18 }
 0x62e   : > { %v1975_v51 = vadd.f32 %v1967_v55, %v1947_v28  ;;  %v1976_v11 = vadd.f32 %v1968_v5, %v1948_v57  ;;  %v1977_v36 = vadd.f32 %v1969_v54, %v1949_v39  ;;  %v1978_v46 = vadd.f32 %v1970_v35, %v1950_v26  ;;  %v2055_v39 = vld [vmem:[#allocation3 + $0x1be] sm:$0xff] }
 0x62f   : > { %v1979_v32 = vadd.f32 %v1971_v38, %v1951_v41  ;;  %v1980_v61 = vadd.f32 %v1972_v20, %v1952_v19  ;;  %v1981_v30 = vadd.f32 %v1973_v24, %v1953_v13  ;;  %v1982_v6 = vadd.f32 %v1974_v3, %v1954_v16  ;;  %v2018_v3 = vld [vmem:[#allocation2 + $0x112] sm:$0xff]  ;;  %v2090_v26 = vld [vmem:[#allocation3 + $0x1bf] sm:$0xff] }
 0x630   : > { %v1995_v7 = vmul.f32 %v1994_v21, %v5226_v50  ;;  %v1996_v37 = vmul.f32 %v1994_v21, %v5228_v31  ;;  %v1997_v52 = vmul.f32 %v1994_v21, %v5230_v56  ;;  %v1998_v42 = vmul.f32 %v1994_v21, %v5232_v58  ;;  %v2118_v19 = vld [vmem:[#allocation3 + $0x1c0] sm:$0xff] }
 0x631   : > { %v1999_v1 = vmul.f32 %v1994_v21, %v5344_v9  ;;  %v2000_v10 = vmul.f32 %v1994_v21, %v5414_v23  ;;  %v2001_v29 = vmul.f32 %v1994_v21, %v5489_v2  ;;  %v2002_v35 = vmul.f32 %v1994_v21, %v1990_v15  ;;  %v2054_v2 = vld [vmem:[#allocation3 + $0x196] sm:$0xff] }
 0x632   : > { %v2003_v63 = vadd.f32 %v1995_v7, %v1975_v51  ;;  %v2004_v22 = vadd.f32 %v1996_v37, %v1976_v11  ;;  %v2005_v43 = vadd.f32 %v1997_v52, %v1977_v36  ;;  %v2006_v4 = vadd.f32 %v1998_v42, %v1978_v46  ;;  %v6862_v51 = vld [vmem:[#allocation37_spill] sm:$0xff] }
 0x633   : > { %v2007_v53 = vadd.f32 %v1999_v1, %v1979_v32  ;;  %v2008_v50 = vadd.f32 %v2000_v10, %v1980_v61  ;;  %v2009_v40 = vadd.f32 %v2001_v29, %v1981_v30  ;;  %v2010_v31 = vadd.f32 %v2002_v35, %v1982_v6  ;;  %v2049_v6 = vld [vmem:[%s6518_s9 + $0x8] sm:$0xff] }
 0x634   : > { %v2023_v56 = vmul.f32 %v5534_v0, %v5259_v33  ;;  %v2024_v9 = vmul.f32 %v5534_v0, %v6819_v8  ;;  %v2025_v58 = vmul.f32 %v5534_v0, %v5264_v34  ;;  %v2026_v23 = vmul.f32 %v5534_v0, %v5266_v49  ;;  %v2089_v8 = vld [vmem:[#allocation3 + $0x197] sm:$0xff] }
 0x635   : > { %v2027_v21 = vmul.f32 %v5534_v0, %v5354_v62  ;;  %v2028_v28 = vmul.f32 %v5534_v0, %v5424_v48  ;;  %v2029_v57 = vmul.f32 %v5534_v0, %v5499_v60  ;;  %v2030_v33 = vmul.f32 %v5534_v0, %v2018_v3  ;;  %v2117_v62 = vld [vmem:[#allocation3 + $0x198] sm:$0xff]  ;;  %v5597_v0 = vld [vmem:[%s6520_s11] ss:$0 sm:$0xff] }
 0x636   : > { %v5578_v14 = vadd.f32 %v2023_v56, %v2003_v63  ;;  %v5580_v34 = vadd.f32 %v2024_v9, %v2004_v22  ;;  %v5582_v49 = vadd.f32 %v2025_v58, %v2005_v43  ;;  %v5584_v59 = vadd.f32 %v2026_v23, %v2006_v4 }
 0x637   : > { %v5586_v18 = vadd.f32 %v2027_v21, %v2007_v53  ;;  %v5588_v48 = vadd.f32 %v2028_v28, %v2008_v50  ;;  %v5590_v41 = vadd.f32 %v2029_v57, %v2009_v40  ;;  %v5592_v60 = vadd.f32 %v2030_v33, %v2010_v31 }
 0x638   : > { %2040 = vst [vmem:[#allocation3 + $0x1a0] sm:$0xff] %v5578_v14  ;;  %2041 = vst [vmem:[#allocation3 + $0x1c8] sm:$0xff] %v5580_v34  ;;  %v2066_v13 = vmul.f32 %v5538_v44, %v2054_v2  ;;  %v2067_v16 = vmul.f32 %v5538_v44, %v2055_v39  ;;  %v2101_v55 = vmul.f32 %v5542_v27, %v2089_v8  ;;  %v5616_v11 = vsub.s32 5, %v6862_v51 }
 0x639   : > { %6858 = vst [vmem:[#allocation57_spill] sm:$0xff] %v5586_v18  ;;  %6859 = vst [vmem:[#allocation45_spill] sm:$0xff] %v5588_v48  ;;  %v2102_v5 = vmul.f32 %v5542_v27, %v2090_v26  ;;  %v2129_v54 = vmul.f32 %v5546_v47, %v2117_v62  ;;  %v2130_v24 = vmul.f32 %v5546_v47, %v2118_v19  ;;  %v5627_v61 = vsub.s32 6, %v6862_v51  ;;  %v6863_v62 = vld [vmem:[#allocation51_spill] sm:$0xff] }
 0x63a   : > { %6860 = vst [vmem:[#allocation67_spill] sm:$0xff] %v5590_v41  ;;  %6861 = vst [vmem:[#allocation61_spill] sm:$0xff] %v5592_v60  ;;  %v2081_v38 = vadd.f32 %v5597_v0, %v2066_v13  ;;  %v2082_v20 = vadd.f32 %v5597_v0, %v2067_v16  ;;  %v5620_v36 = vrot.slane %v5524_v17, %v6848_v25  ;;  %v5630_v30 = vsub.s32 7, %v6862_v51 }
 0x63b   : > { %2042 = vst [vmem:[#allocation3 + $0x1f0] sm:$0xff] %v5582_v49  ;;  %2043 = vst [vmem:[#allocation3 + $0x218] sm:$0xff] %v5584_v59  ;;  %v5624_v32 = vrot.slane %v5524_v17, %v6849_v12  ;;  %v5637_v52 = vrot.slane %v5524_v17, %v5616_v11  ;;  %v5644_v3 = vrot.slane %v5524_v17, %v5627_v61 }
 0x63c   : > { %2044 = vst [vmem:[#allocation3 + $0x240] sm:$0xff] %v5586_v18  ;;  %2045 = vst [vmem:[#allocation3 + $0x268] sm:$0xff] %v5588_v48  ;;  %v2109_v46 = vadd.f32 %v2101_v55, %v2081_v38  ;;  %v2110_v15 = vadd.f32 %v2102_v5, %v2082_v20  ;;  %v5649_v31 = vrot.slane %v5524_v17, %v5630_v30  ;;  %v6864_v20 = vld [vmem:[#allocation53_spill] sm:$0xff] }
 0x63d   : > { %2046 = vst [vmem:[#allocation3 + $0x290] sm:$0xff] %v5590_v41  ;;  %2047 = vst [vmem:[#allocation3 + $0x2b8] sm:$0xff] %v5592_v60  ;;  %v5654_v28 = vrot.slane %v2049_v6, %v6850_v45  ;;  %v5659_v19 = vrot.slane %v2049_v6, %v6863_v62  ;;  %v2092_v48 = vld [vmem:[#allocation3 + $0x20f] sm:$0xff] }
 0x63e   : > { %v2137_v7 = vadd.f32 %v2129_v54, %v2109_v46  ;;  %v2138_v37 = vadd.f32 %v2130_v24, %v2110_v15  ;;  %v5664_v24 = vrot.slane %v2049_v6, %v6864_v20 }
 0x63f   : > { %v2145_v42 = vld [vmem:[#allocation3 + $0x199] sm:$0xff]  ;;  %v2146_v1 = vld [vmem:[#allocation3 + $0x1c1] sm:$0xff] }
 0x640   : > { %v2173_v10 = vld [vmem:[#allocation3 + $0x19a] sm:$0xff]  ;;  %v2157_v29 = vmul.f32 %v5620_v36, %v2145_v42  ;;  %v2158_v35 = vmul.f32 %v5620_v36, %v2146_v1  ;;  %v2174_v63 = vld [vmem:[#allocation3 + $0x1c2] sm:$0xff] }
 0x641   : > { %v2185_v22 = vmul.f32 %v5624_v32, %v2173_v10  ;;  %v2201_v43 = vld [vmem:[#allocation3 + $0x19b] sm:$0xff]  ;;  %v2202_v4 = vld [vmem:[#allocation3 + $0x1c3] sm:$0xff]  ;;  %v2186_v53 = vmul.f32 %v5624_v32, %v2174_v63 }
 0x642   : > { %v2229_v50 = vld [vmem:[#allocation3 + $0x19c] sm:$0xff]  ;;  %v2230_v40 = vld [vmem:[#allocation3 + $0x1c4] sm:$0xff]  ;;  %v2165_v56 = vadd.f32 %v2157_v29, %v2137_v7  ;;  %v2166_v9 = vadd.f32 %v2158_v35, %v2138_v37  ;;  %v2213_v58 = vmul.f32 %v5637_v52, %v2201_v43  ;;  %v2214_v23 = vmul.f32 %v5637_v52, %v2202_v4  ;;  %v2050_v43 = vld [vmem:[%s6518_s9 + $0x10] sm:$0x1f] }
 0x643   : > { %v2257_v2 = vld [vmem:[#allocation3 + $0x19d] sm:$0xff]  ;;  %v2258_v21 = vld [vmem:[#allocation3 + $0x1c5] sm:$0xff]  ;;  %v2241_v39 = vmul.f32 %v5644_v3, %v2229_v50  ;;  %v2242_v8 = vmul.f32 %v5644_v3, %v2230_v40  ;;  %v5669_v37 = vrot.slane %v2049_v6, %v6848_v25  ;;  %v2353_v35 = vmul.f32 %v5664_v24, %v5578_v14  ;;  %v2148_v18 = vld [vmem:[#allocation3 + $0x211] sm:$0xff] }
 0x644   : > { %v2193_v57 = vadd.f32 %v2185_v22, %v2165_v56  ;;  %v2194_v33 = vadd.f32 %v2186_v53, %v2166_v9  ;;  %v2285_v26 = vld [vmem:[#allocation3 + $0x19e] sm:$0xff]  ;;  %v2286_v17 = vld [vmem:[#allocation3 + $0x1c6] sm:$0xff]  ;;  %v2269_v55 = vmul.f32 %v5649_v31, %v2257_v2  ;;  %v2270_v5 = vmul.f32 %v5649_v31, %v2258_v21 }
 0x645   : > { %v2313_v54 = vld [vmem:[#allocation3 + $0x19f] sm:$0xff]  ;;  %v2314_v38 = vld [vmem:[#allocation3 + $0x1c7] sm:$0xff]  ;;  %v2297_v15 = vmul.f32 %v5654_v28, %v2285_v26  ;;  %v2298_v7 = vmul.f32 %v5654_v28, %v2286_v17  ;;  %6865 = vst [vmem:[#allocation48_spill] sm:$0xff] %v5669_v37  ;;  %v2354_v50 = vmul.f32 %v5664_v24, %v5580_v34  ;;  %v5681_v40 = vrot.slane %v2049_v6, %v6849_v12 }
 0x646   : > { %v2221_v13 = vadd.f32 %v2213_v58, %v2193_v57  ;;  %v2222_v16 = vadd.f32 %v2214_v23, %v2194_v33  ;;  %v2325_v10 = vmul.f32 %v5659_v19, %v2313_v54  ;;  %v2326_v29 = vmul.f32 %v5659_v19, %v2314_v38  ;;  %v2369_v63 = vld [vmem:[#allocation3 + $0x1a1] sm:$0xff]  ;;  %v2370_v22 = vld [vmem:[#allocation3 + $0x1c9] sm:$0xff] }
 0x647   : > { %6866 = vst [vmem:[#allocation55_spill] sm:$0xff] %v5681_v40  ;;  %v2397_v56 = vld [vmem:[#allocation3 + $0x1a2] sm:$0xff]  ;;  %v2398_v9 = vld [vmem:[#allocation3 + $0x1ca] sm:$0xff]  ;;  %v5684_v58 = vrot.slane %v2049_v6, %v5616_v11  ;;  %v5687_v23 = vrot.slane %v2049_v6, %v5627_v61  ;;  %v5690_v2 = vrot.slane %v2049_v6, %v5630_v30  ;;  %v2381_v33 = vmul.f32 %v5669_v37, %v2369_v63 }
 0x648   : > { %v2249_v51 = vadd.f32 %v2241_v39, %v2221_v13  ;;  %v2250_v46 = vadd.f32 %v2242_v8, %v2222_v16  ;;  %v2382_v39 = vmul.f32 %v5669_v37, %v2370_v22  ;;  %v2425_v8 = vld [vmem:[#allocation3 + $0x1a3] sm:$0xff]  ;;  %v2426_v26 = vld [vmem:[#allocation3 + $0x1cb] sm:$0xff]  ;;  %v5701_v6 = vrot.slane %v2050_v43, %v6864_v20 }
 0x649   : > { %6867 = vst [vmem:[#allocation39_spill] sm:$0xff] %v5684_v58  ;;  %6868 = vst [vmem:[#allocation40_spill] sm:$0xff] %v5687_v23  ;;  %v2453_v17 = vld [vmem:[#allocation3 + $0x1a4] sm:$0xff]  ;;  %v2454_v13 = vld [vmem:[#allocation3 + $0x1cc] sm:$0xff] }
 0x64a   : > { %v2277_v42 = vadd.f32 %v2269_v55, %v2249_v51  ;;  %v2278_v1 = vadd.f32 %v2270_v5, %v2250_v46  ;;  %6869 = vst [vmem:[#allocation41_spill] sm:$0xff] %v5690_v2  ;;  %v2481_v16 = vld [vmem:[#allocation3 + $0x1a5] sm:$0xff]  ;;  %v5695_v55 = vrot.slane %v2050_v43, %v6850_v45  ;;  %v5698_v5 = vrot.slane %v2050_v43, %v6863_v62 }
 0x64b   : > { %6872 = vst [vmem:[#allocation44_spill] sm:$0xff] %v5701_v6  ;;  %v2409_v51 = vmul.f32 %v5681_v40, %v2397_v56  ;;  %v2410_v46 = vmul.f32 %v5681_v40, %v2398_v9  ;;  %v2465_v63 = vmul.f32 %v5687_v23, %v2453_v17  ;;  %v2537_v22 = vld [vmem:[#allocation3 + $0x1a7] sm:$0xff]  ;;  %v2493_v56 = vmul.f32 %v5690_v2, %v2481_v16  ;;  %v2538_v9 = vld [vmem:[#allocation3 + $0x1cf] sm:$0xff] }
 0x64c   : > { %v2305_v4 = vadd.f32 %v2297_v15, %v2277_v42  ;;  %v2306_v53 = vadd.f32 %v2298_v7, %v2278_v1  ;;  %6870 = vst [vmem:[#allocation42_spill] sm:$0xff] %v5695_v55  ;;  %6871 = vst [vmem:[#allocation43_spill] sm:$0xff] %v5698_v5  ;;  %v2482_v15 = vld [vmem:[#allocation3 + $0x1cd] sm:$0xff] }
 0x64d   : > { %v2509_v7 = vld [vmem:[#allocation3 + $0x1a6] sm:$0xff]  ;;  %v2510_v42 = vld [vmem:[#allocation3 + $0x1ce] sm:$0xff]  ;;  %v2494_v60 = vmul.f32 %v5690_v2, %v2482_v15 }
 0x64e   : > { %v2333_v21 = vadd.f32 %v2325_v10, %v2305_v4  ;;  %v2334_v57 = vadd.f32 %v2326_v29, %v2306_v53  ;;  %v2051_v1 = vld [vmem:[#allocation15] sm:$0xff]  ;;  %v2437_v10 = vmul.f32 %v5684_v58, %v2425_v8  ;;  %v2438_v29 = vmul.f32 %v5684_v58, %v2426_v26  ;;  %v5822_v40 = vld [vmem:[#allocation3 + $0x128] sm:$0xff] }
 0x64f   : > { %v5709_v4 = vrot.slane %v2050_v43, %v6848_v25  ;;  %v2521_v8 = vmul.f32 %v5695_v55, %v2509_v7  ;;  %v2522_v26 = vmul.f32 %v5695_v55, %v2510_v42  ;;  %v2593_v17 = vld [vmem:[#allocation3 + $0x1a9] sm:$0xff]  ;;  %v5717_v58 = vrot.slane %v2050_v43, %v6849_v12  ;;  %v2622_v42 = vld [vmem:[#allocation3 + $0x1d2] sm:$0xff]  ;;  %6889 = vst [vmem:[#allocation37_spill] sm:$0xff] %v5822_v40 }
 0x650   : > { %v2361_v54 = vadd.f32 %v2353_v35, %v2333_v21  ;;  %v2362_v38 = vadd.f32 %v2354_v50, %v2334_v57  ;;  %v2466_v50 = vmul.f32 %v5687_v23, %v2454_v13  ;;  %v2565_v21 = vld [vmem:[#allocation3 + $0x1a8] sm:$0xff]  ;;  %v2566_v57 = vld [vmem:[#allocation3 + $0x1d0] sm:$0xff]  ;;  %v5721_v16 = vrot.slane %v2051_v1, %v6850_v45  ;;  %v5820_v23 = vld [vmem:[#allocation3 + $0x100] sm:$0xff] }
 0x651   : > { %6873 = vst [vmem:[#allocation46_spill] sm:$0xff] %v5709_v4  ;;  %6874 = vst [vmem:[#allocation49_spill] sm:$0xff] %v5717_v58  ;;  %v2594_v13 = vld [vmem:[#allocation3 + $0x1d1] sm:$0xff]  ;;  %v2577_v15 = vmul.f32 %v5701_v6, %v2565_v21  ;;  %v2578_v7 = vmul.f32 %v5701_v6, %v2566_v57  ;;  %v5727_v43 = vrot.slane %v2051_v1, %v6863_v62  ;;  %v2147_v37 = vld [vmem:[#allocation3 + $0x1e9] sm:$0xff] }
 0x652   : > { %v2389_v35 = vadd.f32 %v2381_v33, %v2361_v54  ;;  %v2390_v53 = vadd.f32 %v2382_v39, %v2362_v38  ;;  %v2549_v39 = vmul.f32 %v5698_v5, %v2537_v22  ;;  %v2621_v54 = vld [vmem:[#allocation3 + $0x1aa] sm:$0xff]  ;;  %6875 = vst [vmem:[#allocation59_spill] sm:$0xff] %v5721_v16  ;;  %v2550_v38 = vmul.f32 %v5698_v5, %v2538_v9  ;;  %v5753_v6 = vld [vmem:[#allocation15 + $0x8] sm:$0xff] }
 0x653   : > { %v2649_v55 = vld [vmem:[#allocation3 + $0x10] sm:$0xff]  ;;  %6876 = vst [vmem:[#allocation56_spill] sm:$0xff] %v5727_v43  ;;  %v5730_v22 = vmul.f32 %v5709_v4, %v2593_v17  ;;  %v5735_v2 = vrot.slane %v2051_v1, %v6864_v20  ;;  %v2606_v9 = vmul.f32 %v5709_v4, %v2594_v13  ;;  %v5739_v21 = vmul.f32 %v5717_v58, %v2621_v54 }
 0x654   : > { %v2417_v41 = vadd.f32 %v2409_v51, %v2389_v35  ;;  %v2418_v33 = vadd.f32 %v2410_v46, %v2390_v53  ;;  %v2650_v35 = vld [vmem:[#allocation3 + $0x38] sm:$0xff]  ;;  %v5732_v53 = vld [vmem:[#allocation3 + $0x60] sm:$0xff]  ;;  %v5742_v57 = vrot.slane %v2051_v1, %v6848_v25  ;;  %v5748_v17 = vmul.f32 %v5717_v58, %v2622_v42  ;;  %6888 = vst [vmem:[#allocation47_spill] sm:$0xff] %v5820_v23 }
 0x655   : > { %6877 = vst [vmem:[#allocation60_spill] sm:$0xff] %v5732_v53  ;;  %6878 = vst [vmem:[#allocation62_spill] sm:$0xff] %v5735_v2  ;;  %v5756_v13 = vmul.f32 %v5721_v16, %v2650_v35  ;;  %v5759_v54 = vmul.f32 %v5727_v43, %v2650_v35  ;;  %v5763_v4 = vmul.f32 %v5727_v43, %v5732_v53  ;;  %v5778_v35 = vld [vmem:[#allocation3 + $0xb0] sm:$0xff]  ;;  %v5794_v58 = vld [vmem:[#allocation3 + $0xd8] sm:$0xff] }
 0x656   : > { %v2445_v51 = vadd.f32 %v2437_v10, %v2417_v41  ;;  %v2446_v46 = vadd.f32 %v2438_v29, %v2418_v33  ;;  %6879 = vst [vmem:[#allocation50_spill] sm:$0xff] %v5742_v57  ;;  %v5745_v41 = vrot.slane %v2051_v1, %v6849_v12  ;;  %v5751_v33 = vmul.f32 %v5721_v16, %v2649_v55 }
 0x657   : > { %6883 = vst [vmem:[#allocation63_spill] sm:$0xff] %v5778_v35  ;;  %v5786_v16 = vmul.f32 %v5742_v57, %v5778_v35  ;;  %6886 = vst [vmem:[#allocation66_spill] sm:$0xff] %v5794_v58 }
 0x658   : > { %6880 = vst [vmem:[#allocation54_spill] sm:$0xff] %v5745_v41  ;;  %v2473_v10 = vadd.f32 %v2465_v63, %v2445_v51  ;;  %v2474_v29 = vadd.f32 %v2466_v50, %v2446_v46  ;;  %v5765_v63 = vld [vmem:[#allocation3 + $0x88] sm:$0xff]  ;;  %v5768_v50 = vrot.slane %v2051_v1, %v5616_v11  ;;  %v5772_v51 = vmul.f32 %v5735_v2, %v5732_v53 }
 0x659   : > { %6881 = vst [vmem:[#allocation58_spill] sm:$0xff] %v5765_v63  ;;  %v5776_v46 = vmul.f32 %v5735_v2, %v5765_v63  ;;  %v5782_v43 = vmul.f32 %v5742_v57, %v5765_v63  ;;  %v5798_v63 = vmul.f32 %v5745_v41, %v5778_v35  ;;  %v5802_v57 = vrot.slane %v5753_v6, %v6850_v45 }
 0x65a   : > { %6882 = vst [vmem:[#allocation38_spill] sm:$0xff] %v5768_v50  ;;  %v2501_v42 = vadd.f32 %v2493_v56, %v2473_v10  ;;  %v2502_v55 = vadd.f32 %v2494_v60, %v2474_v29  ;;  %v5789_v60 = vrot.slane %v2051_v1, %v5627_v61  ;;  %v5792_v56 = vrot.slane %v2051_v1, %v5630_v30  ;;  %v2056_v10 = vld [vmem:[#allocation3 + $0x1e6] sm:$0xff]  ;;  %v2057_v29 = vld [vmem:[#allocation3 + $0x20e] sm:$0xff] }
 0x65b   : > { %6887 = vst [vmem:[#allocation68_spill] sm:$0xff] %v5802_v57  ;;  %v5806_v5 = vmul.f32 %v5745_v41, %v5794_v58  ;;  %v5810_v1 = vmul.f32 %v5768_v50, %v5794_v58  ;;  %v2068_v41 = vmul.f32 %v5538_v44, %v2056_v10  ;;  %v2069_v58 = vmul.f32 %v5538_v44, %v2057_v29  ;;  %v2120_v10 = vld [vmem:[#allocation3 + $0x210] sm:$0xff] }
 0x65c   : > { %6884 = vst [vmem:[#allocation64_spill] sm:$0xff] %v5789_v60  ;;  %6885 = vst [vmem:[#allocation65_spill] sm:$0xff] %v5792_v56  ;;  %v2529_v2 = vadd.f32 %v2521_v8, %v2501_v42  ;;  %v2530_v53 = vadd.f32 %v2522_v26, %v2502_v55  ;;  %v5814_v8 = vrot.slane %v5753_v6, %v6863_v62  ;;  %v2091_v42 = vld [vmem:[#allocation3 + $0x1e7] sm:$0xff] }
 0x65d   : > { %v5818_v26 = vrot.slane %v5753_v6, %v6864_v20  ;;  %v5828_v62 = vmul.f32 %v5768_v50, %v5820_v23  ;;  %v5832_v20 = vmul.f32 %v5789_v60, %v5820_v23  ;;  %v5848_v23 = vld [vmem:[#allocation3 + $0x178] sm:$0xff] }
 0x65e   : > { %v2557_v55 = vadd.f32 %v2549_v39, %v2529_v2  ;;  %v2558_v35 = vadd.f32 %v2550_v38, %v2530_v53  ;;  %v5836_v2 = vmul.f32 %v5789_v60, %v5822_v40  ;;  %v5838_v39 = vld [vmem:[#allocation3 + $0x150] sm:$0xff]  ;;  %v5842_v38 = vmul.f32 %v5792_v56, %v5822_v40  ;;  %v2119_v53 = vld [vmem:[#allocation3 + $0x1e8] sm:$0xff]  ;;  %6893 = vst [vmem:[#allocation72_spill] sm:$0xff] %v5848_v23 }
 0x65f   : > { %6890 = vst [vmem:[#allocation69_spill] sm:$0xff] %v5838_v39  ;;  %v5846_v50 = vmul.f32 %v5792_v56, %v5838_v39  ;;  %v5852_v60 = vmul.f32 %v5802_v57, %v5838_v39  ;;  %v5856_v40 = vmul.f32 %v5802_v57, %v5848_v23  ;;  %v2103_v39 = vmul.f32 %v5542_v27, %v2091_v42  ;;  %v2204_v42 = vld [vmem:[#allocation3 + $0x213] sm:$0xff] }
 0x660   : > { %6891 = vst [vmem:[#allocation70_spill] sm:$0xff] %v5842_v38  ;;  %v2585_v29 = vadd.f32 %v2577_v15, %v2557_v55  ;;  %v2586_v44 = vadd.f32 %v2578_v7, %v2558_v35  ;;  %v5860_v15 = vmul.f32 %v5814_v8, %v5848_v23  ;;  %v2083_v7 = vadd.f32 %v5597_v0, %v2068_v41  ;;  %v2176_v38 = vld [vmem:[#allocation3 + $0x212] sm:$0xff] }
 0x661   : > { %6892 = vst [vmem:[#allocation71_spill] sm:$0xff] %v5846_v50  ;;  %6894 = vst [vmem:[#allocation73_spill] sm:$0xff] %v5852_v60  ;;  %v2084_v35 = vadd.f32 %v5597_v0, %v2069_v58  ;;  %v2104_v60 = vmul.f32 %v5542_v27, %v2092_v48  ;;  %v2175_v50 = vld [vmem:[#allocation3 + $0x1ea] sm:$0xff]  ;;  %v2131_v57 = vmul.f32 %v5546_v47, %v2119_v53 }
 0x662   : > { %6895 = vst [vmem:[#allocation74_spill] sm:$0xff] %v5856_v40  ;;  %6896 = vst [vmem:[#allocation75_spill] sm:$0xff] %v5860_v15  ;;  %v2613_v55 = vadd.f32 %v5730_v22, %v2585_v29  ;;  %v2614_v56 = vadd.f32 %v2606_v9, %v2586_v44  ;;  %v2132_v40 = vmul.f32 %v5546_v47, %v2120_v10  ;;  %v2203_v9 = vld [vmem:[#allocation3 + $0x1eb] sm:$0xff]  ;;  %v2232_v10 = vld [vmem:[#allocation3 + $0x214] sm:$0xff] }
 0x663   : > { %v2159_v23 = vmul.f32 %v5620_v36, %v2147_v37  ;;  %v2160_v15 = vmul.f32 %v5620_v36, %v2148_v18  ;;  %v2111_v22 = vadd.f32 %v2103_v39, %v2083_v7  ;;  %v2112_v44 = vadd.f32 %v2104_v60, %v2084_v35  ;;  %v2231_v39 = vld [vmem:[#allocation3 + $0x1ec] sm:$0xff] }
 0x664   : > { %v2641_v41 = vadd.f32 %v5739_v21, %v2613_v55  ;;  %v2642_v58 = vadd.f32 %v5748_v17, %v2614_v56  ;;  %v5875_v48 = vmul.f32 %v5814_v8, %v5578_v14  ;;  %v5879_v53 = vmul.f32 %v5818_v26, %v5578_v14  ;;  %v2259_v35 = vld [vmem:[#allocation3 + $0x1ed] sm:$0xff]  ;;  %v2260_v55 = vld [vmem:[#allocation3 + $0x215] sm:$0xff] }
 0x665   : > { %v2187_v37 = vmul.f32 %v5624_v32, %v2175_v50  ;;  %v2188_v18 = vmul.f32 %v5624_v32, %v2176_v38  ;;  %v2139_v56 = vadd.f32 %v2131_v57, %v2111_v22  ;;  %v2140_v60 = vadd.f32 %v2132_v40, %v2112_v44 }
 0x666   : > { %v2669_v21 = vadd.f32 %v5751_v33, %v2641_v41  ;;  %v2670_v17 = vadd.f32 %v5756_v13, %v2642_v58  ;;  %v5887_v29 = vmul.f32 %v5818_v26, %v5580_v34  ;;  %v5891_v7 = vrot.slane %v5753_v6, %v6848_v25 }
 0x667   : > { %v2215_v50 = vmul.f32 %v5637_v52, %v2203_v9  ;;  %v2216_v38 = vmul.f32 %v5637_v52, %v2204_v42  ;;  %v2167_v57 = vadd.f32 %v2159_v23, %v2139_v56  ;;  %v2168_v40 = vadd.f32 %v2160_v15, %v2140_v60  ;;  %v5907_v9 = vld [vmem:[#allocation15 + $0x10] sm:$0x1f]  ;;  %v2287_v42 = vld [vmem:[#allocation3 + $0x1ee] sm:$0xff] }
 0x668   : > { %v2698_v33 = vadd.f32 %v5759_v54, %v2669_v21  ;;  %v2699_v13 = vadd.f32 %v5763_v4, %v2670_v17  ;;  %v5899_v41 = vrot.slane %v5753_v6, %v6849_v12  ;;  %v5903_v58 = vrot.slane %v5753_v6, %v5616_v11  ;;  %v2288_v21 = vld [vmem:[#allocation3 + $0x216] sm:$0xff] }
 0x669   : > { %v2243_v22 = vmul.f32 %v5644_v3, %v2231_v39  ;;  %v2244_v44 = vmul.f32 %v5644_v3, %v2232_v10  ;;  %v2195_v54 = vadd.f32 %v2187_v37, %v2167_v57  ;;  %v2196_v15 = vadd.f32 %v2188_v18, %v2168_v40  ;;  %v2315_v39 = vld [vmem:[#allocation3 + $0x1ef] sm:$0xff]  ;;  %v2316_v10 = vld [vmem:[#allocation3 + $0x217] sm:$0xff] }
 0x66a   : > { %6897 = vst [vmem:[#allocation76_spill] sm:$0xff] %v5899_v41  ;;  %6898 = vst [vmem:[#allocation77_spill] sm:$0xff] %v5903_v58  ;;  %v2727_v4 = vadd.f32 %v5772_v51, %v2698_v33  ;;  %v2728_v23 = vadd.f32 %v5776_v46, %v2699_v13  ;;  %v5913_v17 = vrot.slane %v5753_v6, %v5627_v61 }
 0x66b   : > { %v5917_v11 = vrot.slane %v5753_v6, %v5630_v30  ;;  %v2271_v56 = vmul.f32 %v5649_v31, %v2259_v35  ;;  %v2272_v60 = vmul.f32 %v5649_v31, %v2260_v55  ;;  %v2223_v37 = vadd.f32 %v2215_v50, %v2195_v54 }
 0x66c   : > { %6899 = vst [vmem:[#allocation78_spill] sm:$0xff] %v5913_v17  ;;  %v2756_v51 = vadd.f32 %v5782_v43, %v2727_v4  ;;  %v2757_v46 = vadd.f32 %v5786_v16, %v2728_v23  ;;  %v2224_v18 = vadd.f32 %v2216_v38, %v2196_v15  ;;  %v5925_v61 = vmul.f32 %v5891_v7, %v5580_v34 }
 0x66d   : > { %6900 = vst [vmem:[#allocation79_spill] sm:$0xff] %v5917_v11  ;;  %v5929_v30 = vrot.slane %v5907_v9, %v6850_v45  ;;  %v2299_v6 = vmul.f32 %v5654_v28, %v2287_v42  ;;  %v2300_v33 = vmul.f32 %v5654_v28, %v2288_v21  ;;  %v2251_v50 = vadd.f32 %v2243_v22, %v2223_v37  ;;  %v2371_v22 = vld [vmem:[#allocation3 + $0x1f1] sm:$0xff] }
 0x66e   : > { %v2785_v43 = vadd.f32 %v5798_v63, %v2756_v51  ;;  %v2786_v16 = vadd.f32 %v5806_v5, %v2757_v46  ;;  %v2252_v38 = vadd.f32 %v2244_v44, %v2224_v18  ;;  %v5937_v13 = vmul.f32 %v5891_v7, %v5582_v49  ;;  %v2372_v44 = vld [vmem:[#allocation3 + $0x219] sm:$0xff]  ;;  %v6902_v51 = vld [vmem:[#allocation57_spill] sm:$0xff]  ;;  %v6903_v18 = vld [vmem:[#allocation48_spill] sm:$0xff] }
 0x66f   : > { %6901 = vst [vmem:[#allocation80_spill] sm:$0xff] %v5929_v30  ;;  %v5941_v57 = vmul.f32 %v5899_v41, %v5582_v49  ;;  %v2327_v45 = vmul.f32 %v5659_v19, %v2315_v39  ;;  %v2328_v40 = vmul.f32 %v5659_v19, %v2316_v10  ;;  %v2279_v55 = vadd.f32 %v2271_v56, %v2251_v50  ;;  %v2399_v56 = vld [vmem:[#allocation3 + $0x1f2] sm:$0xff] }
 0x670   : > { %v2814_v35 = vadd.f32 %v5810_v1, %v2785_v43  ;;  %v2815_v63 = vadd.f32 %v5828_v62, %v2786_v16  ;;  %v2280_v5 = vadd.f32 %v2272_v60, %v2252_v38  ;;  %v5949_v4 = vmul.f32 %v5899_v41, %v5584_v59  ;;  %v2400_v60 = vld [vmem:[#allocation3 + $0x21a] sm:$0xff] }
 0x671   : > { %v5953_v23 = vmul.f32 %v5903_v58, %v5584_v59  ;;  %v2355_v54 = vmul.f32 %v5664_v24, %v5582_v49  ;;  %v2356_v1 = vmul.f32 %v5664_v24, %v5584_v59  ;;  %v2307_v42 = vadd.f32 %v2299_v6, %v2279_v55  ;;  %v6904_v43 = vld [vmem:[#allocation70_spill] sm:$0xff]  ;;  %v6905_v16 = vld [vmem:[#allocation71_spill] sm:$0xff] }
 0x672   : > { %v2843_v62 = vadd.f32 %v5832_v20, %v2814_v35  ;;  %v2844_v15 = vadd.f32 %v5836_v2, %v2815_v63  ;;  %v2308_v21 = vadd.f32 %v2300_v33, %v2280_v5  ;;  %v5963_v46 = vmul.f32 %v5903_v58, %v6902_v51  ;;  %v2427_v50 = vld [vmem:[#allocation3 + $0x1f3] sm:$0xff]  ;;  %v2428_v38 = vld [vmem:[#allocation3 + $0x21b] sm:$0xff] }
 0x673   : > { %v5967_v37 = vmul.f32 %v5913_v17, %v6902_v51  ;;  %v2383_v39 = vmul.f32 %v6903_v18, %v2371_v22  ;;  %v2384_v10 = vmul.f32 %v6903_v18, %v2372_v44  ;;  %v2335_v6 = vadd.f32 %v2327_v45, %v2307_v42  ;;  %v6906_v35 = vld [vmem:[#allocation45_spill] sm:$0xff]  ;;  %v6907_v5 = vld [vmem:[#allocation55_spill] sm:$0xff]  ;;  %v6916_v18 = vld [vmem:[#allocation40_spill] sm:$0xff] }
 0x674   : > { %v2872_v20 = vadd.f32 %v6904_v43, %v2843_v62  ;;  %v2873_v2 = vadd.f32 %v6905_v16, %v2844_v15  ;;  %v2336_v33 = vadd.f32 %v2328_v40, %v2308_v21  ;;  %v5975_v63 = vmul.f32 %v5913_v17, %v6906_v35  ;;  %v6908_v58 = vld [vmem:[#allocation73_spill] sm:$0xff]  ;;  %v6909_v43 = vld [vmem:[#allocation74_spill] sm:$0xff]  ;;  %v6910_v16 = vld [vmem:[#allocation67_spill] sm:$0xff] }
 0x675   : > { %v5979_v55 = vmul.f32 %v5917_v11, %v6906_v35  ;;  %v2411_v22 = vmul.f32 %v6907_v5, %v2399_v56  ;;  %v2412_v44 = vmul.f32 %v6907_v5, %v2400_v60  ;;  %v2363_v45 = vadd.f32 %v2355_v54, %v2335_v6  ;;  %v2455_v42 = vld [vmem:[#allocation3 + $0x1f4] sm:$0xff]  ;;  %v2456_v21 = vld [vmem:[#allocation3 + $0x21c] sm:$0xff] }
 0x676   : > { %v2901_v62 = vadd.f32 %v6908_v58, %v2872_v20  ;;  %v2902_v15 = vadd.f32 %v6909_v43, %v2873_v2  ;;  %v2364_v40 = vadd.f32 %v2356_v1, %v2336_v33  ;;  %v5987_v17 = vmul.f32 %v5917_v11, %v6910_v16  ;;  %v6911_v41 = vld [vmem:[#allocation39_spill] sm:$0xff]  ;;  %v2483_v2 = vld [vmem:[#allocation3 + $0x1f5] sm:$0xff] }
 0x677   : > { %v5991_v35 = vmul.f32 %v5929_v30, %v6910_v16  ;;  %v2439_v56 = vmul.f32 %v6911_v41, %v2427_v50  ;;  %v2440_v60 = vmul.f32 %v6911_v41, %v2428_v38  ;;  %v6912_v5 = vld [vmem:[#allocation75_spill] sm:$0xff]  ;;  %v2391_v54 = vadd.f32 %v2383_v39, %v2363_v45  ;;  %v6913_v33 = vld [vmem:[#allocation61_spill] sm:$0xff] }
 0x678   : > { %v2930_v58 = vadd.f32 %v6912_v5, %v2901_v62  ;;  %v2931_v20 = vadd.f32 %v5875_v48, %v2902_v15  ;;  %v2392_v1 = vadd.f32 %v2384_v10, %v2364_v40  ;;  %v2484_v6 = vld [vmem:[#allocation3 + $0x21d] sm:$0xff]  ;;  %v5999_v43 = vmul.f32 %v5929_v30, %v6913_v33  ;;  %v6917_v45 = vld [vmem:[#allocation53_spill] sm:$0xff] }
 0x679   : > { %v6914_v11 = vld [vmem:[#allocation51_spill] sm:$0xff]  ;;  %v2467_v50 = vmul.f32 %v6916_v18, %v2455_v42  ;;  %v2468_v38 = vmul.f32 %v6916_v18, %v2456_v21  ;;  %v2419_v39 = vadd.f32 %v2411_v22, %v2391_v54  ;;  %v2511_v62 = vld [vmem:[#allocation3 + $0x1f6] sm:$0xff]  ;;  %v6011_v40 = vrot.slane %v5907_v9, %v6917_v45 }
 0x67a   : > { %v6003_v16 = vrot.slane %v5907_v9, %v6914_v11  ;;  %v2950_v5 = vadd.f32 %v5879_v53, %v2930_v58  ;;  %v2951_v48 = vadd.f32 %v5887_v29, %v2931_v20  ;;  %v2420_v10 = vadd.f32 %v2412_v44, %v2392_v1  ;;  %v2512_v15 = vld [vmem:[#allocation3 + $0x21e] sm:$0xff]  ;;  %v6920_v30 = vld [vmem:[#allocation41_spill] sm:$0xff] }
 0x67b   : > { %6918 = vst [vmem:[#allocation70_spill] sm:$0xff] %v6011_v40  ;;  %v6015_v11 = vrot.slane %v5907_v9, %v6848_v25  ;;  %v2495_v42 = vmul.f32 %v6920_v30, %v2483_v2  ;;  %v2496_v21 = vmul.f32 %v6920_v30, %v2484_v6  ;;  %v2447_v22 = vadd.f32 %v2439_v56, %v2419_v39  ;;  %v2539_v58 = vld [vmem:[#allocation3 + $0x1f7] sm:$0xff]  ;;  %v2540_v20 = vld [vmem:[#allocation3 + $0x21f] sm:$0xff] }
 0x67c   : > { %6915 = vst [vmem:[#allocation57_spill] sm:$0xff] %v6003_v16  ;;  %v2979_v53 = vadd.f32 %v5925_v61, %v2950_v5  ;;  %v2980_v29 = vadd.f32 %v5937_v13, %v2951_v48  ;;  %v2448_v44 = vadd.f32 %v2440_v60, %v2420_v10  ;;  %v3145_v54 = vmul.f32 %v6003_v16, %v6913_v33  ;;  %v6922_v25 = vld [vmem:[#allocation42_spill] sm:$0xff]  ;;  %v6031_v13 = vld [vmem:[#allocation3 + $0x2e0] sm:$0xff] }
 0x67d   : > { %6919 = vst [vmem:[#allocation71_spill] sm:$0xff] %v6015_v11  ;;  %v6025_v1 = vrot.slane %v5907_v9, %v6849_v12  ;;  %v2523_v45 = vmul.f32 %v6922_v25, %v2511_v62  ;;  %v2524_v2 = vmul.f32 %v6922_v25, %v2512_v15  ;;  %6923 = vst [vmem:[#allocation74_spill] sm:$0xff] %v6031_v13  ;;  %v2567_v5 = vld [vmem:[#allocation3 + $0x1f8] sm:$0xff]  ;;  %v2568_v48 = vld [vmem:[#allocation3 + $0x220] sm:$0xff] }
 0x67e   : > { %v3008_v6 = vadd.f32 %v5941_v57, %v2979_v53  ;;  %v3009_v61 = vadd.f32 %v5949_v4, %v2980_v29  ;;  %v2475_v56 = vadd.f32 %v2467_v50, %v2447_v22  ;;  %v2476_v60 = vadd.f32 %v2468_v38, %v2448_v44  ;;  %v6924_v9 = vld [vmem:[#allocation43_spill] sm:$0xff]  ;;  %v6041_v62 = vld [vmem:[#allocation3 + $0x308] sm:$0xff] }
 0x67f   : > { %6921 = vst [vmem:[#allocation73_spill] sm:$0xff] %v6025_v1  ;;  %v3146_v33 = vmul.f32 %v6003_v16, %v6031_v13  ;;  %v3174_v12 = vmul.f32 %v6011_v40, %v6031_v13  ;;  %v2551_v39 = vmul.f32 %v6924_v9, %v2539_v58  ;;  %v2552_v10 = vmul.f32 %v6924_v9, %v2540_v20  ;;  %v2595_v15 = vld [vmem:[#allocation3 + $0x1f9] sm:$0xff]  ;;  %v2596_v53 = vld [vmem:[#allocation3 + $0x221] sm:$0xff] }
 0x680   : > { %v3037_v57 = vadd.f32 %v5953_v23, %v3008_v6  ;;  %v3038_v4 = vadd.f32 %v5963_v46, %v3009_v61  ;;  %6925 = vst [vmem:[#allocation67_spill] sm:$0xff] %v6041_v62  ;;  %v2503_v50 = vadd.f32 %v2495_v42, %v2475_v56  ;;  %v2504_v38 = vadd.f32 %v2496_v21, %v2476_v60  ;;  %v6926_v44 = vld [vmem:[#allocation44_spill] sm:$0xff]  ;;  %v6051_v6 = vld [vmem:[#allocation3 + $0x330] sm:$0xff]  ;;  %v2623_v61 = vld [vmem:[#allocation3 + $0x1fa] sm:$0xff] }
 0x681   : > { %v3175_v29 = vmul.f32 %v6011_v40, %v6041_v62  ;;  %v3203_v22 = vmul.f32 %v6015_v11, %v6041_v62  ;;  %v2579_v58 = vmul.f32 %v6926_v44, %v2567_v5  ;;  %v2580_v20 = vmul.f32 %v6926_v44, %v2568_v48  ;;  %6927 = vst [vmem:[#allocation75_spill] sm:$0xff] %v6051_v6  ;;  %v2624_v56 = vld [vmem:[#allocation3 + $0x222] sm:$0xff]  ;;  %v6928_v9 = vld [vmem:[#allocation46_spill] sm:$0xff] }
 0x682   : > { %v3066_v23 = vadd.f32 %v5967_v37, %v3037_v57  ;;  %v3067_v46 = vadd.f32 %v5975_v63, %v3038_v4  ;;  %v2531_v42 = vadd.f32 %v2523_v45, %v2503_v50  ;;  %v2532_v21 = vadd.f32 %v2524_v2, %v2504_v38  ;;  %v6061_v57 = vld [vmem:[#allocation3 + $0x358] sm:$0xff]  ;;  %v6930_v50 = vld [vmem:[#allocation49_spill] sm:$0xff]  ;;  %v6931_v44 = vld [vmem:[#allocation59_spill] sm:$0xff] }
 0x683   : > { %v3204_v60 = vmul.f32 %v6015_v11, %v6051_v6  ;;  %v3232_v40 = vmul.f32 %v6025_v1, %v6051_v6  ;;  %v2607_v5 = vmul.f32 %v6928_v9, %v2595_v15  ;;  %v2608_v48 = vmul.f32 %v6928_v9, %v2596_v53  ;;  %6929 = vst [vmem:[#allocation61_spill] sm:$0xff] %v6061_v57  ;;  %v6932_v6 = vld [vmem:[#allocation60_spill] sm:$0xff]  ;;  %v2149_v13 = vld [vmem:[#allocation3 + $0x239] sm:$0xff] }
 0x684   : > { %v3095_v37 = vadd.f32 %v5979_v55, %v3066_v23  ;;  %v3096_v63 = vadd.f32 %v5987_v17, %v3067_v46  ;;  %v2559_v45 = vadd.f32 %v2551_v39, %v2531_v42  ;;  %v2560_v2 = vadd.f32 %v2552_v10, %v2532_v21  ;;  %v6933_v46 = vld [vmem:[#allocation58_spill] sm:$0xff]  ;;  %v6934_v10 = vld [vmem:[#allocation56_spill] sm:$0xff]  ;;  %v6935_v21 = vld [vmem:[#allocation63_spill] sm:$0xff] }
 0x685   : > { %v3233_v4 = vmul.f32 %v6025_v1, %v6061_v57  ;;  %v2635_v38 = vmul.f32 %v6930_v50, %v2623_v61  ;;  %v2636_v11 = vmul.f32 %v6930_v50, %v2624_v56  ;;  %v2663_v15 = vmul.f32 %v6932_v6, %v6931_v44  ;;  %v6936_v1 = vld [vmem:[#allocation62_spill] sm:$0xff] }
 0x686   : > { %v3124_v53 = vadd.f32 %v5991_v35, %v3095_v37  ;;  %v3125_v55 = vadd.f32 %v5999_v43, %v3096_v63  ;;  %v2587_v23 = vadd.f32 %v2579_v58, %v2559_v45  ;;  %v2588_v17 = vadd.f32 %v2580_v20, %v2560_v2  ;;  %v2058_v50 = vld [vmem:[#allocation3 + $0x236] sm:$0xff]  ;;  %v2059_v43 = vld [vmem:[#allocation3 + $0x25e] sm:$0xff] }
 0x687   : > { %v2664_v39 = vmul.f32 %v6933_v46, %v6931_v44  ;;  %v2692_v42 = vmul.f32 %v6933_v46, %v6934_v10  ;;  %v2693_v61 = vmul.f32 %v6935_v21, %v6934_v10  ;;  %v2721_v56 = vmul.f32 %v6935_v21, %v6936_v1  ;;  %v2093_v58 = vld [vmem:[#allocation3 + $0x237] sm:$0xff]  ;;  %v2094_v20 = vld [vmem:[#allocation3 + $0x25f] sm:$0xff] }
 0x688   : > { %v3153_v6 = vadd.f32 %v3145_v54, %v3124_v53  ;;  %v3154_v9 = vadd.f32 %v3146_v33, %v3125_v55  ;;  %v2615_v35 = vadd.f32 %v2607_v5, %v2587_v23  ;;  %v2616_v37 = vadd.f32 %v2608_v48, %v2588_v17  ;;  %v6937_v63 = vld [vmem:[#allocation66_spill] sm:$0xff]  ;;  %v6939_v44 = vld [vmem:[#allocation47_spill] sm:$0xff]  ;;  %v6941_v55 = vld [vmem:[#allocation52_spill] sm:$0xff] }
 0x689   : > { %v2722_v45 = vmul.f32 %v6937_v63, %v6936_v1  ;;  %v6938_v2 = vld [vmem:[#allocation50_spill] sm:$0xff]  ;;  %v2122_v53 = vld [vmem:[#allocation3 + $0x260] sm:$0xff]  ;;  %v2070_v23 = vmul.f32 %v6941_v55, %v2058_v50  ;;  %v2071_v17 = vmul.f32 %v6941_v55, %v2059_v43  ;;  %v2105_v1 = vmul.f32 %v5542_v27, %v2093_v58 }
 0x68a   : > { %v2750_v46 = vmul.f32 %v6937_v63, %v6938_v2  ;;  %v2751_v10 = vmul.f32 %v6939_v44, %v6938_v2  ;;  %v6940_v57 = vld [vmem:[#allocation54_spill] sm:$0xff]  ;;  %v3182_v16 = vadd.f32 %v3174_v12, %v3153_v6  ;;  %v3183_v54 = vadd.f32 %v3175_v29, %v3154_v9  ;;  %v2178_v43 = vld [vmem:[#allocation3 + $0x262] sm:$0xff] }
 0x68b   : > { %v2779_v21 = vmul.f32 %v6939_v44, %v6940_v57  ;;  %v2643_v33 = vadd.f32 %v2635_v38, %v2615_v35  ;;  %v2644_v5 = vadd.f32 %v2636_v11, %v2616_v37  ;;  %v2121_v48 = vld [vmem:[#allocation3 + $0x238] sm:$0xff]  ;;  %v2106_v63 = vmul.f32 %v5542_v27, %v2094_v20  ;;  %v2150_v44 = vld [vmem:[#allocation3 + $0x261] sm:$0xff] }
 0x68c   : > { %v3211_v25 = vadd.f32 %v3203_v22, %v3182_v16  ;;  %v3212_v62 = vadd.f32 %v3204_v60, %v3183_v54  ;;  %v2085_v12 = vadd.f32 %v5597_v0, %v2070_v23  ;;  %v2086_v11 = vadd.f32 %v5597_v0, %v2071_v17  ;;  %v2177_v37 = vld [vmem:[#allocation3 + $0x23a] sm:$0xff]  ;;  %v6942_v0 = vld [vmem:[#allocation37_spill] sm:$0xff] }
 0x68d   : > { %v2671_v2 = vadd.f32 %v2663_v15, %v2643_v33  ;;  %v2672_v30 = vadd.f32 %v2664_v39, %v2644_v5  ;;  %v2133_v9 = vmul.f32 %v5546_v47, %v2121_v48  ;;  %v2134_v29 = vmul.f32 %v5546_v47, %v2122_v53  ;;  %v2205_v33 = vld [vmem:[#allocation3 + $0x23b] sm:$0xff]  ;;  %v2206_v5 = vld [vmem:[#allocation3 + $0x263] sm:$0xff] }
 0x68e   : > { %v3240_v50 = vadd.f32 %v3232_v40, %v3211_v25  ;;  %v3241_v38 = vadd.f32 %v3233_v4, %v3212_v62  ;;  %v2113_v16 = vadd.f32 %v2105_v1, %v2085_v12  ;;  %v2114_v22 = vadd.f32 %v2106_v63, %v2086_v11  ;;  %v2234_v63 = vld [vmem:[#allocation3 + $0x264] sm:$0xff] }
 0x68f   : > { %v2700_v6 = vadd.f32 %v2692_v42, %v2671_v2  ;;  %v2701_v35 = vadd.f32 %v2693_v61, %v2672_v30  ;;  %v2161_v60 = vmul.f32 %v5620_v36, %v2149_v13  ;;  %v2162_v15 = vmul.f32 %v5620_v36, %v2150_v44  ;;  %v6943_v13 = vld [vmem:[#allocation38_spill] sm:$0xff]  ;;  %v6944_v42 = vld [vmem:[#allocation69_spill] sm:$0xff]  ;;  %v6945_v12 = vld [vmem:[#allocation64_spill] sm:$0xff] }
 0x690   : > { %v3248_v39 = vpack.c.bf16 %v3241_v38, %v3240_v50  ;;  %v2780_v54 = vmul.f32 %v6942_v0, %v6940_v57  ;;  %v2141_v40 = vadd.f32 %v2133_v9, %v2113_v16  ;;  %v2142_v25 = vadd.f32 %v2134_v29, %v2114_v22  ;;  %v2261_v9 = vld [vmem:[#allocation3 + $0x23d] sm:$0xff]  ;;  %v2262_v29 = vld [vmem:[#allocation3 + $0x265] sm:$0xff]  ;;  %v6947_v16 = vld [vmem:[#allocation65_spill] sm:$0xff] }
 0x691   : > { %v2729_v58 = vadd.f32 %v2721_v56, %v2700_v6  ;;  %v2730_v20 = vadd.f32 %v2722_v45, %v2701_v35  ;;  %v2189_v30 = vmul.f32 %v5624_v32, %v2177_v37  ;;  %v2190_v62 = vmul.f32 %v5624_v32, %v2178_v43  ;;  %v2233_v56 = vld [vmem:[#allocation3 + $0x23c] sm:$0xff] }
 0x692   : > { %3809 = vmatprep.mubr.bf16.mxu1 %v3248_v39  ;;  %v2808_v44 = vmul.f32 %v6942_v0, %v6943_v13  ;;  %v2809_v61 = vmul.f32 %v6944_v42, %v6943_v13  ;;  %v2169_v45 = vadd.f32 %v2161_v60, %v2141_v40  ;;  %v2170_v2 = vadd.f32 %v2162_v15, %v2142_v25  ;;  %v2289_v60 = vld [vmem:[#allocation3 + $0x23e] sm:$0xff]  ;;  %v2290_v15 = vld [vmem:[#allocation3 + $0x266] sm:$0xff] }
 0x693   : > { %v2758_v1 = vadd.f32 %v2750_v46, %v2729_v58  ;;  %v2759_v4 = vadd.f32 %v2751_v10, %v2730_v20  ;;  %v2217_v48 = vmul.f32 %v5637_v52, %v2205_v33  ;;  %v2218_v53 = vmul.f32 %v5637_v52, %v2206_v5  ;;  %v6946_v10 = vld [vmem:[#allocation72_spill] sm:$0xff] }
 0x694   : > { %v2837_v46 = vmul.f32 %v6944_v42, %v6945_v12  ;;  %v2838_v11 = vmul.f32 %v6946_v10, %v6945_v12  ;;  %v2197_v50 = vadd.f32 %v2189_v30, %v2169_v45  ;;  %v2198_v38 = vadd.f32 %v2190_v62, %v2170_v2  ;;  %v6948_v40 = vld [vmem:[#allocation68_spill] sm:$0xff]  ;;  %v2317_v62 = vld [vmem:[#allocation3 + $0x23f] sm:$0xff] }
 0x695   : > { %v2787_v23 = vadd.f32 %v2779_v21, %v2758_v1  ;;  %v2788_v17 = vadd.f32 %v2780_v54, %v2759_v4  ;;  %v2245_v6 = vmul.f32 %v5644_v3, %v2233_v56  ;;  %v2246_v35 = vmul.f32 %v5644_v3, %v2234_v63  ;;  %v2318_v1 = vld [vmem:[#allocation3 + $0x267] sm:$0xff] }
 0x696   : > { %v2866_v21 = vmul.f32 %v6946_v10, %v6947_v16  ;;  %v2867_v22 = vmul.f32 %v6947_v16, %v5578_v14  ;;  %v2225_v39 = vadd.f32 %v2217_v48, %v2197_v50  ;;  %v2226_v58 = vadd.f32 %v2218_v53, %v2198_v38  ;;  %v6131_v53 = vld [vmem:[#allocation3 + $0x268] sm:$0xff] }
 0x697   : > { %v2816_v37 = vadd.f32 %v2808_v44, %v2787_v23  ;;  %v2817_v43 = vadd.f32 %v2809_v61, %v2788_v17  ;;  %v2273_v20 = vmul.f32 %v5649_v31, %v2261_v9  ;;  %v2274_v54 = vmul.f32 %v5649_v31, %v2262_v29  ;;  %v2373_v38 = vld [vmem:[#allocation3 + $0x241] sm:$0xff] }
 0x698   : > { %v2895_v25 = vmul.f32 %v6948_v40, %v5578_v14  ;;  %v2896_v30 = vmul.f32 %v6948_v40, %v5580_v34  ;;  %v2253_v4 = vadd.f32 %v2245_v6, %v2225_v39  ;;  %v2254_v44 = vadd.f32 %v2246_v35, %v2226_v58  ;;  %v6129_v14 = vld [vmem:[#allocation3 + $0x240] sm:$0xff]  ;;  %v2374_v6 = vld [vmem:[#allocation3 + $0x269] sm:$0xff] }
 0x699   : > { %v2845_v33 = vadd.f32 %v2837_v46, %v2816_v37  ;;  %v2846_v5 = vadd.f32 %v2838_v11, %v2817_v43  ;;  %v2301_v61 = vmul.f32 %v5654_v28, %v2289_v60  ;;  %v2302_v56 = vmul.f32 %v5654_v28, %v2290_v15  ;;  %v2401_v39 = vld [vmem:[#allocation3 + $0x242] sm:$0xff]  ;;  %v2402_v58 = vld [vmem:[#allocation3 + $0x26a] sm:$0xff] }
 0x69a   : > { %v2924_v2 = vmul.f32 %v5814_v8, %v5580_v34  ;;  %v2925_v48 = vmul.f32 %v5814_v8, %v5582_v49  ;;  %v2281_v23 = vadd.f32 %v2273_v20, %v2253_v4  ;;  %v2282_v17 = vadd.f32 %v2274_v54, %v2254_v44  ;;  %v6951_v44 = vld [vmem:[#allocation45_spill] sm:$0xff] }
 0x69b   : > { %v2874_v63 = vadd.f32 %v2866_v21, %v2845_v33  ;;  %v2875_v45 = vadd.f32 %v2867_v22, %v2846_v5  ;;  %v2329_v46 = vmul.f32 %v5659_v19, %v2317_v62  ;;  %v2330_v11 = vmul.f32 %v5659_v19, %v2318_v1  ;;  %v6949_v33 = vld [vmem:[#allocation48_spill] sm:$0xff] }
 0x69c   : > { %v2944_v50 = vmul.f32 %v5818_v26, %v5582_v49  ;;  %v2945_v34 = vmul.f32 %v5818_v26, %v5584_v59  ;;  %v2309_v35 = vadd.f32 %v2301_v61, %v2281_v23  ;;  %v2310_v37 = vadd.f32 %v2302_v56, %v2282_v17  ;;  %v6950_v1 = vld [vmem:[#allocation76_spill] sm:$0xff] }
 0x69d   : > { %v2903_v9 = vadd.f32 %v2895_v25, %v2874_v63  ;;  %v2904_v29 = vadd.f32 %v2896_v30, %v2875_v45  ;;  %v2357_v43 = vmul.f32 %v5664_v24, %v6129_v14  ;;  %v2358_v21 = vmul.f32 %v5664_v24, %v6131_v53  ;;  %v2430_v56 = vld [vmem:[#allocation3 + $0x26b] sm:$0xff] }
 0x69e   : > { %v2973_v15 = vmul.f32 %v5891_v7, %v5584_v59  ;;  %v2974_v49 = vmul.f32 %v5891_v7, %v6902_v51  ;;  %v2337_v20 = vadd.f32 %v2329_v46, %v2309_v35  ;;  %v2338_v54 = vadd.f32 %v2330_v11, %v2310_v37  ;;  %v2429_v59 = vld [vmem:[#allocation3 + $0x243] sm:$0xff]  ;;  %v6159_v35 = vld [vmem:[#allocation3 + $0x2b8] sm:$0xff] }
 0x69f   : > { %v2932_v22 = vadd.f32 %v2924_v2, %v2903_v9  ;;  %v2933_v60 = vadd.f32 %v2925_v48, %v2904_v29  ;;  %v2385_v5 = vmul.f32 %v6949_v33, %v2373_v38  ;;  %v2386_v25 = vmul.f32 %v6949_v33, %v2374_v6  ;;  %v6952_v2 = vld [vmem:[#allocation55_spill] sm:$0xff]  ;;  %v4070_v11 = vld [vmem:[#allocation3 + $0x268] sm:$0xff]  ;;  %v6953_v9 = vld [vmem:[#allocation77_spill] sm:$0xff] }
 0x6a0   : > { %v3002_v4 = vmul.f32 %v6950_v1, %v6902_v51  ;;  %v3003_v61 = vmul.f32 %v6950_v1, %v6951_v44  ;;  %v2365_v63 = vadd.f32 %v2357_v43, %v2337_v20  ;;  %v2366_v45 = vadd.f32 %v2358_v21, %v2338_v54  ;;  %v2457_v51 = vld [vmem:[#allocation3 + $0x244] sm:$0xff]  ;;  %v2458_v38 = vld [vmem:[#allocation3 + $0x26c] sm:$0xff] }
 0x6a1   : > { %v2952_v30 = vadd.f32 %v2944_v50, %v2932_v22  ;;  %v2953_v62 = vadd.f32 %v2945_v34, %v2933_v60  ;;  %v2413_v48 = vmul.f32 %v6952_v2, %v2401_v39  ;;  %v2414_v23 = vmul.f32 %v6952_v2, %v2402_v58  ;;  %v4071_v50 = vld [vmem:[#allocation3 + $0x290] sm:$0xff]  ;;  %v2485_v20 = vld [vmem:[#allocation3 + $0x245] sm:$0xff] }
 0x6a2   : > { %v3031_v29 = vmul.f32 %v4070_v11, %v6953_v9  ;;  %v3032_v34 = vmul.f32 %v4071_v50, %v6953_v9  ;;  %v6157_v6 = vld [vmem:[#allocation3 + $0x290] sm:$0xff]  ;;  %v2393_v37 = vadd.f32 %v2385_v5, %v2365_v63  ;;  %v2394_v43 = vadd.f32 %v2386_v25, %v2366_v45  ;;  %v2513_v45 = vld [vmem:[#allocation3 + $0x246] sm:$0xff] }
 0x6a3   : > { %v2981_v17 = vadd.f32 %v2973_v15, %v2952_v30  ;;  %v2982_v46 = vadd.f32 %v2974_v49, %v2953_v62  ;;  %v2441_v21 = vmul.f32 %v6911_v41, %v2429_v59  ;;  %v2442_v22 = vmul.f32 %v6911_v41, %v2430_v56  ;;  %v6954_v49 = vld [vmem:[#allocation78_spill] sm:$0xff]  ;;  %v2486_v54 = vld [vmem:[#allocation3 + $0x26d] sm:$0xff]  ;;  %v6955_v56 = vld [vmem:[#allocation79_spill] sm:$0xff] }
 0x6a4   : > { %v3060_v39 = vmul.f32 %v6954_v49, %v6157_v6  ;;  %v3061_v58 = vmul.f32 %v6954_v49, %v6159_v35  ;;  %v2421_v30 = vadd.f32 %v2413_v48, %v2393_v37  ;;  %v2422_v62 = vadd.f32 %v2414_v23, %v2394_v43  ;;  %v6957_v50 = vld [vmem:[#allocation41_spill] sm:$0xff]  ;;  %v6958_v37 = vld [vmem:[#allocation80_spill] sm:$0xff] }
 0x6a5   : > { %v3010_v60 = vadd.f32 %v3002_v4, %v2981_v17  ;;  %v3011_v15 = vadd.f32 %v3003_v61, %v2982_v46  ;;  %v2469_v44 = vmul.f32 %v6916_v18, %v2457_v51  ;;  %v2470_v5 = vmul.f32 %v6916_v18, %v2458_v38  ;;  %v6956_v61 = vld [vmem:[#allocation74_spill] sm:$0xff]  ;;  %v2514_v17 = vld [vmem:[#allocation3 + $0x26e] sm:$0xff] }
 0x6a6   : > { %v3089_v4 = vmul.f32 %v6955_v56, %v6159_v35  ;;  %v3090_v63 = vmul.f32 %v6956_v61, %v6955_v56  ;;  %v2449_v46 = vadd.f32 %v2441_v21, %v2421_v30  ;;  %v2450_v11 = vadd.f32 %v2442_v22, %v2422_v62  ;;  %v2541_v43 = vld [vmem:[#allocation3 + $0x247] sm:$0xff]  ;;  %v6960_v18 = vld [vmem:[#allocation42_spill] sm:$0xff]  ;;  %v6961_v30 = vld [vmem:[#allocation57_spill] sm:$0xff] }
 0x6a7   : > { %v3039_v25 = vadd.f32 %v3031_v29, %v3010_v60  ;;  %v3040_v59 = vadd.f32 %v3032_v34, %v3011_v15  ;;  %v2497_v49 = vmul.f32 %v6957_v50, %v2485_v20  ;;  %v2498_v48 = vmul.f32 %v6957_v50, %v2486_v54  ;;  %v6959_v34 = vld [vmem:[#allocation67_spill] sm:$0xff]  ;;  %v2542_v60 = vld [vmem:[#allocation3 + $0x26f] sm:$0xff] }
 0x6a8   : > { %v3118_v29 = vmul.f32 %v6956_v61, %v6958_v37  ;;  %v3119_v38 = vmul.f32 %v6959_v34, %v6958_v37  ;;  %v2477_v15 = vadd.f32 %v2469_v44, %v2449_v46  ;;  %v2478_v56 = vadd.f32 %v2470_v5, %v2450_v11  ;;  %v2569_v62 = vld [vmem:[#allocation3 + $0x248] sm:$0xff]  ;;  %v6963_v44 = vld [vmem:[#allocation43_spill] sm:$0xff]  ;;  %v6965_v11 = vld [vmem:[#allocation61_spill] sm:$0xff] }
 0x6a9   : > { %v3068_v23 = vadd.f32 %v3060_v39, %v3039_v25  ;;  %v3069_v51 = vadd.f32 %v3061_v58, %v3040_v59  ;;  %v2525_v41 = vmul.f32 %v6960_v18, %v2513_v45  ;;  %v2526_v21 = vmul.f32 %v6960_v18, %v2514_v17  ;;  %v6962_v58 = vld [vmem:[#allocation75_spill] sm:$0xff]  ;;  %v2570_v25 = vld [vmem:[#allocation3 + $0x270] sm:$0xff]  ;;  %v6193_v18 = vld [vmem:[#allocation3 + $0x3a8] sm:$0xff] }
 0x6aa   : > { %v3147_v39 = vmul.f32 %v6959_v34, %v6961_v30  ;;  %v3148_v54 = vmul.f32 %v6962_v58, %v6961_v30  ;;  %v6185_v59 = vld [vmem:[#allocation3 + $0x380] sm:$0xff]  ;;  %v2505_v37 = vadd.f32 %v2497_v49, %v2477_v15  ;;  %v2506_v50 = vadd.f32 %v2498_v48, %v2478_v56  ;;  %v2598_v30 = vld [vmem:[#allocation3 + $0x271] sm:$0xff]  ;;  %v6966_v49 = vld [vmem:[#allocation44_spill] sm:$0xff] }
 0x6ab   : > { %v3097_v22 = vadd.f32 %v3089_v4, %v3068_v23  ;;  %v3098_v20 = vadd.f32 %v3090_v63, %v3069_v51  ;;  %v2553_v5 = vmul.f32 %v6963_v44, %v2541_v43  ;;  %v2554_v45 = vmul.f32 %v6963_v44, %v2542_v60  ;;  %v6964_v4 = vld [vmem:[#allocation70_spill] sm:$0xff]  ;;  %v2597_v51 = vld [vmem:[#allocation3 + $0x249] sm:$0xff] }
 0x6ac   : > { %v3176_v63 = vmul.f32 %v6962_v58, %v6964_v4  ;;  %v3177_v23 = vmul.f32 %v6965_v11, %v6964_v4  ;;  %v2533_v34 = vadd.f32 %v2525_v41, %v2505_v37  ;;  %v2534_v61 = vadd.f32 %v2526_v21, %v2506_v50  ;;  %v6968_v58 = vld [vmem:[#allocation46_spill] sm:$0xff]  ;;  %v6969_v21 = vld [vmem:[#allocation73_spill] sm:$0xff] }
 0x6ad   : > { %v3126_v46 = vadd.f32 %v3118_v29, %v3097_v22  ;;  %v3127_v17 = vadd.f32 %v3119_v38, %v3098_v20  ;;  %v2581_v56 = vmul.f32 %v6966_v49, %v2569_v62  ;;  %v2582_v48 = vmul.f32 %v6966_v49, %v2570_v25  ;;  %v6967_v29 = vld [vmem:[#allocation71_spill] sm:$0xff]  ;;  %v2625_v22 = vld [vmem:[#allocation3 + $0x24a] sm:$0xff]  ;;  %v2626_v20 = vld [vmem:[#allocation3 + $0x272] sm:$0xff] }
 0x6ae   : > { %v3205_v38 = vmul.f32 %v6965_v11, %v6967_v29  ;;  %v3206_v15 = vmul.f32 %v6967_v29, %v6185_v59  ;;  %v2561_v4 = vadd.f32 %v2553_v5, %v2533_v34  ;;  %v2562_v44 = vadd.f32 %v2554_v45, %v2534_v61 }
 0x6af   : > { %v3155_v43 = vadd.f32 %v3147_v39, %v3126_v46  ;;  %v3156_v60 = vadd.f32 %v3148_v54, %v3127_v17  ;;  %v2609_v9 = vmul.f32 %v6968_v58, %v2597_v51  ;;  %v2610_v41 = vmul.f32 %v6968_v58, %v2598_v30  ;;  %v6970_v46 = vld [vmem:[#allocation49_spill] sm:$0xff]  ;;  %v6971_v51 = vld [vmem:[#allocation59_spill] sm:$0xff] }
 0x6b0   : > { %v3234_v39 = vmul.f32 %v6969_v21, %v6185_v59  ;;  %v3235_v54 = vmul.f32 %v6969_v21, %v6193_v18  ;;  %v2589_v62 = vadd.f32 %v2581_v56, %v2561_v4  ;;  %v2590_v25 = vadd.f32 %v2582_v48, %v2562_v44  ;;  %v6972_v30 = vld [vmem:[#allocation63_spill] sm:$0xff]  ;;  %v2061_v58 = vld [vmem:[#allocation3 + $0x2ae] sm:$0xff] }
 0x6b1   : > { %v3184_v50 = vadd.f32 %v3176_v63, %v3155_v43  ;;  %v3185_v37 = vadd.f32 %v3177_v23, %v3156_v60  ;;  %v2637_v17 = vmul.f32 %v6970_v46, %v2625_v22  ;;  %v2638_v29 = vmul.f32 %v6970_v46, %v2626_v20  ;;  %v6973_v23 = vld [vmem:[#allocation66_spill] sm:$0xff]  ;;  %v2060_v60 = vld [vmem:[#allocation3 + $0x286] sm:$0xff]  ;;  %v2096_v48 = vld [vmem:[#allocation3 + $0x2af] sm:$0xff] }
 0x6b2   : > { %v2617_v5 = vadd.f32 %v2609_v9, %v2589_v62  ;;  %v2618_v45 = vadd.f32 %v2610_v41, %v2590_v25  ;;  %v2665_v63 = vmul.f32 %v6972_v30, %v6971_v51  ;;  %v2666_v43 = vmul.f32 %v6973_v23, %v6971_v51  ;;  %v6974_v4 = vld [vmem:[#allocation56_spill] sm:$0xff]  ;;  %v6975_v9 = vld [vmem:[#allocation47_spill] sm:$0xff]  ;;  %v6976_v20 = vld [vmem:[#allocation62_spill] sm:$0xff] }
 0x6b3   : > { %v3213_v34 = vadd.f32 %v3205_v38, %v3184_v50  ;;  %v3214_v61 = vadd.f32 %v3206_v15, %v3185_v37  ;;  %v2694_v44 = vmul.f32 %v6973_v23, %v6974_v4  ;;  %v2095_v56 = vld [vmem:[#allocation3 + $0x287] sm:$0xff]  ;;  %v2695_v15 = vmul.f32 %v6975_v9, %v6974_v4  ;;  %v2124_v37 = vld [vmem:[#allocation3 + $0x2b0] sm:$0xff] }
 0x6b4   : > { %v2645_v22 = vadd.f32 %v2637_v17, %v2617_v5  ;;  %v2646_v38 = vadd.f32 %v2638_v29, %v2618_v45  ;;  %v2723_v41 = vmul.f32 %v6975_v9, %v6976_v20  ;;  %v2123_v50 = vld [vmem:[#allocation3 + $0x288] sm:$0xff]  ;;  %v2073_v25 = vmul.f32 %v6941_v55, %v2061_v58  ;;  %v2152_v45 = vld [vmem:[#allocation3 + $0x2b1] sm:$0xff] }
 0x6b5   : > { %v3242_v49 = vadd.f32 %v3234_v39, %v3213_v34  ;;  %v3243_v21 = vadd.f32 %v3235_v54, %v3214_v61  ;;  %v2724_v39 = vmul.f32 %v6942_v0, %v6976_v20  ;;  %v2072_v54 = vmul.f32 %v6941_v55, %v2060_v60  ;;  %v2151_v5 = vld [vmem:[#allocation3 + $0x289] sm:$0xff] }
 0x6b6   : > { %v2673_v34 = vadd.f32 %v2665_v63, %v2645_v22  ;;  %v2674_v61 = vadd.f32 %v2666_v43, %v2646_v38  ;;  %v2107_v29 = vmul.f32 %v5542_v27, %v2095_v56  ;;  %v2108_v17 = vmul.f32 %v5542_v27, %v2096_v48  ;;  %v6977_v63 = vld [vmem:[#allocation50_spill] sm:$0xff]  ;;  %v2179_v56 = vld [vmem:[#allocation3 + $0x28a] sm:$0xff] }
 0x6b7   : > { %v3249_v62 = vpack.c.bf16 %v3243_v21, %v3242_v49  ;;  %v4072_v49 = vld [vmem:[%s6520_s11] ss:$0 sm:$0xff]  ;;  %v2135_v23 = vmul.f32 %v5546_v47, %v2123_v50  ;;  %v2136_v60 = vmul.f32 %v5546_v47, %v2124_v37  ;;  %v2752_v43 = vmul.f32 %v6942_v0, %v6977_v63  ;;  %v2180_v48 = vld [vmem:[#allocation3 + $0x2b2] sm:$0xff]  ;;  %v6978_v22 = vld [vmem:[#allocation28_spill] sm:$0xff] }
 0x6b8   : > { %v2087_v21 = vadd.f32 %v4072_v49, %v2072_v54  ;;  %v2088_v30 = vadd.f32 %v4072_v49, %v2073_v25  ;;  %v2702_v55 = vadd.f32 %v2694_v44, %v2673_v34  ;;  %v2703_v58 = vadd.f32 %v2695_v15, %v2674_v61  ;;  %v6979_v54 = vld [vmem:[#allocation29_spill] sm:$0xff]  ;;  %v6242_v34 = vld [vmem:[#allocation3 + $0x1a0] sm:$0xff] }
 0x6b9   : > { %3810 = vmatmul.mubr.bf16.vlgmr.msra.gmra.mrb[4].mxu1 %v3249_v62  ;;  %v2753_v27 = vmul.f32 %v6944_v42, %v6977_v63  ;;  %v2163_v62 = vmul.f32 %v5620_v36, %v2151_v5  ;;  %v2164_v50 = vmul.f32 %v5620_v36, %v2152_v45  ;;  %v2781_v0 = vmul.f32 %v6944_v42, %v6940_v57  ;;  %v2207_v37 = vld [vmem:[#allocation3 + $0x28b] sm:$0xff]  ;;  %v2208_v25 = vld [vmem:[#allocation3 + $0x2b3] sm:$0xff] }
 0x6ba   : > { %3885 = vmatpush3.bf16.msra.mxu1 %v6978_v22  ;;  %v2115_v38 = vadd.f32 %v2107_v29, %v2087_v21  ;;  %v2116_v9 = vadd.f32 %v2108_v17, %v2088_v30  ;;  %v2731_v47 = vadd.f32 %v2723_v41, %v2702_v55  ;;  %v2732_v44 = vadd.f32 %v2724_v39, %v2703_v58  ;;  %v2235_v39 = vld [vmem:[#allocation3 + $0x28c] sm:$0xff]  ;;  %v2236_v49 = vld [vmem:[#allocation3 + $0x2b4] sm:$0xff] }
 0x6bb   : > { %3878 = vmatprep.subr.bf16.mxu1 %v6979_v54  ;;  %v2782_v15 = vmul.f32 %v6946_v10, %v6940_v57  ;;  %v2191_v17 = vmul.f32 %v5624_v32, %v2179_v56  ;;  %v2192_v36 = vmul.f32 %v5624_v32, %v2180_v48  ;;  %v2810_v41 = vmul.f32 %v6946_v10, %v6943_v13  ;;  %v6251_v21 = vld [vmem:[#allocation3 + $0x1c8] sm:$0xff]  ;;  %v6980_v55 = vld [vmem:[#allocation30_spill] sm:$0xff]  ;;  %v6260_v22 = vld [vmem:[#allocation3 + $0x1f0] sm:$0xff] }
 0x6bc   : > { %v2143_v61 = vadd.f32 %v2135_v23, %v2115_v38  ;;  %v2144_v29 = vadd.f32 %v2136_v60, %v2116_v9  ;;  %v2760_v5 = vadd.f32 %v2752_v43, %v2731_v47  ;;  %v2761_v45 = vadd.f32 %v2753_v27, %v2732_v44  ;;  %v2263_v56 = vld [vmem:[#allocation3 + $0x28d] sm:$0xff]  ;;  %v2264_v48 = vld [vmem:[#allocation3 + $0x2b5] sm:$0xff] }
 0x6bd   : > { %v2811_v42 = vmul.f32 %v6943_v13, %v6242_v34  ;;  %v2219_v60 = vmul.f32 %v5637_v52, %v2207_v37  ;;  %v2220_v32 = vmul.f32 %v5637_v52, %v2208_v25  ;;  %v2839_v10 = vmul.f32 %v6945_v12, %v6242_v34  ;;  %v6269_v37 = vld [vmem:[#allocation3 + $0x218] sm:$0xff] }
 0x6be   : > { %3886 = vmatpush3.bf16.msra.mxu1 %v6979_v54  ;;  %v2171_v30 = vadd.f32 %v2163_v62, %v2143_v61  ;;  %v2172_v23 = vadd.f32 %v2164_v50, %v2144_v29  ;;  %v2789_v58 = vadd.f32 %v2781_v0, %v2760_v5  ;;  %v2790_v43 = vadd.f32 %v2782_v15, %v2761_v45  ;;  %v2291_v0 = vld [vmem:[#allocation3 + $0x28e] sm:$0xff]  ;;  %v2292_v15 = vld [vmem:[#allocation3 + $0x2b6] sm:$0xff] }
 0x6bf   : > { %3879 = vmatprep.subr.bf16.mxu1 %v6980_v55  ;;  %v2840_v27 = vmul.f32 %v6945_v12, %v6251_v21  ;;  %v2247_v62 = vmul.f32 %v5644_v3, %v2235_v39  ;;  %v2248_v52 = vmul.f32 %v5644_v3, %v2236_v49  ;;  %v2868_v47 = vmul.f32 %v6947_v16, %v6251_v21  ;;  %v2320_v39 = vld [vmem:[#allocation3 + $0x2b7] sm:$0xff] }
 0x6c0   : > { %v2199_v38 = vadd.f32 %v2191_v17, %v2171_v30  ;;  %v2200_v9 = vadd.f32 %v2192_v36, %v2172_v23  ;;  %v2818_v50 = vadd.f32 %v2810_v41, %v2789_v58  ;;  %v2819_v54 = vadd.f32 %v2811_v42, %v2790_v43  ;;  %v6981_v17 = vld [vmem:[#allocation31_spill] sm:$0xff]  ;;  %v2319_v42 = vld [vmem:[#allocation3 + $0x28f] sm:$0xff] }
 0x6c1   : > { %v2869_v44 = vmul.f32 %v6947_v16, %v6260_v22  ;;  %v2275_v29 = vmul.f32 %v5649_v31, %v2263_v56  ;;  %v2276_v3 = vmul.f32 %v5649_v31, %v2264_v48  ;;  %v2897_v45 = vmul.f32 %v6948_v40, %v6260_v22  ;;  %v6982_v48 = vld [vmem:[#allocation32_spill] sm:$0xff] }
 0x6c2   : > { %3887 = vmatpush3.bf16.msra.mxu1 %v6980_v55  ;;  %v2227_v25 = vadd.f32 %v2219_v60, %v2199_v38  ;;  %v2228_v61 = vadd.f32 %v2220_v32, %v2200_v9  ;;  %v2847_v36 = vadd.f32 %v2839_v10, %v2818_v50  ;;  %v2848_v5 = vadd.f32 %v2840_v27, %v2819_v54  ;;  %v2376_v50 = vld [vmem:[#allocation3 + $0x2b9] sm:$0xff] }
 0x6c3   : > { %3880 = vmatprep.subr.bf16.mxu1 %v6981_v17  ;;  %v2898_v41 = vmul.f32 %v6948_v40, %v6269_v37  ;;  %v2303_v23 = vmul.f32 %v5654_v28, %v2291_v0  ;;  %v2304_v60 = vmul.f32 %v5654_v28, %v2292_v15  ;;  %v2926_v55 = vmul.f32 %v5814_v8, %v6269_v37 }
 0x6c4   : > { %v2255_v49 = vadd.f32 %v2247_v62, %v2227_v25  ;;  %v2256_v30 = vadd.f32 %v2248_v52, %v2228_v61  ;;  %v2876_v32 = vadd.f32 %v2868_v47, %v2847_v36  ;;  %v2877_v31 = vadd.f32 %v2869_v44, %v2848_v5  ;;  %v2375_v52 = vld [vmem:[#allocation3 + $0x291] sm:$0xff] }
 0x6c5   : > { %v2927_v58 = vmul.f32 %v5814_v8, %v6129_v14  ;;  %v2331_v27 = vmul.f32 %v5659_v19, %v2319_v42  ;;  %v2332_v56 = vmul.f32 %v5659_v19, %v2320_v39  ;;  %v2946_v9 = vmul.f32 %v5818_v26, %v6129_v14 }
 0x6c6   : > { %3888 = vmatpush3.bf16.msra.mxu1 %v6981_v17  ;;  %v2283_v43 = vadd.f32 %v2275_v29, %v2255_v49  ;;  %v2284_v10 = vadd.f32 %v2276_v3, %v2256_v30  ;;  %v2905_v38 = vadd.f32 %v2897_v45, %v2876_v32  ;;  %v2906_v28 = vadd.f32 %v2898_v41, %v2877_v31  ;;  %v2403_v29 = vld [vmem:[#allocation3 + $0x292] sm:$0xff]  ;;  %v2404_v3 = vld [vmem:[#allocation3 + $0x2ba] sm:$0xff] }
 0x6c7   : > { %3881 = vmatprep.subr.bf16.mxu1 %v6982_v48  ;;  %v2947_v62 = vmul.f32 %v5818_v26, %v6131_v53  ;;  %v2359_v44 = vmul.f32 %v6157_v6, %v5664_v24  ;;  %v2360_v19 = vmul.f32 %v6159_v35, %v5664_v24  ;;  %v2975_v25 = vmul.f32 %v5891_v7, %v6131_v53  ;;  %v6983_v41 = vld [vmem:[#allocation33_spill] sm:$0xff] }
 0x6c8   : > { %v2311_v54 = vadd.f32 %v2303_v23, %v2283_v43  ;;  %v2312_v47 = vadd.f32 %v2304_v60, %v2284_v10  ;;  %v2934_v0 = vadd.f32 %v2926_v55, %v2905_v38  ;;  %v2935_v15 = vadd.f32 %v2927_v58, %v2906_v28  ;;  %v2431_v30 = vld [vmem:[#allocation3 + $0x293] sm:$0xff]  ;;  %v2432_v23 = vld [vmem:[#allocation3 + $0x2bb] sm:$0xff] }
 0x6c9   : > { %v2976_v61 = vmul.f32 %v6157_v6, %v5891_v7  ;;  %v2387_v5 = vmul.f32 %v6949_v33, %v2375_v52  ;;  %v2388_v45 = vmul.f32 %v6949_v33, %v2376_v50  ;;  %v3004_v39 = vmul.f32 %v6157_v6, %v6950_v1  ;;  %v6984_v43 = vld [vmem:[#allocation77_spill] sm:$0xff]  ;;  %v2460_v38 = vld [vmem:[#allocation3 + $0x2bc] sm:$0xff] }
 0x6ca   : > { %3889 = vmatpush3.bf16.msra.mxu1 %v6982_v48  ;;  %v2339_v17 = vadd.f32 %v2331_v27, %v2311_v54  ;;  %v2340_v36 = vadd.f32 %v2332_v56, %v2312_v47  ;;  %v2954_v24 = vadd.f32 %v2946_v9, %v2934_v0  ;;  %v2955_v42 = vadd.f32 %v2947_v62, %v2935_v15  ;;  %v6985_v27 = vld [vmem:[#allocation74_spill] sm:$0xff]  ;;  %v6986_v62 = vld [vmem:[#allocation39_spill] sm:$0xff] }
 0x6cb   : > { %3882 = vmatprep.subr.bf16.mxu1 %v6983_v41  ;;  %v3005_v49 = vmul.f32 %v6159_v35, %v6950_v1  ;;  %v2415_v31 = vmul.f32 %v6952_v2, %v2403_v29  ;;  %v2416_v55 = vmul.f32 %v6952_v2, %v2404_v3  ;;  %v3033_v10 = vmul.f32 %v6159_v35, %v6984_v43  ;;  %v2459_v48 = vld [vmem:[#allocation3 + $0x294] sm:$0xff]  ;;  %v6989_v0 = vld [vmem:[#allocation67_spill] sm:$0xff] }
 0x6cc   : > { %v2367_v60 = vadd.f32 %v2359_v44, %v2339_v17  ;;  %v2368_v32 = vadd.f32 %v2360_v19, %v2340_v36  ;;  %v2983_v58 = vadd.f32 %v2975_v25, %v2954_v24  ;;  %v2984_v33 = vadd.f32 %v2976_v61, %v2955_v42  ;;  %v6987_v54 = vld [vmem:[#allocation34_spill] sm:$0xff]  ;;  %v6990_v17 = vld [vmem:[#allocation40_spill] sm:$0xff]  ;;  %v6991_v24 = vld [vmem:[#allocation79_spill] sm:$0xff] }
 0x6cd   : > { %v3034_v56 = vmul.f32 %v6985_v27, %v6984_v43  ;;  %v2443_v52 = vmul.f32 %v6986_v62, %v2431_v30  ;;  %v2444_v50 = vmul.f32 %v6986_v62, %v2432_v23  ;;  %v6988_v44 = vld [vmem:[#allocation78_spill] sm:$0xff]  ;;  %v2471_v36 = vmul.f32 %v6990_v17, %v2459_v48 }
 0x6ce   : > { %3890 = vmatpush3.bf16.msra.mxu1 %v6983_v41  ;;  %v2395_v28 = vadd.f32 %v2387_v5, %v2367_v60  ;;  %v2396_v9 = vadd.f32 %v2388_v45, %v2368_v32  ;;  %v3012_v2 = vadd.f32 %v3004_v39, %v2983_v58  ;;  %v3013_v47 = vadd.f32 %v3005_v49, %v2984_v33  ;;  %v2487_v25 = vld [vmem:[#allocation3 + $0x295] sm:$0xff]  ;;  %v2488_v61 = vld [vmem:[#allocation3 + $0x2bd] sm:$0xff] }
 0x6cf   : > { %3883 = vmatprep.subr.bf16.mxu1 %v6987_v54  ;;  %v3062_v19 = vmul.f32 %v6985_v27, %v6988_v44  ;;  %v3063_v15 = vmul.f32 %v6989_v0, %v6988_v44  ;;  %v2472_v5 = vmul.f32 %v6990_v17, %v2460_v38  ;;  %v3091_v42 = vmul.f32 %v6989_v0, %v6991_v24  ;;  %v6992_v39 = vld [vmem:[#allocation75_spill] sm:$0xff]  ;;  %v2515_v30 = vld [vmem:[#allocation3 + $0x296] sm:$0xff] }
 0x6d0   : > { %v2423_v29 = vadd.f32 %v2415_v31, %v2395_v28  ;;  %v2424_v3 = vadd.f32 %v2416_v55, %v2396_v9  ;;  %v3041_v45 = vadd.f32 %v3033_v10, %v3012_v2  ;;  %v3042_v41 = vadd.f32 %v3034_v56, %v3013_v47  ;;  %v2516_v23 = vld [vmem:[#allocation3 + $0x2be] sm:$0xff]  ;;  %v6993_v31 = vld [vmem:[#allocation41_spill] sm:$0xff]  ;;  %v6995_v56 = vld [vmem:[#allocation80_spill] sm:$0xff] }
 0x6d1   : > { %v3092_v49 = vmul.f32 %v6992_v39, %v6991_v24  ;;  %v2499_v55 = vmul.f32 %v6993_v31, %v2487_v25  ;;  %v2500_v58 = vmul.f32 %v6993_v31, %v2488_v61  ;;  %v6994_v33 = vld [vmem:[#allocation35_spill] sm:$0xff]  ;;  %v3120_v48 = vmul.f32 %v6992_v39, %v6995_v56  ;;  %v2543_v28 = vld [vmem:[#allocation3 + $0x297] sm:$0xff] }
 0x6d2   : > { %3891 = vmatpush3.bf16.msra.mxu1 %v6987_v54  ;;  %v2451_v60 = vadd.f32 %v2443_v52, %v2423_v29  ;;  %v2452_v32 = vadd.f32 %v2444_v50, %v2424_v3  ;;  %v3070_v10 = vadd.f32 %v3062_v19, %v3041_v45  ;;  %v3071_v27 = vadd.f32 %v3063_v15, %v3042_v41  ;;  %v2544_v9 = vld [vmem:[#allocation3 + $0x2bf] sm:$0xff]  ;;  %v6997_v25 = vld [vmem:[#allocation57_spill] sm:$0xff] }
 0x6d3   : > { %3884 = vmatprep.subr.bf16.mxu1 %v6994_v33  ;;  %v3121_v38 = vmul.f32 %v6965_v11, %v6995_v56  ;;  %v6996_v52 = vld [vmem:[#allocation42_spill] sm:$0xff]  ;;  %v3149_v19 = vmul.f32 %v6965_v11, %v6997_v25  ;;  %v3150_v15 = vmul.f32 %v6185_v59, %v6997_v25  ;;  %v2572_v29 = vld [vmem:[#allocation3 + $0x2c0] sm:$0xff] }
 0x6d4   : > { %v2479_v62 = vadd.f32 %v2471_v36, %v2451_v60  ;;  %v2480_v54 = vadd.f32 %v2472_v5, %v2452_v32  ;;  %v2527_v50 = vmul.f32 %v6996_v52, %v2515_v30  ;;  %v2528_v2 = vmul.f32 %v6996_v52, %v2516_v23  ;;  %v2571_v61 = vld [vmem:[#allocation3 + $0x298] sm:$0xff]  ;;  %v6998_v36 = vld [vmem:[#allocation43_spill] sm:$0xff]  ;;  %v6349_v60 = vld [vmem:[#allocation3 + $0x3d0] sm:$0xff] }
 0x6d5   : > { %v3099_v47 = vadd.f32 %v3091_v42, %v3070_v10  ;;  %v3100_v0 = vadd.f32 %v3092_v49, %v3071_v27  ;;  %v2555_v5 = vmul.f32 %v6998_v36, %v2543_v28  ;;  %v2556_v45 = vmul.f32 %v6998_v36, %v2544_v9  ;;  %v6999_v42 = vld [vmem:[#allocation70_spill] sm:$0xff]  ;;  %v2600_v23 = vld [vmem:[#allocation3 + $0x2c1] sm:$0xff] }
 0x6d6   : > { %3892 = vmatpush3.bf16.msra.mxu1 %v6994_v33  ;;  %v2507_v3 = vadd.f32 %v2499_v55, %v2479_v62  ;;  %v2508_v17 = vadd.f32 %v2500_v58, %v2480_v54  ;;  %v3178_v49 = vmul.f32 %v6185_v59, %v6999_v42  ;;  %v3179_v11 = vmul.f32 %v6193_v18, %v6999_v42  ;;  %v2599_v30 = vld [vmem:[#allocation3 + $0x299] sm:$0xff]  ;;  %v7000_v55 = vld [vmem:[#allocation44_spill] sm:$0xff] }
 0x6d7   : > { %v3128_v41 = vadd.f32 %v3120_v48, %v3099_v47  ;;  %v3129_v39 = vadd.f32 %v3121_v38, %v3100_v0  ;;  %v2583_v58 = vmul.f32 %v7000_v55, %v2571_v61  ;;  %v2584_v33 = vmul.f32 %v7000_v55, %v2572_v29  ;;  %v7001_v48 = vld [vmem:[#allocation71_spill] sm:$0xff]  ;;  %v6357_v54 = vld [vmem:[#allocation3 + $0x3f8] sm:$0xff]  ;;  %v2656_v36 = vld [vmem:[#allocation3 + $0x128] sm:$0xff] }
 0x6d8   : > { %v2535_v32 = vadd.f32 %v2527_v50, %v2507_v3  ;;  %v2536_v31 = vadd.f32 %v2528_v2, %v2508_v17  ;;  %v3207_v38 = vmul.f32 %v6193_v18, %v7001_v48  ;;  %v3208_v28 = vmul.f32 %v7001_v48, %v6349_v60  ;;  %v2627_v9 = vld [vmem:[#allocation3 + $0x29a] sm:$0xff]  ;;  %v2628_v62 = vld [vmem:[#allocation3 + $0x2c2] sm:$0xff] }
 0x6d9   : > { %v3157_v10 = vadd.f32 %v3149_v19, %v3128_v41  ;;  %v3158_v27 = vadd.f32 %v3150_v15, %v3129_v39  ;;  %v7002_v50 = vld [vmem:[#allocation46_spill] sm:$0xff]  ;;  %v7003_v19 = vld [vmem:[#allocation73_spill] sm:$0xff]  ;;  %v2655_v17 = vld [vmem:[#allocation3 + $0x100] sm:$0xff]  ;;  %v2639_v55 = vmul.f32 %v6970_v46, %v2627_v9 }
 0x6da   : > { %v2563_v52 = vadd.f32 %v2555_v5, %v2535_v32  ;;  %v2564_v47 = vadd.f32 %v2556_v45, %v2536_v31  ;;  %v2611_v2 = vmul.f32 %v7002_v50, %v2599_v30  ;;  %v2612_v0 = vmul.f32 %v7002_v50, %v2600_v23  ;;  %v2685_v32 = vld [vmem:[#allocation3 + $0x150] sm:$0xff]  ;;  %v2714_v50 = vld [vmem:[#allocation3 + $0x178] sm:$0xff] }
 0x6db   : > { %v3186_v61 = vadd.f32 %v3178_v49, %v3157_v10  ;;  %v3187_v29 = vadd.f32 %v3179_v11, %v3158_v27  ;;  %v3236_v15 = vmul.f32 %v7003_v19, %v6349_v60  ;;  %v3237_v3 = vmul.f32 %v7003_v19, %v6357_v54 }
 0x6dc   : > { %v2591_v41 = vadd.f32 %v2583_v58, %v2563_v52  ;;  %v2592_v39 = vadd.f32 %v2584_v33, %v2564_v47  ;;  %v2640_v5 = vmul.f32 %v6970_v46, %v2628_v62  ;;  %v2667_v11 = vmul.f32 %v6971_v51, %v2655_v17 }
 0x6dd   : > { %v3215_v45 = vadd.f32 %v3207_v38, %v3186_v61  ;;  %v3216_v30 = vadd.f32 %v3208_v28, %v3187_v29  ;;  %v2668_v31 = vmul.f32 %v6971_v51, %v2656_v36  ;;  %v2696_v58 = vmul.f32 %v6974_v4, %v2656_v36 }
 0x6de   : > { %v2619_v23 = vadd.f32 %v2611_v2, %v2591_v41  ;;  %v2620_v49 = vadd.f32 %v2612_v0, %v2592_v39  ;;  %v2697_v33 = vmul.f32 %v6974_v4, %v2685_v32  ;;  %v2725_v28 = vmul.f32 %v6976_v20, %v2685_v32 }
 0x6df   : > { %v3244_v10 = vadd.f32 %v3236_v15, %v3215_v45  ;;  %v3245_v27 = vadd.f32 %v3237_v3, %v3216_v30  ;;  %v2726_v62 = vmul.f32 %v6976_v20, %v2714_v50  ;;  %v2754_v51 = vmul.f32 %v6977_v63, %v2714_v50 }
 0x6e0   : > { %v2647_v19 = vadd.f32 %v2639_v55, %v2619_v23  ;;  %v2648_v48 = vadd.f32 %v2640_v5, %v2620_v49  ;;  %v2755_v2 = vmul.f32 %v6242_v34, %v6977_v63  ;;  %v2783_v4 = vmul.f32 %v6242_v34, %v6940_v57  ;;  %v2995_v49 = vld [vmem:[#allocation3 + $0x308] sm:$0xff] }
 0x6e1   : > { %v3250_v9 = vpack.c.bf16 %v3245_v27, %v3244_v10  ;;  %v2812_v20 = vmul.f32 %v6251_v21, %v6943_v13  ;;  %v2813_v15 = vmul.f32 %v6260_v22, %v6943_v13  ;;  %v2841_v63 = vmul.f32 %v6260_v22, %v6945_v12  ;;  %v3024_v10 = vld [vmem:[#allocation3 + $0x330] sm:$0xff] }
 0x6e2   : > { %v2675_v46 = vadd.f32 %v2667_v11, %v2647_v19  ;;  %v2676_v38 = vadd.f32 %v2668_v31, %v2648_v48  ;;  %v2784_v48 = vmul.f32 %v6251_v21, %v6940_v57  ;;  %v2842_v36 = vmul.f32 %v6269_v37, %v6945_v12 }
 0x6e3   : > { %3813 = vmatprep.mubr.bf16.mxu1 %v3250_v9  ;;  %v2870_v57 = vmul.f32 %v6269_v37, %v6947_v16  ;;  %v2871_v39 = vmul.f32 %v6947_v16, %v6129_v14  ;;  %v2899_v13 = vmul.f32 %v6948_v40, %v6129_v14  ;;  %v2900_v5 = vmul.f32 %v6948_v40, %v6131_v53  ;;  %v2966_v37 = vld [vmem:[#allocation3 + $0x2e0] sm:$0xff] }
 0x6e4   : > { %v2704_v52 = vadd.f32 %v2696_v58, %v2675_v46  ;;  %v2705_v47 = vadd.f32 %v2697_v33, %v2676_v38  ;;  %v2928_v12 = vmul.f32 %v5814_v8, %v6131_v53  ;;  %v2929_v30 = vmul.f32 %v6157_v6, %v5814_v8  ;;  %v3053_v33 = vld [vmem:[#allocation3 + $0x358] sm:$0xff] }
 0x6e5   : > { %v2948_v16 = vmul.f32 %v6157_v6, %v5818_v26  ;;  %v2949_v14 = vmul.f32 %v6159_v35, %v5818_v26  ;;  %v2977_v31 = vmul.f32 %v6159_v35, %v5891_v7  ;;  %v2978_v53 = vmul.f32 %v5891_v7, %v2966_v37 }
 0x6e6   : > { %v2733_v0 = vadd.f32 %v2725_v28, %v2704_v52  ;;  %v2734_v61 = vadd.f32 %v2726_v62, %v2705_v47  ;;  %v3006_v50 = vmul.f32 %v6950_v1, %v2966_v37  ;;  %v3007_v58 = vmul.f32 %v6950_v1, %v2995_v49  ;;  %v3320_v37 = vld [vmem:[#allocation2 + $0x80] sm:$0xff] }
 0x6e7   : > { %v3035_v26 = vmul.f32 %v6984_v43, %v2995_v49  ;;  %v3036_v46 = vmul.f32 %v6984_v43, %v3024_v10  ;;  %v3064_v35 = vmul.f32 %v6988_v44, %v3024_v10  ;;  %v3065_v7 = vmul.f32 %v6988_v44, %v3053_v33 }
 0x6e8   : > { %v2762_v29 = vadd.f32 %v2754_v51, %v2733_v0  ;;  %v2763_v19 = vadd.f32 %v2755_v2, %v2734_v61  ;;  %v3093_v47 = vmul.f32 %v6991_v24, %v3053_v33  ;;  %v3094_v1 = vmul.f32 %v6185_v59, %v6991_v24  ;;  %v3323_v33 = vld [vmem:[#allocation2 + $0xc8] sm:$0xff] }
 0x6e9   : > { %v3122_v0 = vmul.f32 %v6185_v59, %v6995_v56  ;;  %v3123_v43 = vmul.f32 %v6193_v18, %v6995_v56  ;;  %v3151_v44 = vmul.f32 %v6193_v18, %v6997_v25  ;;  %v3180_v24 = vmul.f32 %v6349_v60, %v6999_v42 }
 0x6ea   : > { %v2791_v3 = vadd.f32 %v2783_v4, %v2762_v29  ;;  %v2792_v17 = vadd.f32 %v2784_v48, %v2763_v19  ;;  %v3152_v48 = vmul.f32 %v6349_v60, %v6997_v25  ;;  %v3198_v29 = vld [vmem:[#allocation3 + $0x420] sm:$0xff]  ;;  %v3181_v59 = vmul.f32 %v6357_v54, %v6999_v42  ;;  %v7005_v25 = vld [vmem:[#allocation73_spill] sm:$0xff] }
 0x6ec   : > { %v2820_v34 = vadd.f32 %v2812_v20, %v2791_v3  ;;  %v2821_v41 = vadd.f32 %v2813_v15, %v2792_v17  ;;  %v3227_v15 = vld [vmem:[#allocation3 + $0x448] sm:$0xff]  ;;  %v7004_v17 = vld [vmem:[#allocation71_spill] sm:$0xff] }
 0x6ed   : > { %v3210_v18 = vmul.f32 %v7004_v17, %v3198_v29 }
 0x6ee   : > { %v2849_v21 = vadd.f32 %v2841_v63, %v2820_v34  ;;  %v2850_v55 = vadd.f32 %v2842_v36, %v2821_v41  ;;  %v3209_v63 = vmul.f32 %v6357_v54, %v7004_v17  ;;  %v3238_v41 = vmul.f32 %v7005_v25, %v3198_v29 }
 0x6f0   : > { %v2878_v22 = vadd.f32 %v2870_v57, %v2849_v21  ;;  %v2879_v45 = vadd.f32 %v2871_v39, %v2850_v55  ;;  %v3239_v57 = vmul.f32 %v7005_v25, %v3227_v15 }
 0x6f2   : > { %v2907_v32 = vadd.f32 %v2899_v13, %v2878_v22  ;;  %v2908_v23 = vadd.f32 %v2900_v5, %v2879_v45  ;;  %v7006_v5 = vld [vmem:[#allocation36_spill] sm:$0xff] }
 0x6f4   : > { %v2936_v11 = vadd.f32 %v2928_v12, %v2907_v32  ;;  %v2937_v40 = vadd.f32 %v2929_v30, %v2908_v23  ;;  %v3319_v12 = vld [vmem:[#allocation2 + $0x68] sm:$0xff] }
 0x6f6   : > { %v2956_v27 = vadd.f32 %v2948_v16, %v2936_v11  ;;  %v2957_v8 = vadd.f32 %v2949_v14, %v2937_v40  ;;  %v3317_v16 = vld [vmem:[#allocation2 + $0x38] sm:$0xff]  ;;  %v3318_v14 = vld [vmem:[#allocation2 + $0x50] sm:$0xff] }
 0x6f8   : > { %v2985_v6 = vadd.f32 %v2977_v31, %v2956_v27  ;;  %v2986_v9 = vadd.f32 %v2978_v53, %v2957_v8 }
 0x6fa   : > { %v3014_v38 = vadd.f32 %v3006_v50, %v2985_v6  ;;  %v3015_v28 = vadd.f32 %v3007_v58, %v2986_v9 }
 0x6fc   : > { %v3043_v62 = vadd.f32 %v3035_v26, %v3014_v38  ;;  %v3044_v52 = vadd.f32 %v3036_v46, %v3015_v28  ;;  %v3324_v26 = vld [vmem:[#allocation2 + $0xe0] sm:$0xff]  ;;  %v3321_v46 = vld [vmem:[#allocation2 + $0x98] sm:$0xff] }
 0x6fe   : > { %v3072_v51 = vadd.f32 %v3064_v35, %v3043_v62  ;;  %v3073_v2 = vadd.f32 %v3065_v7, %v3044_v52  ;;  %v3322_v35 = vld [vmem:[#allocation2 + $0xb0] sm:$0xff] }
 0x700   : > { %v3101_v61 = vadd.f32 %v3093_v47, %v3072_v51  ;;  %v3102_v4 = vadd.f32 %v3094_v1, %v3073_v2 }
 0x702   : > { %v3130_v19 = vadd.f32 %v3122_v0, %v3101_v61  ;;  %v3131_v20 = vadd.f32 %v3123_v43, %v3102_v4 }
 0x704   : > { %v3159_v3 = vadd.f32 %v3151_v44, %v3130_v19  ;;  %v3160_v56 = vadd.f32 %v3152_v48, %v3131_v20 }
 0x706   : > { %v3188_v36 = vadd.f32 %v3180_v24, %v3159_v3  ;;  %v3189_v34 = vadd.f32 %v3181_v59, %v3160_v56 }
 0x708   : > { %v3217_v39 = vadd.f32 %v3209_v63, %v3188_v36  ;;  %v3218_v21 = vadd.f32 %v3210_v18, %v3189_v34 }
 0x70a   : > { %v3246_v60 = vadd.f32 %v3238_v41, %v3217_v39  ;;  %v3247_v55 = vadd.f32 %v3239_v57, %v3218_v21 }
 0x70c   : > { %v3251_v13 = vpack.c.bf16 %v3247_v55, %v3246_v60 }
 0x70e   : > { %3814 = vmatmul.mubr.bf16.gmra.mrb[8].mxu1 %v3251_v13 }
 0x78c   : > { %v3811_v42 = vpop.f32.mrb[4].mxu1 }
 0x78d   : > { %v3295_v22 = vadd.f32 %v3811_v42, %v7006_v5  ;;  %v3286_v45 = vpop.f32.mrb[5].mxu1 }
 0x78e   : > { %v3287_v54 = vadd.f32 %v7006_v5, %v3286_v45  ;;  %v3812_v30 = vpop.f32.mrb[6].mxu1 }
 0x78f   : > { %v3298_v32 = vadd.f32 %v3812_v30, %v7006_v5  ;;  %v3289_v23 = vpop.f32.mrb[7].mxu1  ;;  %v3327_v11 = vmul.f32 %v3319_v12, %v3295_v22 }
 0x790   : > { %v3290_v49 = vadd.f32 %v7006_v5, %v3289_v23  ;;  %v3325_v31 = vmul.f32 %v3317_v16, %v3287_v54 }
 0x791   : > { %v3328_v40 = vmul.f32 %v3320_v37, %v3298_v32 }
 0x792   : > { %v3326_v53 = vmul.f32 %v3318_v14, %v3290_v49 }
 0x793   : > { %v3334_v10 = vpack.c.bf16 %v3328_v40, %v3327_v11 }
 0x794   : > { %v3333_v27 = vpack.c.bf16 %v3326_v53, %v3325_v31 }
 0x796   : > { %3833 = vmatprep.mubr.bf16.mxu0 %v3333_v27 }
 0x797   : > { %3834 = vmatmul.mubr.bf16.vlgmr.msra.gmra.mrb[4].mxu0 %v3334_v10 }
 0x7e1   : > { %v3815_v8 = vpop.f32.mrb[8].mxu1 }
 0x7e2   : > { %v3311_v50 = vadd.f32 %v3815_v8, %v7006_v5  ;;  %v3302_v58 = vpop.f32.mrb[9].mxu1 }
 0x7e3   : > { %v3303_v6 = vadd.f32 %v7006_v5, %v3302_v58  ;;  %v3816_v9 = vpop.f32.mrb[10].mxu1 }
 0x7e4   : > { %v3314_v38 = vadd.f32 %v3816_v9, %v7006_v5  ;;  %v3305_v28 = vpop.f32.mrb[11].mxu1  ;;  %v3331_v62 = vmul.f32 %v3323_v33, %v3311_v50 }
 0x7e5   : > { %v3306_v7 = vadd.f32 %v7006_v5, %v3305_v28  ;;  %v3329_v47 = vmul.f32 %v3321_v46, %v3303_v6 }
 0x7e6   : > { %v3332_v52 = vmul.f32 %v3324_v26, %v3314_v38 }
 0x7e7   : > { %v3330_v1 = vmul.f32 %v3322_v35, %v3306_v7 }
 0x7e8   : > { %v3336_v51 = vpack.c.bf16 %v3332_v52, %v3331_v62 }
 0x7e9   : > { %v3335_v2 = vpack.c.bf16 %v3330_v1, %v3329_v47 }
 0x7eb   : > { %3837 = vmatprep.mubr.bf16.mxu1 %v3335_v2 }
 0x7ec   : > { %3838 = vmatmul.mubr.bf16.vlgmr.msra.gmra.mrb[12].mxu1 %v3336_v51 }
 0x86a   : > { %v3835_v0 = vpop.f32.mrb[4].mxu0 }
 0x86b   : > { %v3380_v43 = vadd.f32 %v3835_v0, %v7006_v5  ;;  %v3371_v61 = vpop.f32.mrb[5].mxu0 }
 0x86c   : > { %v3372_v4 = vadd.f32 %v7006_v5, %v3371_v61  ;;  %v3836_v44 = vpop.f32.mrb[6].mxu0 }
 0x86d   : > { %3404 = vst [vmem:[%s4896_s26 + $0x10] sm:$0xff] %v3380_v43  ;;  %v3383_v48 = vadd.f32 %v3836_v44, %v7006_v5  ;;  %v3374_v29 = vpop.f32.mrb[7].mxu0 }
 0x86e   : > { %3402 = vst [vmem:[%s4896_s26] sm:$0xff] %v3372_v4  ;;  %v3375_v19 = vadd.f32 %v7006_v5, %v3374_v29 }
 0x86f   : > { %3405 = vst [vmem:[%s4896_s26 + $0x18] sm:$0xff] %v3383_v48 }
 0x870   : > { %3403 = vst [vmem:[%s4896_s26 + $0x8] sm:$0xff] %v3375_v19 }
 0x8bf   : > { %v3839_v20 = vpop.f32.mrb[12].mxu1 }
 0x8c0   : > { %v3396_v24 = vadd.f32 %v3839_v20, %v7006_v5  ;;  %v3387_v59 = vpop.f32.mrb[13].mxu1 }
 0x8c1   : > { %v3388_v15 = vadd.f32 %v7006_v5, %v3387_v59  ;;  %v3840_v3 = vpop.f32.mrb[14].mxu1 }
 0x8c2   : > { %3408 = vst [vmem:[%s4896_s26 + $0x30] sm:$0xff] %v3396_v24  ;;  %v3399_v56 = vadd.f32 %v3840_v3, %v7006_v5  ;;  %v3390_v17 = vpop.f32.mrb[15].mxu1 }
 0x8c3   : > { %3406 = vst [vmem:[%s4896_s26 + $0x20] sm:$0xff] %v3388_v15  ;;  %v3391_v63 = vadd.f32 %v7006_v5, %v3390_v17 }
 0x8c4   : > { %3409 = vst [vmem:[%s4896_s26 + $0x38] sm:$0xff] %v3399_v56 }
 0x8c5   : > { %3407 = vst [vmem:[%s4896_s26 + $0x28] sm:$0xff] %v3391_v63 }
 0x8c6   : > { %4282 = shalt.err (!%p4279_p9)
}
 0x8c7   : > { %s4283_s15 = scalar_lea.hbm %s6458_s30, 1024  ;;  %s4287_s18 = scalar_lea.hbm %s6521_s12, 2048 }
 0x8c8   : > { %p4284_p13 = scmp.ne.s32.totalorder %s6458_s30, %s4283_s15  ;;  %p4288_p3 = scmp.lt.u32.totalorder %s6458_s30, %s6521_s12 }
 0x8c9   : > { %p4289_p4 = scmp.lt.u32.totalorder %s4287_s18, %s4283_s15  ;;  %p4291_p8 = scmp.lt.u32.totalorder %s4283_s15, %s6458_s30 }
 0x8ca   : > { %p4285_p10 = pnand %p4284_p13, %p7007_p12 }
 0x8cb   : > { %p4290_p7 = por %p4289_p4, %p4288_p3 }
 0x8cc   : > { %p4286_p11 = pneg %p4285_p10 }
 0x8cd   : > { %p4292_p0 = por %p4291_p8, %p4290_p7 }
 0x8cf   : > { %p4293_p1 = pnand %p4292_p0, %p4286_p11 }
 0x8d1   : > { %4296 = shalt.err (!%p4293_p1)
}
 0x8d2   : > { %s4394_s5 = smov 128   ;;  %s4395_s29 = smov 8  }
 0x8d3   : > { %3921 = dma.vmem_to_hbm [thread:$0]  (%p7007_p12), %s6460_s19, 1024, %s6458_s30, %s6468_s25, %s4394_s5, %s4394_s5, %s4395_s29  }
 0x8d4 PF: > { %s7008_s23 = sld [smem:[#allocation24_spill]]  ;;  %s7009_s28 = sld [smem:[#allocation22_spill]] }
 0x8d5   : > { %s7010_s2 = sld [smem:[#allocation27_spill]] }
 0x8da   : > { %p3963_p2 = scmp.ge.s32.totalorder %s7008_s23, 2  ;;  %s3439_s16 = sand.u32 1, %s7009_s28  }
 0x8db   : > { %p7011_p6 = scmp.ne.s32.totalorder %s7010_s2, 0  ;;  %s3440_s14 = scalar_lea.sflag [#allocation6], %s3439_s16 }
 0x8dd   : > { %p3946_p5 = pnand %p3963_p2, %p7011_p6 }
 0x8df   : > { %4342 = dma.done.wait (!%p3946_p5), %s3440_s14, 1024  }
 0x8e0   : > { %4344 = vsyncadd (!%p3946_p5), %s3440_s14, 4294966272  ;;  %s7012_s24 = sld [smem:[#allocation25_spill]]  ;;  %s7013_s27 = sld [smem:[#allocation23_spill]] }
 0x8e1   : > { %s7014_s23 = sld [smem:[#allocation26_spill]]  ;;  %s7015_s21 = smov %s4351_s22 }
 0x8e6   : > { %p26_p9 = scmp.ge.s32.totalorder %s7012_s24, 4   ;;  %s7016_s22 = smov %s7013_s27 }
 0x8e8   :  { %28 = sbr.rel (!%p26_p9) target bundleno = 10 (0xa), region = 182 }
 0x8ef   :  { %3445 = vsyncpa [#allocation5], 1 }
 0x8f0   :  { %3447 = vsyncpa [#allocation5 + $0x1], 1 }
 0x8f1   :  { %3448 = vsyncpa [#allocation8], 1 }
 0x8f2   :  { %3449 = vsyncpa [#allocation11], 1 }
 0x8f3   :  { %3450 = vsyncpa [#allocation14], 1 }
 0x8f4   :  { %3451 = vsyncpa [#allocation6], 1 }
 0x8f5   :  { %3453 = vsyncpa [#allocation6 + $0x1], 1 }

</bundles_post_ra>
